<compile_context>
chip_gen: v6e
topology: v6e:2x2x1
jax: 0.10.0
libtpu: 0.0.40
codegen_flags: <defaults>
</compile_context>

<pallas_src>
import functools

import jax
import jax.numpy as jnp
from jax.experimental import pallas as pl
from jax.experimental.pallas import tpu as pltpu


# ----------------------------------------------------------------------------
# Pallas kernels
# ----------------------------------------------------------------------------

def _conv1_kernel(cols_ref, w_ref, b_ref, o_ref):
    """leaky_relu(cols @ W + b) for one branch (grid axis = branch index)."""
    h = jnp.dot(cols_ref[0], w_ref[0], preferred_element_type=jnp.float32)
    h = h + b_ref[0]                                  # (1, C) broadcasts
    o_ref[0] = jnp.where(h >= 0, h, 0.01 * h)         # torch LeakyReLU slope 0.01


def conv1_pallas(cols_all, w1_all, b1_all):
    """cols_all: (2, M, K); w1_all: (2, K, C); b1_all: (2, 1, C) -> (2, M, C)."""
    nb, m, k = cols_all.shape
    c = w1_all.shape[-1]
    return pl.pallas_call(
        _conv1_kernel,
        out_shape=jax.ShapeDtypeStruct((nb, m, c), jnp.float32),
        grid_spec=pltpu.PrefetchScalarGridSpec(
            num_scalar_prefetch=0,
            grid=(nb,),
            in_specs=[
                pl.BlockSpec((1, m, k), lambda b: (b, 0, 0)),
                pl.BlockSpec((1, k, c), lambda b: (b, 0, 0)),
                pl.BlockSpec((1, 1, c), lambda b: (b, 0, 0)),
            ],
            out_specs=pl.BlockSpec((1, m, c), lambda b: (b, 0, 0)),
        ),
        compiler_params=pltpu.CompilerParams(
            dimension_semantics=("parallel",)),  # rgb/lwir on separate TCs (v7x)
    )(cols_all, w1_all, b1_all)


def _softplus(x):
    # stable softplus built only from exp/log/abs/max (EUP + VPU ops)
    return jnp.maximum(x, 0.0) + jnp.log(1.0 + jnp.exp(-jnp.abs(x)))


def _tail_loss_kernel(h1_ref, w2_ref, b2_ref, wfc_ref, bfc_ref, eps_ref, o_ref,
                      *, latent):
    """conv2 (as dense matmul) + concatenated fc1/fc2 + tanh + KL/BCE loss."""

    def branch(b):
        h1 = h1_ref[b]                                           # (batch, P*C)
        h2 = jnp.dot(h1, w2_ref[b],
                     preferred_element_type=jnp.float32) + b2_ref[b]
        mv = jnp.dot(h2, wfc_ref[b],
                     preferred_element_type=jnp.float32) + bfc_ref[b]
        mv = jnp.tanh(mv)                                        # (batch, 2*latent)
        return mv[:, :latent], mv[:, latent:]

    mu_r, lv_r = branch(0)          # rgb
    mu_l, lv_l = branch(1)          # lwir
    eps_r = eps_ref[0]
    eps_l = eps_ref[1]
    batch = mu_r.shape[0]

    # reparametrize: z = eps * exp(0.5 * logvar) + mu
    z_r = eps_r * jnp.exp(0.5 * lv_r) + mu_r
    z_l = eps_l * jnp.exp(0.5 * lv_l) + mu_l

    # KL( N(mu_p+2, exp(lv_p+2)) || N(mu_q+2, exp(lv_q+2)) ); Independent(...,1)
    # sums the event dim, weighted_loss default reduction is mean over batch.
    # Algebraic form: log_var_ratio = 2(lv_p - lv_q);
    #                 t1 = (mu_p - mu_q)^2 * exp(-2(lv_q + 2)).
    def kl_sum(mu_p, lv_p, mu_q, lv_q):
        log_vr = 2.0 * (lv_p - lv_q)
        t1 = (mu_p - mu_q) ** 2 * jnp.exp(-2.0 * (lv_q + 2.0))
        return 0.5 * jnp.sum(jnp.exp(log_vr) + t1 - 1.0 - log_vr)

    bi_di_kld = (kl_sum(mu_r, lv_r, mu_l, lv_l)
                 + kl_sum(mu_l, lv_l, mu_r, lv_r)) / batch

    # BCE(sigmoid(z_pred), sigmoid(z_tgt)) with torch's -100 clamp, using
    # log(sigmoid(z)) = -softplus(-z) and log(1 - sigmoid(z)) = -softplus(z).
    def bce_sum(z_pred, z_tgt):
        tgt = jax.nn.sigmoid(z_tgt)
        log_p = jnp.maximum(-_softplus(-z_pred), -100.0)
        log_1p = jnp.maximum(-_softplus(z_pred), -100.0)
        return -jnp.sum(tgt * log_p + (1.0 - tgt) * log_1p)

    o_ref[0] = bce_sum(z_r, z_l) + bce_sum(z_l, z_r) - bi_di_kld


def tail_loss_pallas(h1_all, w2_all, b2_all, wfc_all, bfc_all, eps_all):
    latent = wfc_all.shape[-1] // 2
    out = pl.pallas_call(
        functools.partial(_tail_loss_kernel, latent=latent),
        out_shape=jax.ShapeDtypeStruct((1,), jnp.float32),
        in_specs=[pl.BlockSpec(memory_space=pltpu.MemorySpace.VMEM)] * 6,
        out_specs=pl.BlockSpec(memory_space=pltpu.MemorySpace.SMEM),
    )(h1_all, w2_all, b2_all, wfc_all, bfc_all, eps_all)
    return out[0]


# ----------------------------------------------------------------------------
# Glue: im2col (no transpose of the patches tensor) and the fused forward.
# ----------------------------------------------------------------------------

def _im2col_k4s2p1(x_nchw):
    """(N, C, H, W) -> (N*Ho*Wo, 16*C) with K order (kh, kw, c).

    Only the small raw input is permuted to NHWC; the (kh, kw, c) K-order is
    matched by permuting the constant conv weight at prepare time instead of
    transposing the large patches tensor.
    """
    n, c, h, w = x_nchw.shape
    k, s, p = 4, 2, 1
    ho = (h + 2 * p - k) // s + 1
    wo = (w + 2 * p - k) // s + 1
    x = jnp.transpose(x_nchw, (0, 2, 3, 1))               # NHWC (small)
    xp = jnp.pad(x, ((0, 0), (p, p), (p, p), (0, 0)))
    pieces = [xp[:, i:i + s * ho:s, j:j + s * wo:s, :]
              for i in range(k) for j in range(k)]
    cols = jnp.concatenate(pieces, axis=-1)               # (n, ho, wo, 16*c)
    return cols.reshape(n * ho * wo, k * k * c), ho, wo


def _conv_w_to_im2col(w):
    """torch OIHW conv weight -> (k*k*Cin, Cout) with K order (kh, kw, cin)."""
    cout, cin, kh, kw = w.shape
    return jnp.transpose(w, (2, 3, 1, 0)).reshape(kh * kw * cin, cout)


def _conv_to_dense(w, in_hw, stride=2, pad=1):
    """Express Conv2d(k=4, s=2, p=1) over an (in_hw, in_hw) map as a dense
    matrix: rows indexed (ih, iw, cin) — matching conv1's (n, oh, ow, c) output
    flattened per image — and columns indexed (cout, oh, ow) — matching torch's
    NCHW .view(-1, C*4*4) flattening.  Built once at prepare time (constant)."""
    cout, cin, k, _ = w.shape
    out_hw = (in_hw + 2 * pad - k) // stride + 1
    dense = jnp.zeros((in_hw, in_hw, cin, cout, out_hw, out_hw), jnp.float32)
    for kh in range(k):
        for kw in range(k):
            wt = jnp.transpose(w[:, :, kh, kw])            # (cin, cout)
            for oh in range(out_hw):
                ih = stride * oh - pad + kh
                if not 0 <= ih < in_hw:
                    continue
                for ow in range(out_hw):
                    iw = stride * ow - pad + kw
                    if not 0 <= iw < in_hw:
                        continue
                    dense = dense.at[ih, iw, :, :, oh, ow].set(wt)
    return dense.reshape(in_hw * in_hw * cin, cout * out_hw * out_hw), out_hw


def prepare_params(params, feat_hw=16):
    """Fold every layout permutation into constant weights; call once."""
    hw1 = (feat_hw + 2 - 4) // 2 + 1                       # spatial after conv1
    w1 = jnp.stack([_conv_w_to_im2col(params["layer1_w"]),
                    _conv_w_to_im2col(params["layer2_w"])])
    b1 = jnp.stack([params["layer1_b"], params["layer2_b"]])[:, None, :]
    w2_r, hw2 = _conv_to_dense(params["layer3_w"], hw1)
    w2_l, _ = _conv_to_dense(params["layer4_w"], hw1)
    w2 = jnp.stack([w2_r, w2_l])
    b2 = jnp.stack([jnp.repeat(params["layer3_b"], hw2 * hw2),
                    jnp.repeat(params["layer4_b"], hw2 * hw2)])[:, None, :]
    wfc = jnp.stack([
        jnp.concatenate([params["fc1_rgb_w"].T, params["fc2_rgb_w"].T], axis=1),
        jnp.concatenate([params["fc1_lwir_w"].T, params["fc2_lwir_w"].T], axis=1)])
    bfc = jnp.stack([
        jnp.concatenate([params["fc1_rgb_b"], params["fc2_rgb_b"]]),
        jnp.concatenate([params["fc1_lwir_b"], params["fc2_lwir_b"]])])[:, None, :]
    return {"w1": w1, "b1": b1, "w2": w2, "b2": b2, "wfc": wfc, "bfc": bfc}


def mutual_info_loss(rgb_feat, lwir_feat, prepared, eps_rgb, eps_lwir):
    n = rgb_feat.shape[0]
    channels = prepared["w1"].shape[-1]
    # im2col for both branches in one shot; row order stays (branch, n, oh, ow).
    x_all = jnp.concatenate([rgb_feat, lwir_feat], axis=0)       # (2n, C, H, W)
    cols, ho, wo = _im2col_k4s2p1(x_all)                         # (2n*ho*wo, K)
    cols_all = cols.reshape(2, n * ho * wo, -1)
    # conv1 + leaky relu: one branch-parallel Pallas call.
    h1 = conv1_pallas(cols_all, prepared["w1"], prepared["b1"])  # (2, n*ho*wo, C)
    # per-image flatten is a pure row-major reshape (no transpose, ~16 KiB).
    h1 = h1.reshape(2, n, ho * wo * channels)
    eps_all = jnp.stack([eps_rgb, eps_lwir])
    # conv2 + fc + tanh + reparam + KL/BCE loss: one fused Pallas call.
    return tail_loss_pallas(h1, prepared["w2"], prepared["b2"],
                            prepared["wfc"], prepared["bfc"], eps_all)


# ----------------------------------------------------------------------------
# Pure-JAX reference (verification only)
# ----------------------------------------------------------------------------

def reference_forward(rgb, lwir, params, eps_r, eps_l):
    def conv(x, w, b):
        y = jax.lax.conv_general_dilated(
            x, w, window_strides=(2, 2), padding=((1, 1), (1, 1)),
            dimension_numbers=("NCHW", "OIHW", "NCHW"))
        return y + b[None, :, None, None]

    def leaky(x):
        return jnp.where(x >= 0, x, 0.01 * x)

    r = conv(leaky(conv(rgb, params["layer1_w"], params["layer1_b"])),
             params["layer3_w"], params["layer3_b"])
    l = conv(leaky(conv(lwir, params["layer2_w"], params["layer2_b"])),
             params["layer4_w"], params["layer4_b"])
    r = r.reshape(r.shape[0], -1)
    l = l.reshape(l.shape[0], -1)

    mu_r = jnp.tanh(r @ params["fc1_rgb_w"].T + params["fc1_rgb_b"])
    lv_r = jnp.tanh(r @ params["fc2_rgb_w"].T + params["fc2_rgb_b"])
    mu_l = jnp.tanh(l @ params["fc1_lwir_w"].T + params["fc1_lwir_b"])
    lv_l = jnp.tanh(l @ params["fc2_lwir_w"].T + params["fc2_lwir_b"])

    z_r = eps_r * jnp.exp(0.5 * lv_r) + mu_r
    z_l = eps_l * jnp.exp(0.5 * lv_l) + mu_l
    loc_r, loc_l = mu_r + 2.0, mu_l + 2.0
    sc_r, sc_l = jnp.exp(lv_r + 2.0), jnp.exp(lv_l + 2.0)

    def kl(lp, sp, lq, sq):
        vr = (sp / sq) ** 2
        return 0.5 * (vr + ((lp - lq) / sq) ** 2 - 1.0 - jnp.log(vr))

    b = mu_r.shape[0]
    bi = jnp.sum(kl(loc_r, sc_r, loc_l, sc_l)) / b + \
         jnp.sum(kl(loc_l, sc_l, loc_r, sc_r)) / b
    p_r, p_l = jax.nn.sigmoid(z_r), jax.nn.sigmoid(z_l)

    def bce(pred, tgt):
        return -jnp.sum(tgt * jnp.maximum(jnp.log(pred), -100.0)
                        + (1 - tgt) * jnp.maximum(jnp.log(1 - pred), -100.0))

    return bce(p_r, p_l) + bce(p_l, p_r) - bi


# ----------------------------------------------------------------------------
# Deterministic parameter init + demo
# ----------------------------------------------------------------------------

def init_params(key, in_ch, channels, latent):
    names_shapes = [
        ("layer1_w", (channels, in_ch, 4, 4)), ("layer1_b", (channels,)),
        ("layer2_w", (channels, in_ch, 4, 4)), ("layer2_b", (channels,)),
        ("layer3_w", (channels, channels, 4, 4)), ("layer3_b", (channels,)),
        ("layer4_w", (channels, channels, 4, 4)), ("layer4_b", (channels,)),
        ("fc1_rgb_w", (latent, channels * 16)), ("fc1_rgb_b", (latent,)),
        ("fc2_rgb_w", (latent, channels * 16)), ("fc2_rgb_b", (latent,)),
        ("fc1_lwir_w", (latent, channels * 16)), ("fc1_lwir_b", (latent,)),
        ("fc2_lwir_w", (latent, channels * 16)), ("fc2_lwir_b", (latent,)),
    ]
    keys = jax.random.split(key, len(names_shapes))
    return {name: 0.05 * jax.random.normal(k, shape, jnp.float32)
            for (name, shape), k in zip(names_shapes, keys)}


if __name__ == "__main__":
    # Two stride-2 convs take 16x16 spatial down to 4x4, matching the
    # channels*4*4 fc input the module expects.
    batch, in_ch, channels, latent = 2, 32, 16, 16

    key = jax.random.PRNGKey(0)
    k_rgb, k_lwir, k_eps_r, k_eps_l, k_params = jax.random.split(key, 5)

    rgb_feat = jax.random.normal(k_rgb, (batch, in_ch, 16, 16), jnp.float32)
    lwir_feat = jax.random.normal(k_lwir, (batch, in_ch, 16, 16), jnp.float32)
    # TODO(synk): torch.cuda.FloatTensor(...).normal_() is a stateful RNG draw;
    # replaced with deterministic jax.random normals drawn outside the kernel.
    eps_rgb = jax.random.normal(k_eps_r, (batch, latent), jnp.float32)
    eps_lwir = jax.random.normal(k_eps_l, (batch, latent), jnp.float32)

    params = init_params(k_params, in_ch, channels, latent)
    prepared = prepare_params(params, feat_hw=16)   # once, outside the forward

    loss_fn = jax.jit(mutual_info_loss)
    loss = jax.block_until_ready(
        loss_fn(rgb_feat, lwir_feat, prepared, eps_rgb, eps_lwir))

    ref = jax.block_until_ready(
        reference_forward(rgb_feat, lwir_feat, params, eps_rgb, eps_lwir))
    assert jnp.allclose(loss, ref, rtol=1e-2, atol=1e-2), (loss, ref)

    print("KERNEL_OK")
</pallas_src>

<mosaic_0001>
module attributes {stable_mosaic.version = 11 : i64} {
  func.func @_conv1_kernel(%arg0: i32, %arg1: memref<1x128x512xf32, #tpu.memory_space<vmem>>, %arg2: memref<1x512x16xf32, #tpu.memory_space<vmem>>, %arg3: memref<1x1x16xf32, #tpu.memory_space<vmem>>, %arg4: memref<1x128x16xf32, #tpu.memory_space<vmem>>) attributes {dimension_semantics = [#tpu.dimension_semantics<parallel>], iteration_bounds = array<i64: 2>, scalar_prefetch = 0 : i64, scratch_operands = 0 : i64, tpu.core_type = #tpu.core_type<tc>, window_params = [{transform_indices = @transform_0, window_bounds = array<i64: 1, 128, 512>}, {transform_indices = @transform_1, window_bounds = array<i64: 1, 512, 16>}, {transform_indices = @transform_2, window_bounds = array<i64: 1, 1, 16>}, {transform_indices = @transform_3, window_bounds = array<i64: 1, 128, 16>}]} {
    %c0 = arith.constant 0 : index
    %c0_0 = arith.constant 0 : index
    %c0_1 = arith.constant 0 : index
    %0 = vector.load %arg1[%c0, %c0_0, %c0_1] : memref<1x128x512xf32, #tpu.memory_space<vmem>>, vector<1x128x512xf32>
    %1 = vector.shape_cast %0 : vector<1x128x512xf32> to vector<128x512xf32>
    %c0_2 = arith.constant 0 : index
    %c0_3 = arith.constant 0 : index
    %c0_4 = arith.constant 0 : index
    %2 = vector.load %arg2[%c0_2, %c0_3, %c0_4] : memref<1x512x16xf32, #tpu.memory_space<vmem>>, vector<1x512x16xf32>
    %3 = vector.shape_cast %2 : vector<1x512x16xf32> to vector<512x16xf32>
    %cst = arith.constant dense<0.000000e+00> : vector<128x16xf32>
    %4 = tpu.matmul %1, %3, %cst {dimension_numbers = #tpu.dot_dimension_numbers<[1], [0], [0], [1], [0, 0, 1, 1], [], []>} : vector<128x512xf32>, vector<512x16xf32>, vector<128x16xf32> -> vector<128x16xf32>
    %c0_5 = arith.constant 0 : index
    %c0_6 = arith.constant 0 : index
    %c0_7 = arith.constant 0 : index
    %5 = vector.load %arg3[%c0_5, %c0_6, %c0_7] : memref<1x1x16xf32, #tpu.memory_space<vmem>>, vector<1x1x16xf32>
    %6 = vector.shape_cast %5 : vector<1x1x16xf32> to vector<1x16xf32>
    %7 = vector.broadcast %6 : vector<1x16xf32> to vector<128x16xf32>
    %8 = arith.addf %4, %7 : vector<128x16xf32>
    %cst_8 = arith.constant 0.000000e+00 : f32
    %9 = vector.broadcast %cst_8 : f32 to vector<128x16xf32>
    %10 = arith.cmpf oge, %8, %9 : vector<128x16xf32>
    %cst_9 = arith.constant 0.00999999977 : f32
    %11 = vector.broadcast %cst_9 : f32 to vector<128x16xf32>
    %12 = arith.mulf %11, %8 : vector<128x16xf32>
    %13 = arith.select %10, %8, %12 : vector<128x16xi1>, vector<128x16xf32>
    %c0_10 = arith.constant 0 : index
    %c0_11 = arith.constant 0 : index
    %c0_12 = arith.constant 0 : index
    %14 = vector.load %arg4[%c0_10, %c0_11, %c0_12] : memref<1x128x16xf32, #tpu.memory_space<vmem>>, vector<1x128x16xf32>
    %15 = vector.shape_cast %14 : vector<1x128x16xf32> to vector<128x16xf32>
    %16 = vector.shape_cast %13 : vector<128x16xf32> to vector<1x128x16xf32>
    tpu.vector_store %arg4[%c0_10, %c0_11, %c0_12], %16 {strides = array<i32>} : memref<1x128x16xf32, #tpu.memory_space<vmem>>, vector<1x128x16xf32>,
    return
  }
  func.func @transform_0(%arg0: i32) -> (i32, i32, i32) {
    %c0_i32 = arith.constant 0 : i32
    %c0_i32_0 = arith.constant 0 : i32
    %c0_i32_1 = arith.constant 0 : i32
    return %arg0, %c0_i32, %c0_i32_0 : i32, i32, i32
  }
  func.func @transform_1(%arg0: i32) -> (i32, i32, i32) {
    %c0_i32 = arith.constant 0 : i32
    %c0_i32_0 = arith.constant 0 : i32
    %c0_i32_1 = arith.constant 0 : i32
    return %arg0, %c0_i32, %c0_i32_0 : i32, i32, i32
  }
  func.func @transform_2(%arg0: i32) -> (i32, i32, i32) {
    %c0_i32 = arith.constant 0 : i32
    %c0_i32_0 = arith.constant 0 : i32
    %c0_i32_1 = arith.constant 0 : i32
    return %arg0, %c0_i32, %c0_i32_0 : i32, i32, i32
  }
  func.func @transform_3(%arg0: i32) -> (i32, i32, i32) {
    %c0_i32 = arith.constant 0 : i32
    %c0_i32_0 = arith.constant 0 : i32
    %c0_i32_1 = arith.constant 0 : i32
    return %arg0, %c0_i32, %c0_i32_0 : i32, i32, i32
  }
}

module attributes {stable_mosaic.version = 11 : i64} {
  func.func @_tail_loss_kernel(%arg0: memref<2x2x1024xf32, #tpu.memory_space<vmem>>, %arg1: memref<2x1024x256xf32, #tpu.memory_space<vmem>>, %arg2: memref<2x1x256xf32, #tpu.memory_space<vmem>>, %arg3: memref<2x256x32xf32, #tpu.memory_space<vmem>>, %arg4: memref<2x1x32xf32, #tpu.memory_space<vmem>>, %arg5: memref<2x2x16xf32, #tpu.memory_space<vmem>>, %arg6: memref<1xf32, #tpu.memory_space<smem>>) attributes {dimension_semantics = [], scalar_prefetch = 0 : i64, scratch_operands = 0 : i64, tpu.core_type = #tpu.core_type<tc>} {
    %c0 = arith.constant 0 : index
    %c0_0 = arith.constant 0 : index
    %c0_1 = arith.constant 0 : index
    %0 = vector.load %arg0[%c0, %c0_0, %c0_1] : memref<2x2x1024xf32, #tpu.memory_space<vmem>>, vector<1x2x1024xf32>
    %1 = vector.shape_cast %0 : vector<1x2x1024xf32> to vector<2x1024xf32>
    %c0_2 = arith.constant 0 : index
    %c0_3 = arith.constant 0 : index
    %c0_4 = arith.constant 0 : index
    %2 = vector.load %arg1[%c0_2, %c0_3, %c0_4] : memref<2x1024x256xf32, #tpu.memory_space<vmem>>, vector<1x1024x256xf32>
    %3 = vector.shape_cast %2 : vector<1x1024x256xf32> to vector<1024x256xf32>
    %cst = arith.constant dense<0.000000e+00> : vector<2x256xf32>
    %4 = tpu.matmul %1, %3, %cst {dimension_numbers = #tpu.dot_dimension_numbers<[1], [0], [0], [1], [0, 0, 1, 1], [], []>} : vector<2x1024xf32>, vector<1024x256xf32>, vector<2x256xf32> -> vector<2x256xf32>
    %c0_5 = arith.constant 0 : index
    %c0_6 = arith.constant 0 : index
    %c0_7 = arith.constant 0 : index
    %5 = vector.load %arg2[%c0_5, %c0_6, %c0_7] : memref<2x1x256xf32, #tpu.memory_space<vmem>>, vector<1x1x256xf32>
    %6 = vector.shape_cast %5 : vector<1x1x256xf32> to vector<1x256xf32>
    %7 = vector.broadcast %6 : vector<1x256xf32> to vector<2x256xf32>
    %8 = arith.addf %4, %7 : vector<2x256xf32>
    %c0_8 = arith.constant 0 : index
    %c0_9 = arith.constant 0 : index
    %c0_10 = arith.constant 0 : index
    %9 = vector.load %arg3[%c0_8, %c0_9, %c0_10] : memref<2x256x32xf32, #tpu.memory_space<vmem>>, vector<1x256x32xf32>
    %10 = vector.shape_cast %9 : vector<1x256x32xf32> to vector<256x32xf32>
    %cst_11 = arith.constant dense<0.000000e+00> : vector<2x32xf32>
    %11 = tpu.matmul %8, %10, %cst_11 {dimension_numbers = #tpu.dot_dimension_numbers<[1], [0], [0], [1], [0, 0, 1, 1], [], []>} : vector<2x256xf32>, vector<256x32xf32>, vector<2x32xf32> -> vector<2x32xf32>
    %c0_12 = arith.constant 0 : index
    %c0_13 = arith.constant 0 : index
    %c0_14 = arith.constant 0 : index
    %12 = vector.load %arg4[%c0_12, %c0_13, %c0_14] : memref<2x1x32xf32, #tpu.memory_space<vmem>>, vector<1x1x32xf32>
    %13 = vector.shape_cast %12 : vector<1x1x32xf32> to vector<1x32xf32>
    %14 = vector.broadcast %13 : vector<1x32xf32> to vector<2x32xf32>
    %15 = arith.addf %11, %14 : vector<2x32xf32>
    %16 = math.tanh %15 : vector<2x32xf32>
    %17 = vector.extract_strided_slice %16 {offsets = [0, 0], sizes = [2, 16], strides = [1, 1]} : vector<2x32xf32> to vector<2x16xf32>
    %18 = vector.extract_strided_slice %16 {offsets = [0, 16], sizes = [2, 16], strides = [1, 1]} : vector<2x32xf32> to vector<2x16xf32>
    %c1 = arith.constant 1 : index
    %c0_15 = arith.constant 0 : index
    %c0_16 = arith.constant 0 : index
    %19 = vector.load %arg0[%c1, %c0_15, %c0_16] : memref<2x2x1024xf32, #tpu.memory_space<vmem>>, vector<1x2x1024xf32>
    %20 = vector.shape_cast %19 : vector<1x2x1024xf32> to vector<2x1024xf32>
    %c1_17 = arith.constant 1 : index
    %c0_18 = arith.constant 0 : index
    %c0_19 = arith.constant 0 : index
    %21 = vector.load %arg1[%c1_17, %c0_18, %c0_19] : memref<2x1024x256xf32, #tpu.memory_space<vmem>>, vector<1x1024x256xf32>
    %22 = vector.shape_cast %21 : vector<1x1024x256xf32> to vector<1024x256xf32>
    %cst_20 = arith.constant dense<0.000000e+00> : vector<2x256xf32>
    %23 = tpu.matmul %20, %22, %cst_20 {dimension_numbers = #tpu.dot_dimension_numbers<[1], [0], [0], [1], [0, 0, 1, 1], [], []>} : vector<2x1024xf32>, vector<1024x256xf32>, vector<2x256xf32> -> vector<2x256xf32>
    %c1_21 = arith.constant 1 : index
    %c0_22 = arith.constant 0 : index
    %c0_23 = arith.constant 0 : index
    %24 = vector.load %arg2[%c1_21, %c0_22, %c0_23] : memref<2x1x256xf32, #tpu.memory_space<vmem>>, vector<1x1x256xf32>
    %25 = vector.shape_cast %24 : vector<1x1x256xf32> to vector<1x256xf32>
    %26 = vector.broadcast %25 : vector<1x256xf32> to vector<2x256xf32>
    %27 = arith.addf %23, %26 : vector<2x256xf32>
    %c1_24 = arith.constant 1 : index
    %c0_25 = arith.constant 0 : index
    %c0_26 = arith.constant 0 : index
    %28 = vector.load %arg3[%c1_24, %c0_25, %c0_26] : memref<2x256x32xf32, #tpu.memory_space<vmem>>, vector<1x256x32xf32>
    %29 = vector.shape_cast %28 : vector<1x256x32xf32> to vector<256x32xf32>
    %cst_27 = arith.constant dense<0.000000e+00> : vector<2x32xf32>
    %30 = tpu.matmul %27, %29, %cst_27 {dimension_numbers = #tpu.dot_dimension_numbers<[1], [0], [0], [1], [0, 0, 1, 1], [], []>} : vector<2x256xf32>, vector<256x32xf32>, vector<2x32xf32> -> vector<2x32xf32>
    %c1_28 = arith.constant 1 : index
    %c0_29 = arith.constant 0 : index
    %c0_30 = arith.constant 0 : index
    %31 = vector.load %arg4[%c1_28, %c0_29, %c0_30] : memref<2x1x32xf32, #tpu.memory_space<vmem>>, vector<1x1x32xf32>
    %32 = vector.shape_cast %31 : vector<1x1x32xf32> to vector<1x32xf32>
    %33 = vector.broadcast %32 : vector<1x32xf32> to vector<2x32xf32>
    %34 = arith.addf %30, %33 : vector<2x32xf32>
    %35 = math.tanh %34 : vector<2x32xf32>
    %36 = vector.extract_strided_slice %35 {offsets = [0, 0], sizes = [2, 16], strides = [1, 1]} : vector<2x32xf32> to vector<2x16xf32>
    %37 = vector.extract_strided_slice %35 {offsets = [0, 16], sizes = [2, 16], strides = [1, 1]} : vector<2x32xf32> to vector<2x16xf32>
    %c0_31 = arith.constant 0 : index
    %c0_32 = arith.constant 0 : index
    %c0_33 = arith.constant 0 : index
    %38 = vector.load %arg5[%c0_31, %c0_32, %c0_33] : memref<2x2x16xf32, #tpu.memory_space<vmem>>, vector<1x2x16xf32>
    %39 = vector.shape_cast %38 : vector<1x2x16xf32> to vector<2x16xf32>
    %c1_34 = arith.constant 1 : index
    %c0_35 = arith.constant 0 : index
    %c0_36 = arith.constant 0 : index
    %40 = vector.load %arg5[%c1_34, %c0_35, %c0_36] : memref<2x2x16xf32, #tpu.memory_space<vmem>>, vector<1x2x16xf32>
    %41 = vector.shape_cast %40 : vector<1x2x16xf32> to vector<2x16xf32>
    %cst_37 = arith.constant 5.000000e-01 : f32
    %42 = vector.broadcast %cst_37 : f32 to vector<2x16xf32>
    %43 = arith.mulf %42, %18 : vector<2x16xf32>
    %44 = math.exp %43 : vector<2x16xf32>
    %45 = arith.mulf %39, %44 : vector<2x16xf32>
    %46 = arith.addf %45, %17 : vector<2x16xf32>
    %cst_38 = arith.constant 5.000000e-01 : f32
    %47 = vector.broadcast %cst_38 : f32 to vector<2x16xf32>
    %48 = arith.mulf %47, %37 : vector<2x16xf32>
    %49 = math.exp %48 : vector<2x16xf32>
    %50 = arith.mulf %41, %49 : vector<2x16xf32>
    %51 = arith.addf %50, %36 : vector<2x16xf32>
    %52 = arith.subf %18, %37 : vector<2x16xf32>
    %cst_39 = arith.constant 2.000000e+00 : f32
    %53 = vector.broadcast %cst_39 : f32 to vector<2x16xf32>
    %54 = arith.mulf %53, %52 : vector<2x16xf32>
    %55 = arith.subf %17, %36 : vector<2x16xf32>
    %56 = arith.mulf %55, %55 : vector<2x16xf32>
    %cst_40 = arith.constant 2.000000e+00 : f32
    %57 = vector.broadcast %cst_40 : f32 to vector<2x16xf32>
    %58 = arith.addf %37, %57 : vector<2x16xf32>
    %cst_41 = arith.constant -2.000000e+00 : f32
    %59 = vector.broadcast %cst_41 : f32 to vector<2x16xf32>
    %60 = arith.mulf %59, %58 : vector<2x16xf32>
    %61 = math.exp %60 : vector<2x16xf32>
    %62 = arith.mulf %56, %61 : vector<2x16xf32>
    %63 = math.exp %54 : vector<2x16xf32>
    %64 = arith.addf %63, %62 : vector<2x16xf32>
    %cst_42 = arith.constant 1.000000e+00 : f32
    %65 = vector.broadcast %cst_42 : f32 to vector<2x16xf32>
    %66 = arith.subf %64, %65 : vector<2x16xf32>
    %67 = arith.subf %66, %54 : vector<2x16xf32>
    %68 = vector.shape_cast %67 : vector<2x16xf32> to vector<1x2x16xf32>
    %cst_43 = arith.constant dense<0.000000e+00> : vector<1xf32>
    %69 = vector.multi_reduction <add>, %68, %cst_43 [1, 2] : vector<1x2x16xf32> to vector<1xf32>
    %70 = vector.shape_cast %69 : vector<1xf32> to vector<1x1x1xf32>
    %71 = vector.extract %70[0, 0, 0] : f32 from vector<1x1x1xf32>
    %cst_44 = arith.constant 5.000000e-01 : f32
    %72 = arith.mulf %cst_44, %71 : f32
    %73 = arith.subf %37, %18 : vector<2x16xf32>
    %cst_45 = arith.constant 2.000000e+00 : f32
    %74 = vector.broadcast %cst_45 : f32 to vector<2x16xf32>
    %75 = arith.mulf %74, %73 : vector<2x16xf32>
    %76 = arith.subf %36, %17 : vector<2x16xf32>
    %77 = arith.mulf %76, %76 : vector<2x16xf32>
    %cst_46 = arith.constant 2.000000e+00 : f32
    %78 = vector.broadcast %cst_46 : f32 to vector<2x16xf32>
    %79 = arith.addf %18, %78 : vector<2x16xf32>
    %cst_47 = arith.constant -2.000000e+00 : f32
    %80 = vector.broadcast %cst_47 : f32 to vector<2x16xf32>
    %81 = arith.mulf %80, %79 : vector<2x16xf32>
    %82 = math.exp %81 : vector<2x16xf32>
    %83 = arith.mulf %77, %82 : vector<2x16xf32>
    %84 = math.exp %75 : vector<2x16xf32>
    %85 = arith.addf %84, %83 : vector<2x16xf32>
    %cst_48 = arith.constant 1.000000e+00 : f32
    %86 = vector.broadcast %cst_48 : f32 to vector<2x16xf32>
    %87 = arith.subf %85, %86 : vector<2x16xf32>
    %88 = arith.subf %87, %75 : vector<2x16xf32>
    %89 = vector.shape_cast %88 : vector<2x16xf32> to vector<1x2x16xf32>
    %cst_49 = arith.constant dense<0.000000e+00> : vector<1xf32>
    %90 = vector.multi_reduction <add>, %89, %cst_49 [1, 2] : vector<1x2x16xf32> to vector<1xf32>
    %91 = vector.shape_cast %90 : vector<1xf32> to vector<1x1x1xf32>
    %92 = vector.extract %91[0, 0, 0] : f32 from vector<1x1x1xf32>
    %cst_50 = arith.constant 5.000000e-01 : f32
    %93 = arith.mulf %cst_50, %92 : f32
    %94 = arith.addf %72, %93 : f32
    %cst_51 = arith.constant 2.000000e+00 : f32
    %95 = arith.divf %94, %cst_51 : f32
    %96 = arith.negf %51 : vector<2x16xf32>
    %97 = math.exp %96 : vector<2x16xf32>
    %cst_52 = arith.constant 1.000000e+00 : f32
    %98 = vector.broadcast %cst_52 : f32 to vector<2x16xf32>
    %99 = arith.addf %98, %97 : vector<2x16xf32>
    %100 = arith.divf %98, %99 : vector<2x16xf32>
    %cst_53 = arith.constant 0.000000e+00 : f32
    %101 = vector.broadcast %cst_53 : f32 to vector<2x16xf32>
    %102 = arith.subf %101, %46 : vector<2x16xf32>
    %cst_54 = arith.constant 0.000000e+00 : f32
    %103 = vector.broadcast %cst_54 : f32 to vector<2x16xf32>
    %104 = arith.maximumf %102, %103 : vector<2x16xf32>
    %105 = math.absf %102 : vector<2x16xf32>
    %cst_55 = arith.constant 0.000000e+00 : f32
    %106 = vector.broadcast %cst_55 : f32 to vector<2x16xf32>
    %107 = arith.subf %106, %105 : vector<2x16xf32>
    %108 = math.exp %107 : vector<2x16xf32>
    %cst_56 = arith.constant 1.000000e+00 : f32
    %109 = vector.broadcast %cst_56 : f32 to vector<2x16xf32>
    %110 = arith.addf %109, %108 : vector<2x16xf32>
    %111 = math.log %110 : vector<2x16xf32>
    %112 = arith.addf %104, %111 : vector<2x16xf32>
    %cst_57 = arith.constant 0.000000e+00 : f32
    %113 = vector.broadcast %cst_57 : f32 to vector<2x16xf32>
    %114 = arith.subf %113, %112 : vector<2x16xf32>
    %cst_58 = arith.constant -1.000000e+02 : f32
    %115 = vector.broadcast %cst_58 : f32 to vector<2x16xf32>
    %116 = arith.maximumf %114, %115 : vector<2x16xf32>
    %cst_59 = arith.constant 0.000000e+00 : f32
    %117 = vector.broadcast %cst_59 : f32 to vector<2x16xf32>
    %118 = arith.maximumf %46, %117 : vector<2x16xf32>
    %119 = math.absf %46 : vector<2x16xf32>
    %cst_60 = arith.constant 0.000000e+00 : f32
    %120 = vector.broadcast %cst_60 : f32 to vector<2x16xf32>
    %121 = arith.subf %120, %119 : vector<2x16xf32>
    %122 = math.exp %121 : vector<2x16xf32>
    %cst_61 = arith.constant 1.000000e+00 : f32
    %123 = vector.broadcast %cst_61 : f32 to vector<2x16xf32>
    %124 = arith.addf %123, %122 : vector<2x16xf32>
    %125 = math.log %124 : vector<2x16xf32>
    %126 = arith.addf %118, %125 : vector<2x16xf32>
    %cst_62 = arith.constant 0.000000e+00 : f32
    %127 = vector.broadcast %cst_62 : f32 to vector<2x16xf32>
    %128 = arith.subf %127, %126 : vector<2x16xf32>
    %cst_63 = arith.constant -1.000000e+02 : f32
    %129 = vector.broadcast %cst_63 : f32 to vector<2x16xf32>
    %130 = arith.maximumf %128, %129 : vector<2x16xf32>
    %131 = arith.mulf %100, %116 : vector<2x16xf32>
    %cst_64 = arith.constant 1.000000e+00 : f32
    %132 = vector.broadcast %cst_64 : f32 to vector<2x16xf32>
    %133 = arith.subf %132, %100 : vector<2x16xf32>
    %134 = arith.mulf %133, %130 : vector<2x16xf32>
    %135 = arith.addf %131, %134 : vector<2x16xf32>
    %136 = vector.shape_cast %135 : vector<2x16xf32> to vector<1x2x16xf32>
    %cst_65 = arith.constant dense<0.000000e+00> : vector<1xf32>
    %137 = vector.multi_reduction <add>, %136, %cst_65 [1, 2] : vector<1x2x16xf32> to vector<1xf32>
    %138 = vector.shape_cast %137 : vector<1xf32> to vector<1x1x1xf32>
    %139 = vector.extract %138[0, 0, 0] : f32 from vector<1x1x1xf32>
    %cst_66 = arith.constant 0.000000e+00 : f32
    %140 = arith.subf %cst_66, %139 : f32
    %141 = arith.negf %46 : vector<2x16xf32>
    %142 = math.exp %141 : vector<2x16xf32>
    %cst_67 = arith.constant 1.000000e+00 : f32
    %143 = vector.broadcast %cst_67 : f32 to vector<2x16xf32>
    %144 = arith.addf %143, %142 : vector<2x16xf32>
    %145 = arith.divf %143, %144 : vector<2x16xf32>
    %cst_68 = arith.constant 0.000000e+00 : f32
    %146 = vector.broadcast %cst_68 : f32 to vector<2x16xf32>
    %147 = arith.subf %146, %51 : vector<2x16xf32>
    %cst_69 = arith.constant 0.000000e+00 : f32
    %148 = vector.broadcast %cst_69 : f32 to vector<2x16xf32>
    %149 = arith.maximumf %147, %148 : vector<2x16xf32>
    %150 = math.absf %147 : vector<2x16xf32>
    %cst_70 = arith.constant 0.000000e+00 : f32
    %151 = vector.broadcast %cst_70 : f32 to vector<2x16xf32>
    %152 = arith.subf %151, %150 : vector<2x16xf32>
    %153 = math.exp %152 : vector<2x16xf32>
    %cst_71 = arith.constant 1.000000e+00 : f32
    %154 = vector.broadcast %cst_71 : f32 to vector<2x16xf32>
    %155 = arith.addf %154, %153 : vector<2x16xf32>
    %156 = math.log %155 : vector<2x16xf32>
    %157 = arith.addf %149, %156 : vector<2x16xf32>
    %cst_72 = arith.constant 0.000000e+00 : f32
    %158 = vector.broadcast %cst_72 : f32 to vector<2x16xf32>
    %159 = arith.subf %158, %157 : vector<2x16xf32>
    %cst_73 = arith.constant -1.000000e+02 : f32
    %160 = vector.broadcast %cst_73 : f32 to vector<2x16xf32>
    %161 = arith.maximumf %159, %160 : vector<2x16xf32>
    %cst_74 = arith.constant 0.000000e+00 : f32
    %162 = vector.broadcast %cst_74 : f32 to vector<2x16xf32>
    %163 = arith.maximumf %51, %162 : vector<2x16xf32>
    %164 = math.absf %51 : vector<2x16xf32>
    %cst_75 = arith.constant 0.000000e+00 : f32
    %165 = vector.broadcast %cst_75 : f32 to vector<2x16xf32>
    %166 = arith.subf %165, %164 : vector<2x16xf32>
    %167 = math.exp %166 : vector<2x16xf32>
    %cst_76 = arith.constant 1.000000e+00 : f32
    %168 = vector.broadcast %cst_76 : f32 to vector<2x16xf32>
    %169 = arith.addf %168, %167 : vector<2x16xf32>
    %170 = math.log %169 : vector<2x16xf32>
    %171 = arith.addf %163, %170 : vector<2x16xf32>
    %cst_77 = arith.constant 0.000000e+00 : f32
    %172 = vector.broadcast %cst_77 : f32 to vector<2x16xf32>
    %173 = arith.subf %172, %171 : vector<2x16xf32>
    %cst_78 = arith.constant -1.000000e+02 : f32
    %174 = vector.broadcast %cst_78 : f32 to vector<2x16xf32>
    %175 = arith.maximumf %173, %174 : vector<2x16xf32>
    %176 = arith.mulf %145, %161 : vector<2x16xf32>
    %cst_79 = arith.constant 1.000000e+00 : f32
    %177 = vector.broadcast %cst_79 : f32 to vector<2x16xf32>
    %178 = arith.subf %177, %145 : vector<2x16xf32>
    %179 = arith.mulf %178, %175 : vector<2x16xf32>
    %180 = arith.addf %176, %179 : vector<2x16xf32>
    %181 = vector.shape_cast %180 : vector<2x16xf32> to vector<1x2x16xf32>
    %cst_80 = arith.constant dense<0.000000e+00> : vector<1xf32>
    %182 = vector.multi_reduction <add>, %181, %cst_80 [1, 2] : vector<1x2x16xf32> to vector<1xf32>
    %183 = vector.shape_cast %182 : vector<1xf32> to vector<1x1x1xf32>
    %184 = vector.extract %183[0, 0, 0] : f32 from vector<1x1x1xf32>
    %cst_81 = arith.constant 0.000000e+00 : f32
    %185 = arith.subf %cst_81, %184 : f32
    %186 = arith.addf %140, %185 : f32
    %187 = arith.subf %186, %95 : f32
    %c0_82 = arith.constant 0 : index
    %188 = memref.load %arg6[%c0_82] : memref<1xf32, #tpu.memory_space<smem>>
    memref.store %187, %arg6[%c0_82] : memref<1xf32, #tpu.memory_space<smem>>
    return
  }
}

</mosaic_0001>

<bundles_post_ra>
// kernel: mutual_info_loss.2
= control target key start
LH: loop header
LB: loop body
LE: loop exit
PB: predicated region body
PF: predicated region fallthrough
CT: control target
= control target key end

     0   :  { %s984_s12 = smov 0   ;;  %s1200_s0 = inlined_call_operand.vmem [shape: f32[2,128,512], index: 0, kind: input, shape index: {}]   ;;  %s1201_s1 = inlined_call_operand.vmem [shape: f32[2,512,16], index: 1, kind: input, shape index: {}]   ;;  %s1202_s2 = inlined_call_operand.vmem [shape: f32[2,1,16], index: 2, kind: input, shape index: {}]   ;;  %s1203_s3 = inlined_call_operand.vmem [shape: f32[2,128,16], index: 3, kind: output, shape index: {}]  }
   0x1 LB: > { %s771_s13 = sadd.s32 4294967295, %s962_s12   ;;  %p775_p0 = scmp.ge.s32.totalorder %s962_s12, 1  ;;  %s962_s12 = sphi %s984_s12, %s13_s12  }
   0x2   : > { %p155_p1 = scmp.lt.s32.totalorder %s962_s12, 3 }
   0x4   : > { %p156_p2 = pnand %p775_p0, %p155_p1 }
   0x5   : > { %p187_p3 = scmp.lt.s32.totalorder (!%p156_p2), %s771_s13, 1 }
   0x6   : > { %159 = sbr.rel (%p156_p2) target bundleno = 314 (0x13a), region = 32 }
   0xb   : > { %s1205_s13 = smov (!%p187_p3, %s771_s13), 1  ;;  %vm678_vm0 = vcmask 130048  }
   0xc   : > { %s785_s14 = sshll.u32 %s1205_s13, 9  ;;  %s199_s23 = scalar_lea.vmem %s1202_s2, %s1205_s13 }
   0xd   : > { %s1000_s17 = scalar_lea.vmem %s1201_s1, %s785_s14  ;;  %s1065_s20 = scalar_lea.vmem %s1200_s0, %s785_s14 }
   0xe   : > { %v300_v0 = vld [vmem:[%s1000_s17 + $0xf8] sm:$0xff]  ;;  %v299_v4 = vld [vmem:[%s1000_s17 + $0xf0] sm:$0xff]  ;;  %v298_v8 = vld [vmem:[%s1000_s17 + $0xe8] sm:$0xff]  ;;  %s787_s24 = sshll.u32 %s1205_s13, 7 }
   0xf   : > { %v332_v1 = vld [vmem:[%s1000_s17 + $0x1f8] sm:$0xff]  ;;  %788 = vmatprep.subr.mxu0 %v300_v0  ;;  %v331_v5 = vld [vmem:[%s1000_s17 + $0x1f0] sm:$0xff]  ;;  %v330_v9 = vld [vmem:[%s1000_s17 + $0x1e8] sm:$0xff]  ;;  %s1148_s27 = scalar_lea.vmem %s1203_s3, %s787_s24 }
  0x10   : > { %v284_v2 = vld [vmem:[%s1000_s17 + $0x78] sm:$0xff]  ;;  %868 = vmatprep.subr.mxu1 %v332_v1  ;;  %v283_v6 = vld [vmem:[%s1000_s17 + $0x70] sm:$0xff]  ;;  %v282_v10 = vld [vmem:[%s1000_s17 + $0x68] sm:$0xff] }
  0x11   : > { %v316_v3 = vld [vmem:[%s1000_s17 + $0x178] sm:$0xff]  ;;  %789 = vmatpush3.msra.mxu0 %v284_v2  ;;  %v315_v7 = vld [vmem:[%s1000_s17 + $0x170] sm:$0xff]  ;;  %v314_v11 = vld [vmem:[%s1000_s17 + $0x168] sm:$0xff] }
  0x12   : > { %869 = vmatpush3.msra.mxu1 %v316_v3  ;;  %790 = vmatprep.subr.mxu0 %v299_v4  ;;  %v297_v12 = vld [vmem:[%s1000_s17 + $0xe0] sm:$0xff]  ;;  %v296_v16 = vld [vmem:[%s1000_s17 + $0xd8] sm:$0xff]  ;;  %v295_v20 = vld [vmem:[%s1000_s17 + $0xd0] sm:$0xff] }
  0x13   : > { %870 = vmatprep.subr.mxu1 %v331_v5  ;;  %791 = vmatpush3.msra.mxu0 %v283_v6  ;;  %v329_v13 = vld [vmem:[%s1000_s17 + $0x1e0] sm:$0xff]  ;;  %v328_v17 = vld [vmem:[%s1000_s17 + $0x1d8] sm:$0xff]  ;;  %v327_v21 = vld [vmem:[%s1000_s17 + $0x1d0] sm:$0xff] }
  0x14   : > { %871 = vmatpush3.msra.mxu1 %v315_v7  ;;  %792 = vmatprep.subr.mxu0 %v298_v8  ;;  %v281_v14 = vld [vmem:[%s1000_s17 + $0x60] sm:$0xff]  ;;  %v280_v18 = vld [vmem:[%s1000_s17 + $0x58] sm:$0xff]  ;;  %v279_v22 = vld [vmem:[%s1000_s17 + $0x50] sm:$0xff] }
  0x15   : > { %872 = vmatprep.subr.mxu1 %v330_v9  ;;  %v313_v15 = vld [vmem:[%s1000_s17 + $0x160] sm:$0xff]  ;;  %793 = vmatpush3.msra.mxu0 %v282_v10  ;;  %v312_v19 = vld [vmem:[%s1000_s17 + $0x158] sm:$0xff]  ;;  %v311_v23 = vld [vmem:[%s1000_s17 + $0x150] sm:$0xff] }
  0x16   : > { %873 = vmatpush3.msra.mxu1 %v314_v11  ;;  %794 = vmatprep.subr.mxu0 %v297_v12  ;;  %v294_v24 = vld [vmem:[%s1000_s17 + $0xc8] sm:$0xff]  ;;  %v293_v28 = vld [vmem:[%s1000_s17 + $0xc0] sm:$0xff]  ;;  %v292_v32 = vld [vmem:[%s1000_s17 + $0xb8] sm:$0xff] }
  0x17   : > { %874 = vmatprep.subr.mxu1 %v329_v13  ;;  %795 = vmatpush3.msra.mxu0 %v281_v14  ;;  %v326_v25 = vld [vmem:[%s1000_s17 + $0x1c8] sm:$0xff]  ;;  %v325_v29 = vld [vmem:[%s1000_s17 + $0x1c0] sm:$0xff]  ;;  %v324_v33 = vld [vmem:[%s1000_s17 + $0x1b8] sm:$0xff] }
  0x18   : > { %875 = vmatpush3.msra.mxu1 %v313_v15  ;;  %796 = vmatprep.subr.mxu0 %v296_v16  ;;  %v278_v26 = vld [vmem:[%s1000_s17 + $0x48] sm:$0xff]  ;;  %v277_v30 = vld [vmem:[%s1000_s17 + $0x40] sm:$0xff]  ;;  %v276_v34 = vld [vmem:[%s1000_s17 + $0x38] sm:$0xff] }
  0x19   : > { %876 = vmatprep.subr.mxu1 %v328_v17  ;;  %797 = vmatpush3.msra.mxu0 %v280_v18  ;;  %v310_v27 = vld [vmem:[%s1000_s17 + $0x148] sm:$0xff]  ;;  %v309_v31 = vld [vmem:[%s1000_s17 + $0x140] sm:$0xff]  ;;  %v308_v35 = vld [vmem:[%s1000_s17 + $0x138] sm:$0xff] }
  0x1a   : > { %877 = vmatpush3.msra.mxu1 %v312_v19  ;;  %798 = vmatprep.subr.mxu0 %v295_v20  ;;  %v291_v36 = vld [vmem:[%s1000_s17 + $0xb0] sm:$0xff]  ;;  %v290_v40 = vld [vmem:[%s1000_s17 + $0xa8] sm:$0xff]  ;;  %v289_v44 = vld [vmem:[%s1000_s17 + $0xa0] sm:$0xff] }
  0x1b   : > { %878 = vmatprep.subr.mxu1 %v327_v21  ;;  %799 = vmatpush3.msra.mxu0 %v279_v22  ;;  %v323_v37 = vld [vmem:[%s1000_s17 + $0x1b0] sm:$0xff]  ;;  %v322_v41 = vld [vmem:[%s1000_s17 + $0x1a8] sm:$0xff]  ;;  %v321_v45 = vld [vmem:[%s1000_s17 + $0x1a0] sm:$0xff] }
  0x1c   : > { %879 = vmatpush3.msra.mxu1 %v311_v23  ;;  %800 = vmatprep.subr.mxu0 %v294_v24  ;;  %v275_v38 = vld [vmem:[%s1000_s17 + $0x30] sm:$0xff]  ;;  %v274_v42 = vld [vmem:[%s1000_s17 + $0x28] sm:$0xff]  ;;  %v273_v46 = vld [vmem:[%s1000_s17 + $0x20] sm:$0xff] }
  0x1d   : > { %880 = vmatprep.subr.mxu1 %v326_v25  ;;  %801 = vmatpush3.msra.mxu0 %v278_v26  ;;  %v307_v39 = vld [vmem:[%s1000_s17 + $0x130] sm:$0xff]  ;;  %v306_v43 = vld [vmem:[%s1000_s17 + $0x128] sm:$0xff]  ;;  %v305_v47 = vld [vmem:[%s1000_s17 + $0x120] sm:$0xff] }
  0x1e   : > { %881 = vmatpush3.msra.mxu1 %v310_v27  ;;  %802 = vmatprep.subr.mxu0 %v293_v28  ;;  %v288_v48 = vld [vmem:[%s1000_s17 + $0x98] sm:$0xff]  ;;  %v287_v52 = vld [vmem:[%s1000_s17 + $0x90] sm:$0xff]  ;;  %v286_v56 = vld [vmem:[%s1000_s17 + $0x88] sm:$0xff] }
  0x1f   : > { %882 = vmatprep.subr.mxu1 %v325_v29  ;;  %803 = vmatpush3.msra.mxu0 %v277_v30  ;;  %v320_v49 = vld [vmem:[%s1000_s17 + $0x198] sm:$0xff]  ;;  %v319_v53 = vld [vmem:[%s1000_s17 + $0x190] sm:$0xff]  ;;  %v318_v57 = vld [vmem:[%s1000_s17 + $0x188] sm:$0xff] }
  0x20   : > { %883 = vmatpush3.msra.mxu1 %v309_v31  ;;  %804 = vmatprep.subr.mxu0 %v292_v32  ;;  %v272_v50 = vld [vmem:[%s1000_s17 + $0x18] sm:$0xff]  ;;  %v271_v54 = vld [vmem:[%s1000_s17 + $0x10] sm:$0xff]  ;;  %v270_v58 = vld [vmem:[%s1000_s17 + $0x8] sm:$0xff] }
  0x21   : > { %884 = vmatprep.subr.mxu1 %v324_v33  ;;  %805 = vmatpush3.msra.mxu0 %v276_v34  ;;  %v304_v51 = vld [vmem:[%s1000_s17 + $0x118] sm:$0xff]  ;;  %v303_v55 = vld [vmem:[%s1000_s17 + $0x110] sm:$0xff]  ;;  %v302_v59 = vld [vmem:[%s1000_s17 + $0x108] sm:$0xff] }
  0x22   : > { %885 = vmatpush3.msra.mxu1 %v308_v35  ;;  %806 = vmatprep.subr.mxu0 %v291_v36  ;;  %v285_v60 = vld [vmem:[%s1000_s17 + $0x80] sm:$0xff]  ;;  %v206_v63 = vld [vmem:[%s1065_s20 + $0x8] sm:$0xff]  ;;  %v208_v1 = vld [vmem:[%s1065_s20 + $0x18] sm:$0xff] }
  0x23   : > { %886 = vmatprep.subr.mxu1 %v323_v37  ;;  %807 = vmatpush3.msra.mxu0 %v275_v38  ;;  %v317_v61 = vld [vmem:[%s1000_s17 + $0x180] sm:$0xff]  ;;  %v207_v3 = vld [vmem:[%s1065_s20 + $0x10] sm:$0xff]  ;;  %v210_v4 = vld [vmem:[%s1065_s20 + $0x28] sm:$0xff] }
  0x24   : > { %887 = vmatpush3.msra.mxu1 %v307_v39  ;;  %808 = vmatprep.subr.mxu0 %v290_v40  ;;  %v269_v62 = vld [vmem:[%s1000_s17] sm:$0xff]  ;;  %v212_v5 = vld [vmem:[%s1065_s20 + $0x38] sm:$0xff]  ;;  %v211_v7 = vld [vmem:[%s1065_s20 + $0x30] sm:$0xff] }
  0x25   : > { %888 = vmatprep.subr.mxu1 %v322_v41  ;;  %809 = vmatpush3.msra.mxu0 %v274_v42  ;;  %v301_v0 = vld [vmem:[%s1000_s17 + $0x100] sm:$0xff]  ;;  %v214_v8 = vld [vmem:[%s1065_s20 + $0x48] sm:$0xff]  ;;  %v216_v9 = vld [vmem:[%s1065_s20 + $0x58] sm:$0xff] }
  0x26   : > { %889 = vmatpush3.msra.mxu1 %v306_v43  ;;  %810 = vmatprep.subr.mxu0 %v289_v44  ;;  %v205_v2 = vld [vmem:[%s1065_s20] sm:$0xff]  ;;  %v215_v11 = vld [vmem:[%s1065_s20 + $0x50] sm:$0xff]  ;;  %v218_v12 = vld [vmem:[%s1065_s20 + $0x68] sm:$0xff] }
  0x27   : > { %890 = vmatprep.subr.mxu1 %v321_v45  ;;  %811 = vmatpush3.msra.mxu0 %v273_v46  ;;  %v209_v6 = vld [vmem:[%s1065_s20 + $0x20] sm:$0xff]  ;;  %v220_v13 = vld [vmem:[%s1065_s20 + $0x78] sm:$0xff]  ;;  %v219_v15 = vld [vmem:[%s1065_s20 + $0x70] sm:$0xff] }
  0x28   : > { %891 = vmatpush3.msra.mxu1 %v305_v47  ;;  %812 = vmatprep.subr.mxu0 %v288_v48  ;;  %v213_v10 = vld [vmem:[%s1065_s20 + $0x40] sm:$0xff]  ;;  %v222_v16 = vld [vmem:[%s1065_s20 + $0x88] sm:$0xff]  ;;  %v224_v17 = vld [vmem:[%s1065_s20 + $0x98] sm:$0xff] }
  0x29   : > { %892 = vmatprep.subr.mxu1 %v320_v49  ;;  %813 = vmatpush3.msra.mxu0 %v272_v50  ;;  %v217_v14 = vld [vmem:[%s1065_s20 + $0x60] sm:$0xff]  ;;  %v223_v19 = vld [vmem:[%s1065_s20 + $0x90] sm:$0xff]  ;;  %v226_v20 = vld [vmem:[%s1065_s20 + $0xa8] sm:$0xff] }
  0x2a   : > { %893 = vmatpush3.msra.mxu1 %v304_v51  ;;  %814 = vmatprep.subr.mxu0 %v287_v52  ;;  %v221_v18 = vld [vmem:[%s1065_s20 + $0x80] sm:$0xff]  ;;  %v228_v21 = vld [vmem:[%s1065_s20 + $0xb8] sm:$0xff]  ;;  %v227_v23 = vld [vmem:[%s1065_s20 + $0xb0] sm:$0xff] }
  0x2b   : > { %894 = vmatprep.subr.mxu1 %v319_v53  ;;  %815 = vmatpush3.msra.mxu0 %v271_v54  ;;  %v225_v22 = vld [vmem:[%s1065_s20 + $0xa0] sm:$0xff]  ;;  %v230_v24 = vld [vmem:[%s1065_s20 + $0xc8] sm:$0xff]  ;;  %v232_v25 = vld [vmem:[%s1065_s20 + $0xd8] sm:$0xff] }
  0x2c   : > { %895 = vmatpush3.msra.mxu1 %v303_v55  ;;  %816 = vmatprep.subr.mxu0 %v286_v56  ;;  %v229_v26 = vld [vmem:[%s1065_s20 + $0xc0] sm:$0xff]  ;;  %v231_v27 = vld [vmem:[%s1065_s20 + $0xd0] sm:$0xff]  ;;  %v234_v28 = vld [vmem:[%s1065_s20 + $0xe8] sm:$0xff] }
  0x2d   : > { %896 = vmatprep.subr.mxu1 %v318_v57  ;;  %817 = vmatpush3.msra.mxu0 %v270_v58  ;;  %v236_v29 = vld [vmem:[%s1065_s20 + $0xf8] sm:$0xff]  ;;  %v233_v30 = vld [vmem:[%s1065_s20 + $0xe0] sm:$0xff]  ;;  %v235_v31 = vld [vmem:[%s1065_s20 + $0xf0] sm:$0xff] }
  0x2e   : > { %897 = vmatpush3.msra.mxu1 %v302_v59  ;;  %818 = vmatprep.subr.mxu0 %v285_v60  ;;  %v238_v32 = vld [vmem:[%s1065_s20 + $0x108] sm:$0xff]  ;;  %v240_v33 = vld [vmem:[%s1065_s20 + $0x118] sm:$0xff]  ;;  %v237_v34 = vld [vmem:[%s1065_s20 + $0x100] sm:$0xff] }
  0x2f   : > { %898 = vmatprep.subr.mxu1 %v317_v61  ;;  %819 = vmatpush3.msra.mxu0 %v269_v62  ;;  %v239_v35 = vld [vmem:[%s1065_s20 + $0x110] sm:$0xff]  ;;  %v242_v36 = vld [vmem:[%s1065_s20 + $0x128] sm:$0xff]  ;;  %v244_v37 = vld [vmem:[%s1065_s20 + $0x138] sm:$0xff] }
  0x30   : > { %404 = vmatprep.mubr.f32.mxu0 %v206_v63  ;;  %899 = vmatpush3.msra.mxu1 %v301_v0  ;;  %v241_v38 = vld [vmem:[%s1065_s20 + $0x120] sm:$0xff]  ;;  %v243_v39 = vld [vmem:[%s1065_s20 + $0x130] sm:$0xff]  ;;  %v246_v40 = vld [vmem:[%s1065_s20 + $0x148] sm:$0xff] }
  0x31   : > { %549 = vmatprep.mubr.f32.mxu1 %v208_v1  ;;  %405 = vmatmul.mubr.f32.vlgmr.msra.gmra.mxu0 %v205_v2  ;;  %v248_v41 = vld [vmem:[%s1065_s20 + $0x158] sm:$0xff]  ;;  %v245_v42 = vld [vmem:[%s1065_s20 + $0x140] sm:$0xff]  ;;  %v247_v43 = vld [vmem:[%s1065_s20 + $0x150] sm:$0xff] }
  0x32   : > { %550 = vmatmul.mubr.f32.vlgmr.msra.gmra.mxu1 %v207_v3  ;;  %409 = vmatprep.mubr.f32.mxu0 %v210_v4  ;;  %v250_v44 = vld [vmem:[%s1065_s20 + $0x168] sm:$0xff]  ;;  %v252_v45 = vld [vmem:[%s1065_s20 + $0x178] sm:$0xff]  ;;  %v249_v46 = vld [vmem:[%s1065_s20 + $0x160] sm:$0xff] }
  0x33   : > { %554 = vmatprep.mubr.f32.mxu1 %v212_v5  ;;  %v251_v47 = vld [vmem:[%s1065_s20 + $0x170] sm:$0xff]  ;;  %v254_v48 = vld [vmem:[%s1065_s20 + $0x188] sm:$0xff]  ;;  %v256_v49 = vld [vmem:[%s1065_s20 + $0x198] sm:$0xff] }
  0x34   : > { %v253_v50 = vld [vmem:[%s1065_s20 + $0x180] sm:$0xff]  ;;  %v255_v51 = vld [vmem:[%s1065_s20 + $0x190] sm:$0xff]  ;;  %v258_v52 = vld [vmem:[%s1065_s20 + $0x1a8] sm:$0xff] }
  0x35   : > { %410 = vmatmul.mubr.f32.gmra.mxu0 %v209_v6  ;;  %v260_v53 = vld [vmem:[%s1065_s20 + $0x1b8] sm:$0xff]  ;;  %v257_v54 = vld [vmem:[%s1065_s20 + $0x1a0] sm:$0xff]  ;;  %v259_v55 = vld [vmem:[%s1065_s20 + $0x1b0] sm:$0xff] }
  0x36   : > { %555 = vmatmul.mubr.f32.gmra.mxu1 %v211_v7  ;;  %414 = vmatprep.mubr.f32.mxu0 %v214_v8  ;;  %v262_v56 = vld [vmem:[%s1065_s20 + $0x1c8] sm:$0xff]  ;;  %v264_v57 = vld [vmem:[%s1065_s20 + $0x1d8] sm:$0xff]  ;;  %v261_v58 = vld [vmem:[%s1065_s20 + $0x1c0] sm:$0xff] }
  0x37   : > { %559 = vmatprep.mubr.f32.mxu1 %v216_v9  ;;  %v263_v59 = vld [vmem:[%s1065_s20 + $0x1d0] sm:$0xff]  ;;  %v266_v60 = vld [vmem:[%s1065_s20 + $0x1e8] sm:$0xff]  ;;  %v268_v61 = vld [vmem:[%s1065_s20 + $0x1f8] sm:$0xff] }
  0x38   : > { %v265_v62 = vld [vmem:[%s1065_s20 + $0x1e0] sm:$0xff]  ;;  %v267_v63 = vld [vmem:[%s1065_s20 + $0x1f0] sm:$0xff] }
  0x39   : > { %415 = vmatmul.mubr.f32.gmra.mxu0 %v213_v10  ;;  %v1141_v2 = vld [vmem:[%s199_s23] ss:$0 sm:$0xff] }
  0x3a   : > { %560 = vmatmul.mubr.f32.gmra.mxu1 %v215_v11  ;;  %419 = vmatprep.mubr.f32.mxu0 %v218_v12 }
  0x3b   : > { %564 = vmatprep.mubr.f32.mxu1 %v220_v13 }
  0x3d   : > { %420 = vmatmul.mubr.f32.gmra.mxu0 %v217_v14 }
  0x3e   : > { %565 = vmatmul.mubr.f32.gmra.mxu1 %v219_v15  ;;  %424 = vmatprep.mubr.f32.mxu0 %v222_v16 }
  0x3f   : > { %569 = vmatprep.mubr.f32.mxu1 %v224_v17 }
  0x41   : > { %425 = vmatmul.mubr.f32.gmra.mxu0 %v221_v18 }
  0x42   : > { %570 = vmatmul.mubr.f32.gmra.mxu1 %v223_v19  ;;  %429 = vmatprep.mubr.f32.mxu0 %v226_v20 }
  0x43   : > { %574 = vmatprep.mubr.f32.mxu1 %v228_v21 }
  0x45   : > { %430 = vmatmul.mubr.f32.gmra.mxu0 %v225_v22 }
  0x46   : > { %575 = vmatmul.mubr.f32.gmra.mxu1 %v227_v23  ;;  %434 = vmatprep.mubr.f32.mxu0 %v230_v24 }
  0x47   : > { %579 = vmatprep.mubr.f32.mxu1 %v232_v25 }
  0x49   : > { %435 = vmatmul.mubr.f32.gmra.mxu0 %v229_v26 }
  0x4a   : > { %580 = vmatmul.mubr.f32.gmra.mxu1 %v231_v27  ;;  %439 = vmatprep.mubr.f32.mxu0 %v234_v28 }
  0x4b   : > { %584 = vmatprep.mubr.f32.mxu1 %v236_v29 }
  0x4d   : > { %440 = vmatmul.mubr.f32.gmra.mxu0 %v233_v30 }
  0x4e   : > { %585 = vmatmul.mubr.f32.gmra.mxu1 %v235_v31  ;;  %444 = vmatprep.mubr.f32.mxu0 %v238_v32 }
  0x4f   : > { %589 = vmatprep.mubr.f32.mxu1 %v240_v33 }
  0x51   : > { %445 = vmatmul.mubr.f32.gmra.mxu0 %v237_v34 }
  0x52   : > { %590 = vmatmul.mubr.f32.gmra.mxu1 %v239_v35  ;;  %449 = vmatprep.mubr.f32.mxu0 %v242_v36 }
  0x53   : > { %594 = vmatprep.mubr.f32.mxu1 %v244_v37 }
  0x55   : > { %450 = vmatmul.mubr.f32.gmra.mxu0 %v241_v38 }
  0x56   : > { %595 = vmatmul.mubr.f32.gmra.mxu1 %v243_v39  ;;  %454 = vmatprep.mubr.f32.mxu0 %v246_v40 }
  0x57   : > { %599 = vmatprep.mubr.f32.mxu1 %v248_v41 }
  0x59   : > { %455 = vmatmul.mubr.f32.gmra.mxu0 %v245_v42 }
  0x5a   : > { %600 = vmatmul.mubr.f32.gmra.mxu1 %v247_v43  ;;  %459 = vmatprep.mubr.f32.mxu0 %v250_v44 }
  0x5b   : > { %604 = vmatprep.mubr.f32.mxu1 %v252_v45 }
  0x5d   : > { %460 = vmatmul.mubr.f32.gmra.mxu0 %v249_v46 }
  0x5e   : > { %605 = vmatmul.mubr.f32.gmra.mxu1 %v251_v47  ;;  %464 = vmatprep.mubr.f32.mxu0 %v254_v48 }
  0x5f   : > { %609 = vmatprep.mubr.f32.mxu1 %v256_v49 }
  0x61   : > { %465 = vmatmul.mubr.f32.gmra.mxu0 %v253_v50 }
  0x62   : > { %610 = vmatmul.mubr.f32.gmra.mxu1 %v255_v51  ;;  %469 = vmatprep.mubr.f32.mxu0 %v258_v52 }
  0x63   : > { %614 = vmatprep.mubr.f32.mxu1 %v260_v53 }
  0x65   : > { %470 = vmatmul.mubr.f32.gmra.mxu0 %v257_v54 }
  0x66   : > { %615 = vmatmul.mubr.f32.gmra.mxu1 %v259_v55  ;;  %474 = vmatprep.mubr.f32.mxu0 %v262_v56 }
  0x67   : > { %619 = vmatprep.mubr.f32.mxu1 %v264_v57 }
  0x69   : > { %475 = vmatmul.mubr.f32.gmra.mxu0 %v261_v58 }
  0x6a   : > { %620 = vmatmul.mubr.f32.gmra.mxu1 %v263_v59  ;;  %479 = vmatprep.mubr.f32.mxu0 %v266_v60 }
  0x6b   : > { %624 = vmatprep.mubr.f32.mxu1 %v268_v61 }
  0x6d   : > { %480 = vmatmul.mubr.f32.gmra.mxu0 %v265_v62 }
  0x6e   : > { %625 = vmatmul.mubr.f32.gmra.mxu1 %v267_v63 }
  0xf1   : > { %v820_v0 = vpop.f32.mrf.mxu0 }
  0xf2   : > { %v900_v1 = vpop.f32.mrf.mxu1 }
  0xf3   : > { %v821_v3 = vpop.f32.mrf.mxu0 }
  0xf4   : > { %v901_v4 = vpop.f32.mrf.mxu1  ;;  %v822_v5 = vadd.f32 %v821_v3, %v820_v0 }
  0xf5   : > { %v823_v6 = vpop.f32.mrf.mxu0  ;;  %v902_v9 = vadd.f32 %v901_v4, %v900_v1 }
  0xf6   : > { %v903_v7 = vpop.f32.mrf.mxu1  ;;  %v407_v8 = vadd.f32 %v822_v5, %v1141_v2 }
  0xf7   : > { %v824_v10 = vpop.f32.mrf.mxu0 }
  0xf8   : > { %v904_v11 = vpop.f32.mrf.mxu1  ;;  %v552_v12 = vadd.f32 %v902_v9, %v407_v8  ;;  %v825_v13 = vadd.f32 %v824_v10, %v823_v6 }
  0xf9   : > { %v826_v14 = vpop.f32.mrf.mxu0  ;;  %v905_v18 = vadd.f32 %v904_v11, %v903_v7 }
  0xfa   : > { %v906_v15 = vpop.f32.mrf.mxu1  ;;  %vm630_vm1 = vcmp.ge.f32.partialorder %v552_v12, 0.0  ;;  %v646_v16 = vmul.f32 0.01, %v552_v12  ;;  %v412_v17 = vadd.f32 %v825_v13, %v1141_v2 }
  0xfb   : > { %v827_v19 = vpop.f32.mrf.mxu0 }
  0xfc   : > { %v907_v20 = vpop.f32.mrf.mxu1  ;;  %v662_v21 = vsel %vm630_vm1, %v552_v12, %v646_v16  ;;  %v557_v22 = vadd.f32 %v905_v18, %v412_v17  ;;  %v828_v23 = vadd.f32 %v827_v19, %v826_v14 }
  0xfd   : > { %679 = vst.msk [vmem:[%s1148_s27] sm:$0xff] %vm678_vm0, %v662_v21  ;;  %v829_v24 = vpop.f32.mrf.mxu0  ;;  %v908_v28 = vadd.f32 %v907_v20, %v906_v15 }
  0xfe   : > { %v909_v25 = vpop.f32.mrf.mxu1  ;;  %vm631_vm2 = vcmp.ge.f32.partialorder %v557_v22, 0.0  ;;  %v647_v26 = vmul.f32 0.01, %v557_v22  ;;  %v417_v27 = vadd.f32 %v828_v23, %v1141_v2 }
  0xff   : > { %v830_v29 = vpop.f32.mrf.mxu0 }
 0x100   : > { %v910_v30 = vpop.f32.mrf.mxu1  ;;  %v663_v31 = vsel %vm631_vm2, %v557_v22, %v647_v26  ;;  %v562_v32 = vadd.f32 %v908_v28, %v417_v27  ;;  %v831_v33 = vadd.f32 %v830_v29, %v829_v24 }
 0x101   : > { %680 = vst.msk [vmem:[%s1148_s27 + $0x8] sm:$0xff] %vm678_vm0, %v663_v31  ;;  %v832_v34 = vpop.f32.mrf.mxu0  ;;  %v911_v38 = vadd.f32 %v910_v30, %v909_v25 }
 0x102   : > { %v912_v35 = vpop.f32.mrf.mxu1  ;;  %vm632_vm3 = vcmp.ge.f32.partialorder %v562_v32, 0.0  ;;  %v648_v36 = vmul.f32 0.01, %v562_v32  ;;  %v422_v37 = vadd.f32 %v831_v33, %v1141_v2 }
 0x103   : > { %v833_v39 = vpop.f32.mrf.mxu0 }
 0x104   : > { %v913_v40 = vpop.f32.mrf.mxu1  ;;  %v664_v41 = vsel %vm632_vm3, %v562_v32, %v648_v36  ;;  %v567_v42 = vadd.f32 %v911_v38, %v422_v37  ;;  %v834_v43 = vadd.f32 %v833_v39, %v832_v34 }
 0x105   : > { %681 = vst.msk [vmem:[%s1148_s27 + $0x10] sm:$0xff] %vm678_vm0, %v664_v41  ;;  %v835_v44 = vpop.f32.mrf.mxu0  ;;  %v914_v48 = vadd.f32 %v913_v40, %v912_v35 }
 0x106   : > { %v915_v45 = vpop.f32.mrf.mxu1  ;;  %vm633_vm4 = vcmp.ge.f32.partialorder %v567_v42, 0.0  ;;  %v649_v46 = vmul.f32 0.01, %v567_v42  ;;  %v427_v47 = vadd.f32 %v834_v43, %v1141_v2 }
 0x107   : > { %v836_v49 = vpop.f32.mrf.mxu0 }
 0x108   : > { %v916_v50 = vpop.f32.mrf.mxu1  ;;  %v665_v51 = vsel %vm633_vm4, %v567_v42, %v649_v46  ;;  %v572_v52 = vadd.f32 %v914_v48, %v427_v47  ;;  %v837_v53 = vadd.f32 %v836_v49, %v835_v44 }
 0x109   : > { %682 = vst.msk [vmem:[%s1148_s27 + $0x18] sm:$0xff] %vm678_vm0, %v665_v51  ;;  %v838_v54 = vpop.f32.mrf.mxu0  ;;  %v917_v58 = vadd.f32 %v916_v50, %v915_v45 }
 0x10a   : > { %v918_v55 = vpop.f32.mrf.mxu1  ;;  %vm634_vm5 = vcmp.ge.f32.partialorder %v572_v52, 0.0  ;;  %v650_v56 = vmul.f32 0.01, %v572_v52  ;;  %v432_v57 = vadd.f32 %v837_v53, %v1141_v2 }
 0x10b   : > { %v839_v59 = vpop.f32.mrf.mxu0 }
 0x10c   : > { %v919_v60 = vpop.f32.mrf.mxu1  ;;  %v666_v61 = vsel %vm634_vm5, %v572_v52, %v650_v56  ;;  %v577_v62 = vadd.f32 %v917_v58, %v432_v57  ;;  %v840_v63 = vadd.f32 %v839_v59, %v838_v54 }
 0x10d   : > { %683 = vst.msk [vmem:[%s1148_s27 + $0x20] sm:$0xff] %vm678_vm0, %v666_v61  ;;  %v841_v0 = vpop.f32.mrf.mxu0  ;;  %v920_v5 = vadd.f32 %v919_v60, %v918_v55 }
 0x10e   : > { %v921_v1 = vpop.f32.mrf.mxu1  ;;  %vm635_vm6 = vcmp.ge.f32.partialorder %v577_v62, 0.0  ;;  %v651_v3 = vmul.f32 0.01, %v577_v62  ;;  %v437_v4 = vadd.f32 %v840_v63, %v1141_v2 }
 0x10f   : > { %v842_v6 = vpop.f32.mrf.mxu0 }
 0x110   : > { %v922_v7 = vpop.f32.mrf.mxu1  ;;  %v667_v8 = vsel %vm635_vm6, %v577_v62, %v651_v3  ;;  %v582_v9 = vadd.f32 %v920_v5, %v437_v4  ;;  %v843_v10 = vadd.f32 %v842_v6, %v841_v0 }
 0x111   : > { %684 = vst.msk [vmem:[%s1148_s27 + $0x28] sm:$0xff] %vm678_vm0, %v667_v8  ;;  %v844_v11 = vpop.f32.mrf.mxu0  ;;  %v923_v15 = vadd.f32 %v922_v7, %v921_v1 }
 0x112   : > { %v924_v12 = vpop.f32.mrf.mxu1  ;;  %vm636_vm7 = vcmp.ge.f32.partialorder %v582_v9, 0.0  ;;  %v652_v13 = vmul.f32 0.01, %v582_v9  ;;  %v442_v14 = vadd.f32 %v843_v10, %v1141_v2 }
 0x113   : > { %v845_v16 = vpop.f32.mrf.mxu0 }
 0x114   : > { %v925_v17 = vpop.f32.mrf.mxu1  ;;  %v668_v18 = vsel %vm636_vm7, %v582_v9, %v652_v13  ;;  %v587_v19 = vadd.f32 %v923_v15, %v442_v14  ;;  %v846_v20 = vadd.f32 %v845_v16, %v844_v11 }
 0x115   : > { %685 = vst.msk [vmem:[%s1148_s27 + $0x30] sm:$0xff] %vm678_vm0, %v668_v18  ;;  %v847_v21 = vpop.f32.mrf.mxu0  ;;  %v926_v25 = vadd.f32 %v925_v17, %v924_v12 }
 0x116   : > { %v927_v22 = vpop.f32.mrf.mxu1  ;;  %vm637_vm8 = vcmp.ge.f32.partialorder %v587_v19, 0.0  ;;  %v653_v23 = vmul.f32 0.01, %v587_v19  ;;  %v447_v24 = vadd.f32 %v846_v20, %v1141_v2 }
 0x117   : > { %v848_v26 = vpop.f32.mrf.mxu0 }
 0x118   : > { %v928_v27 = vpop.f32.mrf.mxu1  ;;  %v669_v28 = vsel %vm637_vm8, %v587_v19, %v653_v23  ;;  %v592_v29 = vadd.f32 %v926_v25, %v447_v24  ;;  %v849_v30 = vadd.f32 %v848_v26, %v847_v21 }
 0x119   : > { %686 = vst.msk [vmem:[%s1148_s27 + $0x38] sm:$0xff] %vm678_vm0, %v669_v28  ;;  %v850_v31 = vpop.f32.mrf.mxu0  ;;  %v929_v35 = vadd.f32 %v928_v27, %v927_v22 }
 0x11a   : > { %v930_v32 = vpop.f32.mrf.mxu1  ;;  %vm638_vm9 = vcmp.ge.f32.partialorder %v592_v29, 0.0  ;;  %v654_v33 = vmul.f32 0.01, %v592_v29  ;;  %v452_v34 = vadd.f32 %v849_v30, %v1141_v2 }
 0x11b   : > { %v851_v36 = vpop.f32.mrf.mxu0 }
 0x11c   : > { %v931_v37 = vpop.f32.mrf.mxu1  ;;  %v670_v38 = vsel %vm638_vm9, %v592_v29, %v654_v33  ;;  %v597_v39 = vadd.f32 %v929_v35, %v452_v34  ;;  %v852_v40 = vadd.f32 %v851_v36, %v850_v31 }
 0x11d   : > { %687 = vst.msk [vmem:[%s1148_s27 + $0x40] sm:$0xff] %vm678_vm0, %v670_v38  ;;  %v853_v41 = vpop.f32.mrf.mxu0  ;;  %v932_v45 = vadd.f32 %v931_v37, %v930_v32 }
 0x11e   : > { %v933_v42 = vpop.f32.mrf.mxu1  ;;  %vm639_vm10 = vcmp.ge.f32.partialorder %v597_v39, 0.0  ;;  %v655_v43 = vmul.f32 0.01, %v597_v39  ;;  %v457_v44 = vadd.f32 %v852_v40, %v1141_v2 }
 0x11f   : > { %v854_v46 = vpop.f32.mrf.mxu0 }
 0x120   : > { %v934_v47 = vpop.f32.mrf.mxu1  ;;  %v671_v48 = vsel %vm639_vm10, %v597_v39, %v655_v43  ;;  %v602_v49 = vadd.f32 %v932_v45, %v457_v44  ;;  %v855_v50 = vadd.f32 %v854_v46, %v853_v41 }
 0x121   : > { %688 = vst.msk [vmem:[%s1148_s27 + $0x48] sm:$0xff] %vm678_vm0, %v671_v48  ;;  %v856_v51 = vpop.f32.mrf.mxu0  ;;  %v935_v55 = vadd.f32 %v934_v47, %v933_v42 }
 0x122   : > { %v936_v52 = vpop.f32.mrf.mxu1  ;;  %vm640_vm11 = vcmp.ge.f32.partialorder %v602_v49, 0.0  ;;  %v656_v53 = vmul.f32 0.01, %v602_v49  ;;  %v462_v54 = vadd.f32 %v855_v50, %v1141_v2 }
 0x123   : > { %v857_v56 = vpop.f32.mrf.mxu0 }
 0x124   : > { %v937_v57 = vpop.f32.mrf.mxu1  ;;  %v672_v58 = vsel %vm640_vm11, %v602_v49, %v656_v53  ;;  %v607_v59 = vadd.f32 %v935_v55, %v462_v54  ;;  %v858_v60 = vadd.f32 %v857_v56, %v856_v51 }
 0x125   : > { %689 = vst.msk [vmem:[%s1148_s27 + $0x50] sm:$0xff] %vm678_vm0, %v672_v58  ;;  %v859_v61 = vpop.f32.mrf.mxu0  ;;  %v938_v1 = vadd.f32 %v937_v57, %v936_v52 }
 0x126   : > { %v939_v62 = vpop.f32.mrf.mxu1  ;;  %vm641_vm12 = vcmp.ge.f32.partialorder %v607_v59, 0.0  ;;  %v657_v63 = vmul.f32 0.01, %v607_v59  ;;  %v467_v0 = vadd.f32 %v858_v60, %v1141_v2 }
 0x127   : > { %v860_v3 = vpop.f32.mrf.mxu0 }
 0x128   : > { %v940_v4 = vpop.f32.mrf.mxu1  ;;  %v673_v5 = vsel %vm641_vm12, %v607_v59, %v657_v63  ;;  %v612_v6 = vadd.f32 %v938_v1, %v467_v0  ;;  %v861_v7 = vadd.f32 %v860_v3, %v859_v61 }
 0x129   : > { %690 = vst.msk [vmem:[%s1148_s27 + $0x58] sm:$0xff] %vm678_vm0, %v673_v5  ;;  %v862_v8 = vpop.f32.mrf.mxu0  ;;  %v941_v12 = vadd.f32 %v940_v4, %v939_v62 }
 0x12a   : > { %v942_v9 = vpop.f32.mrf.mxu1  ;;  %vm642_vm13 = vcmp.ge.f32.partialorder %v612_v6, 0.0  ;;  %v658_v10 = vmul.f32 0.01, %v612_v6  ;;  %v472_v11 = vadd.f32 %v861_v7, %v1141_v2 }
 0x12b   : > { %v863_v13 = vpop.f32.mrf.mxu0 }
 0x12c   : > { %v943_v14 = vpop.f32.mrf.mxu1  ;;  %v674_v15 = vsel %vm642_vm13, %v612_v6, %v658_v10  ;;  %v617_v16 = vadd.f32 %v941_v12, %v472_v11  ;;  %v864_v17 = vadd.f32 %v863_v13, %v862_v8 }
 0x12d   : > { %691 = vst.msk [vmem:[%s1148_s27 + $0x60] sm:$0xff] %vm678_vm0, %v674_v15  ;;  %v865_v18 = vpop.f32.mrf.mxu0  ;;  %v944_v22 = vadd.f32 %v943_v14, %v942_v9 }
 0x12e   : > { %v945_v19 = vpop.f32.mrf.mxu1  ;;  %vm643_vm14 = vcmp.ge.f32.partialorder %v617_v16, 0.0  ;;  %v659_v20 = vmul.f32 0.01, %v617_v16  ;;  %v477_v21 = vadd.f32 %v864_v17, %v1141_v2 }
 0x12f   : > { %v866_v23 = vpop.f32.mrf.mxu0 }
 0x130   : > { %v946_v24 = vpop.f32.mrf.mxu1  ;;  %v675_v25 = vsel %vm643_vm14, %v617_v16, %v659_v20  ;;  %v622_v26 = vadd.f32 %v944_v22, %v477_v21  ;;  %v867_v27 = vadd.f32 %v866_v23, %v865_v18 }
 0x131   : > { %692 = vst.msk [vmem:[%s1148_s27 + $0x68] sm:$0xff] %vm678_vm0, %v675_v25  ;;  %v947_v30 = vadd.f32 %v946_v24, %v945_v19 }
 0x132   : > { %vm644_vm15 = vcmp.ge.f32.partialorder %v622_v26, 0.0  ;;  %v660_v28 = vmul.f32 0.01, %v622_v26  ;;  %v482_v29 = vadd.f32 %v867_v27, %v1141_v2 }
 0x134   : > { %v676_v31 = vsel %vm644_vm15, %v622_v26, %v660_v28  ;;  %v627_v32 = vadd.f32 %v947_v30, %v482_v29 }
 0x135   : > { %693 = vst.msk [vmem:[%s1148_s27 + $0x70] sm:$0xff] %vm678_vm0, %v676_v31 }
 0x136   : > { %vm645_vm1 = vcmp.ge.f32.partialorder %v627_v32, 0.0  ;;  %v661_v33 = vmul.f32 0.01, %v627_v32 }
 0x138   : > { %v677_v34 = vsel %vm645_vm1, %v627_v32, %v661_v33 }
 0x139   : > { %694 = vst.msk [vmem:[%s1148_s27 + $0x78] sm:$0xff] %vm678_vm0, %v677_v34 }
 0x13a PF: > { %s13_s12 = sadd.s32 1, %s962_s12  }
 0x13b   : > { %p10_p4 = scmp.ge.s32.totalorder %s13_s12, 4  }
 0x13d   :  { %12 = sbr.rel (!%p10_p4) target bundleno = 1 (0x1), region = 68 }

// kernel: mutual_info_loss.3
= control target key start
LH: loop header
LB: loop body
LE: loop exit
PB: predicated region body
PF: predicated region fallthrough
CT: control target
= control target key end

     0   :  { %s3949_s0 = inlined_call_operand.vmem [shape: f32[2,2,1024], index: 0, kind: input, shape index: {}]   ;;  %s3950_s1 = inlined_call_operand.vmem [shape: f32[2,1024,256], index: 1, kind: input, shape index: {}]   ;;  %s3951_s2 = inlined_call_operand.vmem [shape: f32[2,1,256], index: 2, kind: input, shape index: {}]   ;;  %s3952_s3 = inlined_call_operand.vmem [shape: f32[2,256,32], index: 3, kind: input, shape index: {}]   ;;  %s3953_s4 = inlined_call_operand.vmem [shape: f32[2,1,32], index: 4, kind: input, shape index: {}]   ;;  %s3954_s5 = inlined_call_operand.vmem [shape: f32[2,2,16], index: 5, kind: input, shape index: {}]   ;;  %s3955_s6 = inlined_call_operand.hbm [shape: f32[1], index: 6, kind: output, shape index: {}]  }
   0x1   :  { %v57_v0 = vld [vmem:[%s3950_s1 + $0xf8] sm:$0xff]  ;;  %v56_v2 = vld [vmem:[%s3950_s1 + $0xf0] sm:$0xff]  ;;  %v55_v4 = vld [vmem:[%s3950_s1 + $0xe8] sm:$0xff] }
   0x2   :  { %v121_v1 = vld [vmem:[%s3950_s1 + $0x2f8] sm:$0xff]  ;;  %338 = vmatprep.subr.mxu0 %v57_v0  ;;  %v120_v3 = vld [vmem:[%s3950_s1 + $0x2f0] sm:$0xff]  ;;  %v119_v5 = vld [vmem:[%s3950_s1 + $0x2e8] sm:$0xff] }
   0x3   :  { %409 = vmatprep.subr.mxu1 %v121_v1  ;;  %339 = vmatpush1.msra.mxu0 %v56_v2  ;;  %v54_v6 = vld [vmem:[%s3950_s1 + $0xe0] sm:$0xff]  ;;  %v53_v8 = vld [vmem:[%s3950_s1 + $0xd8] sm:$0xff]  ;;  %v52_v10 = vld [vmem:[%s3950_s1 + $0xd0] sm:$0xff] }
   0x4   :  { %410 = vmatpush1.msra.mxu1 %v120_v3  ;;  %v118_v7 = vld [vmem:[%s3950_s1 + $0x2e0] sm:$0xff]  ;;  %340 = vmatprep.subr.mxu0 %v55_v4  ;;  %v117_v9 = vld [vmem:[%s3950_s1 + $0x2d8] sm:$0xff]  ;;  %v116_v11 = vld [vmem:[%s3950_s1 + $0x2d0] sm:$0xff] }
   0x5   :  { %411 = vmatprep.subr.mxu1 %v119_v5  ;;  %341 = vmatpush1.msra.mxu0 %v54_v6  ;;  %v51_v12 = vld [vmem:[%s3950_s1 + $0xc8] sm:$0xff]  ;;  %v50_v14 = vld [vmem:[%s3950_s1 + $0xc0] sm:$0xff]  ;;  %v49_v16 = vld [vmem:[%s3950_s1 + $0xb8] sm:$0xff] }
   0x6   :  { %412 = vmatpush1.msra.mxu1 %v118_v7  ;;  %v115_v13 = vld [vmem:[%s3950_s1 + $0x2c8] sm:$0xff]  ;;  %342 = vmatprep.subr.mxu0 %v53_v8  ;;  %v114_v15 = vld [vmem:[%s3950_s1 + $0x2c0] sm:$0xff]  ;;  %v113_v17 = vld [vmem:[%s3950_s1 + $0x2b8] sm:$0xff] }
   0x7   :  { %413 = vmatprep.subr.mxu1 %v117_v9  ;;  %343 = vmatpush1.msra.mxu0 %v52_v10  ;;  %v48_v18 = vld [vmem:[%s3950_s1 + $0xb0] sm:$0xff]  ;;  %v47_v20 = vld [vmem:[%s3950_s1 + $0xa8] sm:$0xff]  ;;  %v46_v22 = vld [vmem:[%s3950_s1 + $0xa0] sm:$0xff] }
   0x8   :  { %414 = vmatpush1.msra.mxu1 %v116_v11  ;;  %344 = vmatprep.subr.mxu0 %v51_v12  ;;  %v112_v19 = vld [vmem:[%s3950_s1 + $0x2b0] sm:$0xff]  ;;  %v111_v21 = vld [vmem:[%s3950_s1 + $0x2a8] sm:$0xff]  ;;  %v110_v23 = vld [vmem:[%s3950_s1 + $0x2a0] sm:$0xff] }
   0x9   :  { %415 = vmatprep.subr.mxu1 %v115_v13  ;;  %345 = vmatpush1.msra.mxu0 %v50_v14  ;;  %v45_v24 = vld [vmem:[%s3950_s1 + $0x98] sm:$0xff]  ;;  %v44_v26 = vld [vmem:[%s3950_s1 + $0x90] sm:$0xff]  ;;  %v43_v28 = vld [vmem:[%s3950_s1 + $0x88] sm:$0xff] }
   0xa   :  { %416 = vmatpush1.msra.mxu1 %v114_v15  ;;  %346 = vmatprep.subr.mxu0 %v49_v16  ;;  %v109_v25 = vld [vmem:[%s3950_s1 + $0x298] sm:$0xff]  ;;  %v108_v27 = vld [vmem:[%s3950_s1 + $0x290] sm:$0xff]  ;;  %v107_v29 = vld [vmem:[%s3950_s1 + $0x288] sm:$0xff] }
   0xb   :  { %417 = vmatprep.subr.mxu1 %v113_v17  ;;  %347 = vmatpush1.msra.mxu0 %v48_v18  ;;  %v42_v30 = vld [vmem:[%s3950_s1 + $0x80] sm:$0xff]  ;;  %v41_v32 = vld [vmem:[%s3950_s1 + $0x78] sm:$0xff]  ;;  %v40_v34 = vld [vmem:[%s3950_s1 + $0x70] sm:$0xff] }
   0xc   :  { %418 = vmatpush1.msra.mxu1 %v112_v19  ;;  %348 = vmatprep.subr.mxu0 %v47_v20  ;;  %v106_v31 = vld [vmem:[%s3950_s1 + $0x280] sm:$0xff]  ;;  %v105_v33 = vld [vmem:[%s3950_s1 + $0x278] sm:$0xff]  ;;  %v104_v35 = vld [vmem:[%s3950_s1 + $0x270] sm:$0xff] }
   0xd   :  { %419 = vmatprep.subr.mxu1 %v111_v21  ;;  %349 = vmatpush1.msra.mxu0 %v46_v22  ;;  %v39_v36 = vld [vmem:[%s3950_s1 + $0x68] sm:$0xff]  ;;  %v38_v38 = vld [vmem:[%s3950_s1 + $0x60] sm:$0xff]  ;;  %v37_v40 = vld [vmem:[%s3950_s1 + $0x58] sm:$0xff] }
   0xe   :  { %420 = vmatpush1.msra.mxu1 %v110_v23  ;;  %350 = vmatprep.subr.mxu0 %v45_v24  ;;  %v103_v37 = vld [vmem:[%s3950_s1 + $0x268] sm:$0xff]  ;;  %v102_v39 = vld [vmem:[%s3950_s1 + $0x260] sm:$0xff]  ;;  %v101_v41 = vld [vmem:[%s3950_s1 + $0x258] sm:$0xff] }
   0xf   :  { %421 = vmatprep.subr.mxu1 %v109_v25  ;;  %351 = vmatpush1.msra.mxu0 %v44_v26  ;;  %v36_v42 = vld [vmem:[%s3950_s1 + $0x50] sm:$0xff]  ;;  %v35_v44 = vld [vmem:[%s3950_s1 + $0x48] sm:$0xff]  ;;  %v34_v46 = vld [vmem:[%s3950_s1 + $0x40] sm:$0xff] }
  0x10   :  { %422 = vmatpush1.msra.mxu1 %v108_v27  ;;  %352 = vmatprep.subr.mxu0 %v43_v28  ;;  %v100_v43 = vld [vmem:[%s3950_s1 + $0x250] sm:$0xff]  ;;  %v99_v45 = vld [vmem:[%s3950_s1 + $0x248] sm:$0xff]  ;;  %v98_v47 = vld [vmem:[%s3950_s1 + $0x240] sm:$0xff] }
  0x11   :  { %423 = vmatprep.subr.mxu1 %v107_v29  ;;  %353 = vmatpush1.msra.mxu0 %v42_v30  ;;  %v33_v48 = vld [vmem:[%s3950_s1 + $0x38] sm:$0xff]  ;;  %v32_v50 = vld [vmem:[%s3950_s1 + $0x30] sm:$0xff]  ;;  %v31_v52 = vld [vmem:[%s3950_s1 + $0x28] sm:$0xff]  ;;  %v284_v30 = vlaneseq }
  0x12   :  { %424 = vmatpush1.msra.mxu1 %v106_v31  ;;  %354 = vmatprep.subr.mxu0 %v41_v32  ;;  %v97_v49 = vld [vmem:[%s3950_s1 + $0x238] sm:$0xff]  ;;  %v96_v51 = vld [vmem:[%s3950_s1 + $0x230] sm:$0xff]  ;;  %v95_v53 = vld [vmem:[%s3950_s1 + $0x228] sm:$0xff]  ;;  %v2083_v31 = vmov 1983009808  }
  0x13   :  { %425 = vmatprep.subr.mxu1 %v105_v33  ;;  %355 = vmatpush1.msra.mxu0 %v40_v34  ;;  %v30_v54 = vld [vmem:[%s3950_s1 + $0x20] sm:$0xff]  ;;  %v29_v56 = vld [vmem:[%s3950_s1 + $0x18] sm:$0xff]  ;;  %v28_v58 = vld [vmem:[%s3950_s1 + $0x10] sm:$0xff]  ;;  %v298_v32 = vunpack.c.l.s4 %v2083_v31 }
  0x14   :  { %426 = vmatpush1.msra.mxu1 %v104_v35  ;;  %356 = vmatprep.subr.mxu0 %v39_v36  ;;  %v94_v55 = vld [vmem:[%s3950_s1 + $0x220] sm:$0xff]  ;;  %v93_v57 = vld [vmem:[%s3950_s1 + $0x218] sm:$0xff]  ;;  %v92_v59 = vld [vmem:[%s3950_s1 + $0x210] sm:$0xff] }
  0x15   :  { %427 = vmatprep.subr.mxu1 %v103_v37  ;;  %357 = vmatpush1.msra.mxu0 %v38_v38  ;;  %v27_v60 = vld [vmem:[%s3950_s1 + $0x8] sm:$0xff]  ;;  %v26_v62 = vld [vmem:[%s3950_s1] sm:$0xff]  ;;  %v89_v0 = vld [vmem:[%s3950_s1 + $0x1f8] sm:$0xff] }
  0x16   :  { %428 = vmatpush1.msra.mxu1 %v102_v39  ;;  %358 = vmatprep.subr.mxu0 %v37_v40  ;;  %v91_v61 = vld [vmem:[%s3950_s1 + $0x208] sm:$0xff]  ;;  %v90_v63 = vld [vmem:[%s3950_s1 + $0x200] sm:$0xff]  ;;  %v153_v1 = vld [vmem:[%s3950_s1 + $0x3f8] sm:$0xff] }
  0x17   :  { %429 = vmatprep.subr.mxu1 %v101_v41  ;;  %359 = vmatpush1.msra.mxu0 %v36_v42  ;;  %v88_v2 = vld [vmem:[%s3950_s1 + $0x1f0] sm:$0xff]  ;;  %v87_v4 = vld [vmem:[%s3950_s1 + $0x1e8] sm:$0xff]  ;;  %v86_v6 = vld [vmem:[%s3950_s1 + $0x1e0] sm:$0xff]  ;;  %v2428_v41 = vshrl.u32 %v284_v30, 7  ;;  %v299_v42 = vunpack.c.0.s8 %v298_v32 }
  0x18   :  { %430 = vmatpush1.msra.mxu1 %v100_v43  ;;  %360 = vmatprep.subr.mxu0 %v35_v44  ;;  %v152_v3 = vld [vmem:[%s3950_s1 + $0x3f0] sm:$0xff]  ;;  %v151_v5 = vld [vmem:[%s3950_s1 + $0x3e8] sm:$0xff]  ;;  %v150_v7 = vld [vmem:[%s3950_s1 + $0x3e0] sm:$0xff] }
  0x19   :  { %431 = vmatprep.subr.mxu1 %v99_v45  ;;  %361 = vmatpush1.msra.mxu0 %v34_v46  ;;  %v85_v8 = vld [vmem:[%s3950_s1 + $0x1d8] sm:$0xff]  ;;  %v84_v10 = vld [vmem:[%s3950_s1 + $0x1d0] sm:$0xff]  ;;  %v83_v12 = vld [vmem:[%s3950_s1 + $0x1c8] sm:$0xff] }
  0x1a   :  { %432 = vmatpush1.msra.mxu1 %v98_v47  ;;  %362 = vmatprep.subr.mxu0 %v33_v48  ;;  %v149_v9 = vld [vmem:[%s3950_s1 + $0x3d8] sm:$0xff]  ;;  %v148_v11 = vld [vmem:[%s3950_s1 + $0x3d0] sm:$0xff]  ;;  %v147_v13 = vld [vmem:[%s3950_s1 + $0x3c8] sm:$0xff] }
  0x1b   :  { %433 = vmatprep.subr.mxu1 %v97_v49  ;;  %363 = vmatpush1.msra.mxu0 %v32_v50  ;;  %v82_v14 = vld [vmem:[%s3950_s1 + $0x1c0] sm:$0xff]  ;;  %v81_v16 = vld [vmem:[%s3950_s1 + $0x1b8] sm:$0xff]  ;;  %v80_v18 = vld [vmem:[%s3950_s1 + $0x1b0] sm:$0xff] }
  0x1c   :  { %434 = vmatpush1.msra.mxu1 %v96_v51  ;;  %364 = vmatprep.subr.mxu0 %v31_v52  ;;  %v146_v15 = vld [vmem:[%s3950_s1 + $0x3c0] sm:$0xff]  ;;  %v145_v17 = vld [vmem:[%s3950_s1 + $0x3b8] sm:$0xff]  ;;  %v144_v19 = vld [vmem:[%s3950_s1 + $0x3b0] sm:$0xff]  ;;  %v2458_v52 = vsub.s32 %v299_v42, %v2428_v41 }
  0x1d   :  { %435 = vmatprep.subr.mxu1 %v95_v53  ;;  %365 = vmatpush1.msra.mxu0 %v30_v54  ;;  %v79_v20 = vld [vmem:[%s3950_s1 + $0x1a8] sm:$0xff]  ;;  %v78_v22 = vld [vmem:[%s3950_s1 + $0x1a0] sm:$0xff]  ;;  %v77_v24 = vld [vmem:[%s3950_s1 + $0x198] sm:$0xff] }
  0x1e   :  { %436 = vmatpush1.msra.mxu1 %v94_v55  ;;  %366 = vmatprep.subr.mxu0 %v29_v56  ;;  %v143_v21 = vld [vmem:[%s3950_s1 + $0x3a8] sm:$0xff]  ;;  %v142_v23 = vld [vmem:[%s3950_s1 + $0x3a0] sm:$0xff]  ;;  %v141_v25 = vld [vmem:[%s3950_s1 + $0x398] sm:$0xff] }
  0x1f   :  { %437 = vmatprep.subr.mxu1 %v93_v57  ;;  %367 = vmatpush1.msra.mxu0 %v28_v58  ;;  %v76_v26 = vld [vmem:[%s3950_s1 + $0x190] sm:$0xff]  ;;  %v75_v28 = vld [vmem:[%s3950_s1 + $0x188] sm:$0xff]  ;;  %v74_v33 = vld [vmem:[%s3950_s1 + $0x180] sm:$0xff] }
  0x20   :  { %438 = vmatpush1.msra.mxu1 %v92_v59  ;;  %368 = vmatprep.subr.mxu0 %v27_v60  ;;  %v140_v27 = vld [vmem:[%s3950_s1 + $0x390] sm:$0xff]  ;;  %v139_v29 = vld [vmem:[%s3950_s1 + $0x388] sm:$0xff]  ;;  %v138_v34 = vld [vmem:[%s3950_s1 + $0x380] sm:$0xff] }
  0x21   :  { %439 = vmatprep.subr.mxu1 %v91_v61  ;;  %369 = vmatpush1.msra.mxu0 %v26_v62  ;;  %v73_v35 = vld [vmem:[%s3950_s1 + $0x178] sm:$0xff]  ;;  %v72_v37 = vld [vmem:[%s3950_s1 + $0x170] sm:$0xff]  ;;  %v71_v39 = vld [vmem:[%s3950_s1 + $0x168] sm:$0xff] }
  0x22   :  { %440 = vmatpush1.msra.mxu1 %v90_v63  ;;  %370 = vmatprep.subr.mxu0 %v89_v0  ;;  %v137_v36 = vld [vmem:[%s3950_s1 + $0x378] sm:$0xff]  ;;  %v136_v38 = vld [vmem:[%s3950_s1 + $0x370] sm:$0xff]  ;;  %v135_v40 = vld [vmem:[%s3950_s1 + $0x368] sm:$0xff] }
  0x23   :  { %441 = vmatprep.subr.mxu1 %v153_v1  ;;  %371 = vmatpush2.msra.mxu0 %v88_v2  ;;  %v70_v43 = vld [vmem:[%s3950_s1 + $0x160] sm:$0xff]  ;;  %v69_v45 = vld [vmem:[%s3950_s1 + $0x158] sm:$0xff]  ;;  %v68_v47 = vld [vmem:[%s3950_s1 + $0x150] sm:$0xff] }
  0x24   :  { %442 = vmatpush2.msra.mxu1 %v152_v3  ;;  %372 = vmatprep.subr.mxu0 %v87_v4  ;;  %v134_v44 = vld [vmem:[%s3950_s1 + $0x360] sm:$0xff]  ;;  %v133_v46 = vld [vmem:[%s3950_s1 + $0x358] sm:$0xff]  ;;  %v132_v48 = vld [vmem:[%s3950_s1 + $0x350] sm:$0xff] }
  0x25   :  { %443 = vmatprep.subr.mxu1 %v151_v5  ;;  %373 = vmatpush2.msra.mxu0 %v86_v6  ;;  %v24_v49 = vld [vmem:[%s3949_s0] sm:$0xff]  ;;  %v67_v50 = vld [vmem:[%s3950_s1 + $0x148] sm:$0xff]  ;;  %v65_v55 = vld [vmem:[%s3950_s1 + $0x138] sm:$0xff] }
  0x26   :  { %444 = vmatpush2.msra.mxu1 %v150_v7  ;;  %374 = vmatprep.subr.mxu0 %v85_v8  ;;  %v131_v51 = vld [vmem:[%s3950_s1 + $0x348] sm:$0xff]  ;;  %v66_v53 = vld [vmem:[%s3950_s1 + $0x140] sm:$0xff]  ;;  %v129_v56 = vld [vmem:[%s3950_s1 + $0x338] sm:$0xff]  ;;  %v296_v57 = vcombine.high %v24_v49, %v24_v49  ;;  %v303_v62 = vrot.slane %v24_v49, %v2458_v52 }
  0x27   :  { %445 = vmatprep.subr.mxu1 %v149_v9  ;;  %375 = vmatpush2.msra.mxu0 %v84_v10  ;;  %v130_v54 = vld [vmem:[%s3950_s1 + $0x340] sm:$0xff]  ;;  %v64_v58 = vld [vmem:[%s3950_s1 + $0x130] sm:$0xff]  ;;  %v63_v60 = vld [vmem:[%s3950_s1 + $0x128] sm:$0xff] }
  0x28   :  { %446 = vmatpush2.msra.mxu1 %v148_v11  ;;  %376 = vmatprep.subr.mxu0 %v83_v12  ;;  %v128_v59 = vld [vmem:[%s3950_s1 + $0x330] sm:$0xff]  ;;  %v127_v61 = vld [vmem:[%s3950_s1 + $0x328] sm:$0xff]  ;;  %v62_v63 = vld [vmem:[%s3950_s1 + $0x120] sm:$0xff]  ;;  %v310_v3 = vrot.slane %v296_v57, %v2458_v52  ;;  %v311_v8 = vcombine.high %v303_v62, %v303_v62 }
  0x29   :  { %447 = vmatprep.subr.mxu1 %v147_v13  ;;  %377 = vmatpush2.msra.mxu0 %v82_v14  ;;  %v126_v0 = vld [vmem:[%s3950_s1 + $0x320] sm:$0xff]  ;;  %v61_v1 = vld [vmem:[%s3950_s1 + $0x118] sm:$0xff]  ;;  %v60_v4 = vld [vmem:[%s3950_s1 + $0x110] sm:$0xff] }
  0x2a   :  { %448 = vmatpush2.msra.mxu1 %v146_v15  ;;  %378 = vmatprep.subr.mxu0 %v81_v16  ;;  %v125_v2 = vld [vmem:[%s3950_s1 + $0x318] sm:$0xff]  ;;  %v124_v5 = vld [vmem:[%s3950_s1 + $0x310] sm:$0xff]  ;;  %v59_v6 = vld [vmem:[%s3950_s1 + $0x108] sm:$0xff]  ;;  %v312_v11 = vcombine.high %v310_v3, %v310_v3 }
  0x2b   :  { %449 = vmatprep.subr.mxu1 %v145_v17  ;;  %379 = vmatpush2.msra.mxu0 %v80_v18  ;;  %v123_v7 = vld [vmem:[%s3950_s1 + $0x308] sm:$0xff]  ;;  %v58_v9 = vld [vmem:[%s3950_s1 + $0x100] sm:$0xff]  ;;  %v185_v12 = vld [vmem:[%s3950_s1 + $0x4f8] sm:$0xff] }
  0x2c   :  { %450 = vmatpush2.msra.mxu1 %v144_v19  ;;  %380 = vmatprep.subr.mxu0 %v79_v20  ;;  %v122_v10 = vld [vmem:[%s3950_s1 + $0x300] sm:$0xff]  ;;  %v249_v13 = vld [vmem:[%s3950_s1 + $0x6f8] sm:$0xff]  ;;  %v184_v14 = vld [vmem:[%s3950_s1 + $0x4f0] sm:$0xff] }
  0x2d   :  { %451 = vmatprep.subr.mxu1 %v143_v21  ;;  %381 = vmatpush2.msra.mxu0 %v78_v22  ;;  %v248_v15 = vld [vmem:[%s3950_s1 + $0x6f0] sm:$0xff]  ;;  %v183_v16 = vld [vmem:[%s3950_s1 + $0x4e8] sm:$0xff]  ;;  %v182_v18 = vld [vmem:[%s3950_s1 + $0x4e0] sm:$0xff] }
  0x2e   :  { %452 = vmatpush2.msra.mxu1 %v142_v23  ;;  %382 = vmatprep.subr.mxu0 %v77_v24  ;;  %v247_v17 = vld [vmem:[%s3950_s1 + $0x6e8] sm:$0xff]  ;;  %v246_v19 = vld [vmem:[%s3950_s1 + $0x6e0] sm:$0xff]  ;;  %v181_v20 = vld [vmem:[%s3950_s1 + $0x4d8] sm:$0xff] }
  0x2f   :  { %453 = vmatprep.subr.mxu1 %v141_v25  ;;  %383 = vmatpush2.msra.mxu0 %v76_v26  ;;  %v245_v21 = vld [vmem:[%s3950_s1 + $0x6d8] sm:$0xff]  ;;  %v180_v22 = vld [vmem:[%s3950_s1 + $0x4d0] sm:$0xff]  ;;  %v179_v24 = vld [vmem:[%s3950_s1 + $0x4c8] sm:$0xff] }
  0x30   :  { %454 = vmatpush2.msra.mxu1 %v140_v27  ;;  %384 = vmatprep.subr.mxu0 %v75_v28  ;;  %v244_v23 = vld [vmem:[%s3950_s1 + $0x6d0] sm:$0xff]  ;;  %v243_v25 = vld [vmem:[%s3950_s1 + $0x6c8] sm:$0xff]  ;;  %v178_v26 = vld [vmem:[%s3950_s1 + $0x4c0] sm:$0xff] }
  0x31   :  { %455 = vmatprep.subr.mxu1 %v139_v29  ;;  %385 = vmatpush2.msra.mxu0 %v74_v33  ;;  %v242_v27 = vld [vmem:[%s3950_s1 + $0x6c0] sm:$0xff]  ;;  %v177_v28 = vld [vmem:[%s3950_s1 + $0x4b8] sm:$0xff]  ;;  %v176_v30 = vld [vmem:[%s3950_s1 + $0x4b0] sm:$0xff] }
  0x32   :  { %456 = vmatpush2.msra.mxu1 %v138_v34  ;;  %386 = vmatprep.subr.mxu0 %v73_v35  ;;  %v241_v29 = vld [vmem:[%s3950_s1 + $0x6b8] sm:$0xff]  ;;  %v240_v31 = vld [vmem:[%s3950_s1 + $0x6b0] sm:$0xff]  ;;  %v175_v32 = vld [vmem:[%s3950_s1 + $0x4a8] sm:$0xff] }
  0x33   :  { %457 = vmatprep.subr.mxu1 %v137_v36  ;;  %387 = vmatpush2.msra.mxu0 %v72_v37  ;;  %v239_v33 = vld [vmem:[%s3950_s1 + $0x6a8] sm:$0xff]  ;;  %v174_v34 = vld [vmem:[%s3950_s1 + $0x4a0] sm:$0xff]  ;;  %v173_v36 = vld [vmem:[%s3950_s1 + $0x498] sm:$0xff] }
  0x34   :  { %458 = vmatpush2.msra.mxu1 %v136_v38  ;;  %388 = vmatprep.subr.mxu0 %v71_v39  ;;  %v238_v35 = vld [vmem:[%s3950_s1 + $0x6a0] sm:$0xff]  ;;  %v237_v37 = vld [vmem:[%s3950_s1 + $0x698] sm:$0xff]  ;;  %v172_v38 = vld [vmem:[%s3950_s1 + $0x490] sm:$0xff] }
  0x35   :  { %459 = vmatprep.subr.mxu1 %v135_v40  ;;  %389 = vmatpush2.msra.mxu0 %v70_v43  ;;  %v236_v39 = vld [vmem:[%s3950_s1 + $0x690] sm:$0xff]  ;;  %v171_v40 = vld [vmem:[%s3950_s1 + $0x488] sm:$0xff]  ;;  %v170_v43 = vld [vmem:[%s3950_s1 + $0x480] sm:$0xff] }
  0x36   :  { %460 = vmatpush2.msra.mxu1 %v134_v44  ;;  %390 = vmatprep.subr.mxu0 %v69_v45  ;;  %v235_v42 = vld [vmem:[%s3950_s1 + $0x688] sm:$0xff]  ;;  %v234_v44 = vld [vmem:[%s3950_s1 + $0x680] sm:$0xff]  ;;  %v169_v45 = vld [vmem:[%s3950_s1 + $0x478] sm:$0xff] }
  0x37   :  { %461 = vmatprep.subr.mxu1 %v133_v46  ;;  %391 = vmatpush2.msra.mxu0 %v68_v47  ;;  %v233_v46 = vld [vmem:[%s3950_s1 + $0x678] sm:$0xff]  ;;  %v168_v47 = vld [vmem:[%s3950_s1 + $0x470] sm:$0xff]  ;;  %v167_v49 = vld [vmem:[%s3950_s1 + $0x468] sm:$0xff] }
  0x38   :  { %462 = vmatpush2.msra.mxu1 %v132_v48  ;;  %392 = vmatprep.subr.mxu0 %v67_v50  ;;  %v232_v48 = vld [vmem:[%s3950_s1 + $0x670] sm:$0xff]  ;;  %v231_v50 = vld [vmem:[%s3950_s1 + $0x668] sm:$0xff] }
  0x39   :  { %463 = vmatprep.subr.mxu1 %v131_v51  ;;  %393 = vmatpush2.msra.mxu0 %v66_v53  ;;  %v166_v51 = vld [vmem:[%s3950_s1 + $0x460] sm:$0xff]  ;;  %v228_v57 = vld [vmem:[%s3950_s1 + $0x650] sm:$0xff] }
  0x3a   :  { %464 = vmatpush2.msra.mxu1 %v130_v54  ;;  %394 = vmatprep.subr.mxu0 %v65_v55  ;;  %v230_v53 = vld [vmem:[%s3950_s1 + $0x660] sm:$0xff]  ;;  %v165_v54 = vld [vmem:[%s3950_s1 + $0x458] sm:$0xff] }
  0x3b   :  { %465 = vmatprep.subr.mxu1 %v129_v56  ;;  %395 = vmatpush2.msra.mxu0 %v64_v58  ;;  %v229_v55 = vld [vmem:[%s3950_s1 + $0x658] sm:$0xff]  ;;  %v164_v56 = vld [vmem:[%s3950_s1 + $0x450] sm:$0xff]  ;;  %v163_v58 = vld [vmem:[%s3950_s1 + $0x448] sm:$0xff] }
  0x3c   :  { %466 = vmatpush2.msra.mxu1 %v128_v59  ;;  %396 = vmatprep.subr.mxu0 %v63_v60  ;;  %v227_v59 = vld [vmem:[%s3950_s1 + $0x648] sm:$0xff] }
  0x3d   :  { %467 = vmatprep.subr.mxu1 %v127_v61  ;;  %397 = vmatpush2.msra.mxu0 %v62_v63 }
  0x3e   :  { %468 = vmatpush2.msra.mxu1 %v126_v0  ;;  %398 = vmatprep.subr.mxu0 %v61_v1 }
  0x3f   :  { %469 = vmatprep.subr.mxu1 %v125_v2  ;;  %399 = vmatpush2.msra.mxu0 %v60_v4 }
  0x40   :  { %470 = vmatpush2.msra.mxu1 %v124_v5  ;;  %400 = vmatprep.subr.mxu0 %v59_v6 }
  0x41   :  { %471 = vmatprep.subr.mxu1 %v123_v7  ;;  %401 = vmatpush2.msra.mxu0 %v58_v9 }
  0x42   :  { %402 = vmatprep.mubr.f32.mxu0 %v311_v8  ;;  %472 = vmatpush2.msra.mxu1 %v122_v10 }
  0x43   :  { %403 = vmatmul.mubr.f32.vlgmr.msra.gmra.mxu0 %v303_v62  ;;  %473 = vmatprep.mubr.f32.mxu1 %v312_v11 }
  0x44   :  { %480 = vmatprep.subr.mxu0 %v185_v12  ;;  %551 = vmatprep.subr.mxu1 %v249_v13 }
  0x45   :  { %474 = vmatmul.mubr.f32.vlgmr.msra.gmra.mxu1 %v310_v3  ;;  %481 = vmatpush1.msra.mxu0 %v184_v14 }
  0x46   :  { %552 = vmatpush1.msra.mxu1 %v248_v15  ;;  %482 = vmatprep.subr.mxu0 %v183_v16 }
  0x47   :  { %553 = vmatprep.subr.mxu1 %v247_v17  ;;  %483 = vmatpush1.msra.mxu0 %v182_v18 }
  0x48   :  { %554 = vmatpush1.msra.mxu1 %v246_v19  ;;  %484 = vmatprep.subr.mxu0 %v181_v20 }
  0x49   :  { %555 = vmatprep.subr.mxu1 %v245_v21  ;;  %485 = vmatpush1.msra.mxu0 %v180_v22 }
  0x4a   :  { %556 = vmatpush1.msra.mxu1 %v244_v23  ;;  %486 = vmatprep.subr.mxu0 %v179_v24 }
  0x4b   :  { %557 = vmatprep.subr.mxu1 %v243_v25  ;;  %487 = vmatpush1.msra.mxu0 %v178_v26 }
  0x4c   :  { %558 = vmatpush1.msra.mxu1 %v242_v27  ;;  %488 = vmatprep.subr.mxu0 %v177_v28 }
  0x4d   :  { %559 = vmatprep.subr.mxu1 %v241_v29  ;;  %489 = vmatpush1.msra.mxu0 %v176_v30 }
  0x4e   :  { %560 = vmatpush1.msra.mxu1 %v240_v31  ;;  %490 = vmatprep.subr.mxu0 %v175_v32 }
  0x4f   :  { %561 = vmatprep.subr.mxu1 %v239_v33  ;;  %491 = vmatpush1.msra.mxu0 %v174_v34 }
  0x50   :  { %562 = vmatpush1.msra.mxu1 %v238_v35  ;;  %492 = vmatprep.subr.mxu0 %v173_v36 }
  0x51   :  { %563 = vmatprep.subr.mxu1 %v237_v37  ;;  %493 = vmatpush1.msra.mxu0 %v172_v38 }
  0x52   :  { %564 = vmatpush1.msra.mxu1 %v236_v39  ;;  %494 = vmatprep.subr.mxu0 %v171_v40 }
  0x53   :  { %565 = vmatprep.subr.mxu1 %v235_v42  ;;  %495 = vmatpush1.msra.mxu0 %v170_v43 }
  0x54   :  { %566 = vmatpush1.msra.mxu1 %v234_v44  ;;  %496 = vmatprep.subr.mxu0 %v169_v45 }
  0x55   :  { %567 = vmatprep.subr.mxu1 %v233_v46  ;;  %497 = vmatpush1.msra.mxu0 %v168_v47 }
  0x56   :  { %568 = vmatpush1.msra.mxu1 %v232_v48  ;;  %498 = vmatprep.subr.mxu0 %v167_v49 }
  0x57   :  { %569 = vmatprep.subr.mxu1 %v231_v50  ;;  %499 = vmatpush1.msra.mxu0 %v166_v51 }
  0x58   :  { %570 = vmatpush1.msra.mxu1 %v230_v53 }
  0x59   :  { %11 = vsyncpa [#allocation3], 0  ;;  %500 = vmatprep.subr.mxu0 %v165_v54  ;;  %571 = vmatprep.subr.mxu1 %v229_v55  ;;  %v162_v60 = vld [vmem:[%s3950_s1 + $0x440] sm:$0xff]  ;;  %v161_v62 = vld [vmem:[%s3950_s1 + $0x438] sm:$0xff]  ;;  %s2085_s19 = smov 16   ;;  %vm1491_vm0 = vcmask 123904  }
  0x5a   :  { %v226_v61 = vld [vmem:[%s3950_s1 + $0x640] sm:$0xff]  ;;  %501 = vmatpush1.msra.mxu0 %v164_v56  ;;  %572 = vmatpush1.msra.mxu1 %v228_v57  ;;  %v225_v63 = vld [vmem:[%s3950_s1 + $0x638] sm:$0xff]  ;;  %v160_v0 = vld [vmem:[%s3950_s1 + $0x430] sm:$0xff]  ;;  %s2086_s10 = smov [#allocation2]  }
  0x5b   :  { %502 = vmatprep.subr.mxu0 %v163_v58  ;;  %573 = vmatprep.subr.mxu1 %v227_v59  ;;  %v224_v1 = vld [vmem:[%s3950_s1 + $0x630] sm:$0xff]  ;;  %v159_v2 = vld [vmem:[%s3950_s1 + $0x428] sm:$0xff]  ;;  %v158_v4 = vld [vmem:[%s3950_s1 + $0x420] sm:$0xff] }
  0x5c   :  { %503 = vmatpush1.msra.mxu0 %v162_v60  ;;  %574 = vmatpush1.msra.mxu1 %v226_v61  ;;  %v223_v3 = vld [vmem:[%s3950_s1 + $0x628] sm:$0xff]  ;;  %v222_v5 = vld [vmem:[%s3950_s1 + $0x620] sm:$0xff]  ;;  %v157_v6 = vld [vmem:[%s3950_s1 + $0x418] sm:$0xff] }
  0x5d   :  { %504 = vmatprep.subr.mxu0 %v161_v62  ;;  %575 = vmatprep.subr.mxu1 %v225_v63  ;;  %v221_v7 = vld [vmem:[%s3950_s1 + $0x618] sm:$0xff]  ;;  %v156_v8 = vld [vmem:[%s3950_s1 + $0x410] sm:$0xff]  ;;  %v155_v10 = vld [vmem:[%s3950_s1 + $0x408] sm:$0xff] }
  0x5e   :  { %505 = vmatpush1.msra.mxu0 %v160_v0  ;;  %576 = vmatpush1.msra.mxu1 %v224_v1  ;;  %v220_v9 = vld [vmem:[%s3950_s1 + $0x610] sm:$0xff]  ;;  %v219_v11 = vld [vmem:[%s3950_s1 + $0x608] sm:$0xff]  ;;  %v154_v12 = vld [vmem:[%s3950_s1 + $0x400] sm:$0xff] }
  0x5f   :  { %506 = vmatprep.subr.mxu0 %v159_v2  ;;  %577 = vmatprep.subr.mxu1 %v223_v3  ;;  %v218_v13 = vld [vmem:[%s3950_s1 + $0x600] sm:$0xff]  ;;  %v217_v14 = vld [vmem:[%s3950_s1 + $0x5f8] sm:$0xff]  ;;  %v216_v16 = vld [vmem:[%s3950_s1 + $0x5f0] sm:$0xff] }
  0x60   :  { %507 = vmatpush1.msra.mxu0 %v158_v4  ;;  %578 = vmatpush1.msra.mxu1 %v222_v5  ;;  %v281_v15 = vld [vmem:[%s3950_s1 + $0x7f8] sm:$0xff]  ;;  %v280_v17 = vld [vmem:[%s3950_s1 + $0x7f0] sm:$0xff]  ;;  %v215_v18 = vld [vmem:[%s3950_s1 + $0x5e8] sm:$0xff] }
  0x61   :  { %508 = vmatprep.subr.mxu0 %v157_v6  ;;  %579 = vmatprep.subr.mxu1 %v221_v7  ;;  %v279_v19 = vld [vmem:[%s3950_s1 + $0x7e8] sm:$0xff]  ;;  %v214_v20 = vld [vmem:[%s3950_s1 + $0x5e0] sm:$0xff]  ;;  %v213_v22 = vld [vmem:[%s3950_s1 + $0x5d8] sm:$0xff] }
  0x62   :  { %509 = vmatpush1.msra.mxu0 %v156_v8  ;;  %580 = vmatpush1.msra.mxu1 %v220_v9  ;;  %v278_v21 = vld [vmem:[%s3950_s1 + $0x7e0] sm:$0xff]  ;;  %v277_v23 = vld [vmem:[%s3950_s1 + $0x7d8] sm:$0xff]  ;;  %v212_v24 = vld [vmem:[%s3950_s1 + $0x5d0] sm:$0xff] }
  0x63   :  { %510 = vmatprep.subr.mxu0 %v155_v10  ;;  %581 = vmatprep.subr.mxu1 %v219_v11  ;;  %v276_v25 = vld [vmem:[%s3950_s1 + $0x7d0] sm:$0xff]  ;;  %v211_v26 = vld [vmem:[%s3950_s1 + $0x5c8] sm:$0xff]  ;;  %v210_v28 = vld [vmem:[%s3950_s1 + $0x5c0] sm:$0xff] }
  0x64   :  { %511 = vmatpush1.msra.mxu0 %v154_v12  ;;  %582 = vmatpush1.msra.mxu1 %v218_v13  ;;  %v275_v27 = vld [vmem:[%s3950_s1 + $0x7c8] sm:$0xff]  ;;  %v274_v29 = vld [vmem:[%s3950_s1 + $0x7c0] sm:$0xff]  ;;  %v209_v30 = vld [vmem:[%s3950_s1 + $0x5b8] sm:$0xff] }
  0x65   :  { %512 = vmatprep.subr.mxu0 %v217_v14  ;;  %583 = vmatprep.subr.mxu1 %v281_v15  ;;  %v273_v31 = vld [vmem:[%s3950_s1 + $0x7b8] sm:$0xff]  ;;  %v208_v32 = vld [vmem:[%s3950_s1 + $0x5b0] sm:$0xff]  ;;  %v207_v34 = vld [vmem:[%s3950_s1 + $0x5a8] sm:$0xff] }
  0x66   :  { %513 = vmatpush2.msra.mxu0 %v216_v16  ;;  %584 = vmatpush2.msra.mxu1 %v280_v17  ;;  %v272_v33 = vld [vmem:[%s3950_s1 + $0x7b0] sm:$0xff]  ;;  %v271_v35 = vld [vmem:[%s3950_s1 + $0x7a8] sm:$0xff]  ;;  %v206_v36 = vld [vmem:[%s3950_s1 + $0x5a0] sm:$0xff] }
  0x67   :  { %514 = vmatprep.subr.mxu0 %v215_v18  ;;  %585 = vmatprep.subr.mxu1 %v279_v19  ;;  %v270_v37 = vld [vmem:[%s3950_s1 + $0x7a0] sm:$0xff]  ;;  %v205_v38 = vld [vmem:[%s3950_s1 + $0x598] sm:$0xff]  ;;  %v204_v40 = vld [vmem:[%s3950_s1 + $0x590] sm:$0xff] }
  0x68   :  { %515 = vmatpush2.msra.mxu0 %v214_v20  ;;  %586 = vmatpush2.msra.mxu1 %v278_v21  ;;  %v269_v39 = vld [vmem:[%s3950_s1 + $0x798] sm:$0xff]  ;;  %v268_v42 = vld [vmem:[%s3950_s1 + $0x790] sm:$0xff]  ;;  %v203_v43 = vld [vmem:[%s3950_s1 + $0x588] sm:$0xff] }
  0x69   :  { %516 = vmatprep.subr.mxu0 %v213_v22  ;;  %587 = vmatprep.subr.mxu1 %v277_v23  ;;  %v267_v44 = vld [vmem:[%s3950_s1 + $0x788] sm:$0xff]  ;;  %v202_v45 = vld [vmem:[%s3950_s1 + $0x580] sm:$0xff]  ;;  %v201_v47 = vld [vmem:[%s3950_s1 + $0x578] sm:$0xff] }
  0x6a   :  { %517 = vmatpush2.msra.mxu0 %v212_v24  ;;  %588 = vmatpush2.msra.mxu1 %v276_v25  ;;  %v266_v46 = vld [vmem:[%s3950_s1 + $0x780] sm:$0xff]  ;;  %v265_v48 = vld [vmem:[%s3950_s1 + $0x778] sm:$0xff]  ;;  %v200_v49 = vld [vmem:[%s3950_s1 + $0x570] sm:$0xff] }
  0x6b   :  { %518 = vmatprep.subr.mxu0 %v211_v26  ;;  %589 = vmatprep.subr.mxu1 %v275_v27  ;;  %v264_v50 = vld [vmem:[%s3950_s1 + $0x770] sm:$0xff]  ;;  %v199_v51 = vld [vmem:[%s3950_s1 + $0x568] sm:$0xff]  ;;  %v198_v54 = vld [vmem:[%s3950_s1 + $0x560] sm:$0xff] }
  0x6c   :  { %519 = vmatpush2.msra.mxu0 %v210_v28  ;;  %590 = vmatpush2.msra.mxu1 %v274_v29  ;;  %v263_v53 = vld [vmem:[%s3950_s1 + $0x768] sm:$0xff]  ;;  %v262_v55 = vld [vmem:[%s3950_s1 + $0x760] sm:$0xff]  ;;  %v197_v56 = vld [vmem:[%s3950_s1 + $0x558] sm:$0xff] }
  0x6d   :  { %520 = vmatprep.subr.mxu0 %v209_v30  ;;  %591 = vmatprep.subr.mxu1 %v273_v31  ;;  %v261_v57 = vld [vmem:[%s3950_s1 + $0x758] sm:$0xff]  ;;  %v25_v58 = vld [vmem:[%s3949_s0 + $0x8] sm:$0xff]  ;;  %v196_v59 = vld [vmem:[%s3950_s1 + $0x550] sm:$0xff] }
  0x6e   :  { %521 = vmatpush2.msra.mxu0 %v208_v32  ;;  %592 = vmatpush2.msra.mxu1 %v272_v33  ;;  %v260_v60 = vld [vmem:[%s3950_s1 + $0x750] sm:$0xff]  ;;  %v195_v61 = vld [vmem:[%s3950_s1 + $0x548] sm:$0xff]  ;;  %v194_v63 = vld [vmem:[%s3950_s1 + $0x540] sm:$0xff]  ;;  %v313_v1 = vcombine.high %v25_v58, %v25_v58  ;;  %v320_v8 = vrot.slane %v25_v58, %v2458_v52 }
  0x6f   :  { %522 = vmatprep.subr.mxu0 %v207_v34  ;;  %593 = vmatprep.subr.mxu1 %v271_v35  ;;  %v259_v62 = vld [vmem:[%s3950_s1 + $0x748] sm:$0xff]  ;;  %v258_v0 = vld [vmem:[%s3950_s1 + $0x740] sm:$0xff]  ;;  %v193_v2 = vld [vmem:[%s3950_s1 + $0x538] sm:$0xff] }
  0x70   :  { %523 = vmatpush2.msra.mxu0 %v206_v36  ;;  %594 = vmatpush2.msra.mxu1 %v270_v37  ;;  %v257_v3 = vld [vmem:[%s3950_s1 + $0x738] sm:$0xff]  ;;  %v192_v4 = vld [vmem:[%s3950_s1 + $0x530] sm:$0xff]  ;;  %v191_v6 = vld [vmem:[%s3950_s1 + $0x528] sm:$0xff]  ;;  %v327_v11 = vrot.slane %v313_v1, %v2458_v52  ;;  %v328_v18 = vcombine.high %v320_v8, %v320_v8 }
  0x71   :  { %524 = vmatprep.subr.mxu0 %v205_v38  ;;  %595 = vmatprep.subr.mxu1 %v269_v39  ;;  %v256_v5 = vld [vmem:[%s3950_s1 + $0x730] sm:$0xff]  ;;  %v255_v7 = vld [vmem:[%s3950_s1 + $0x728] sm:$0xff]  ;;  %v190_v9 = vld [vmem:[%s3950_s1 + $0x520] sm:$0xff] }
  0x72   :  { %525 = vmatpush2.msra.mxu0 %v204_v40  ;;  %596 = vmatpush2.msra.mxu1 %v268_v42  ;;  %v254_v10 = vld [vmem:[%s3950_s1 + $0x720] sm:$0xff]  ;;  %v189_v12 = vld [vmem:[%s3950_s1 + $0x518] sm:$0xff]  ;;  %v188_v14 = vld [vmem:[%s3950_s1 + $0x510] sm:$0xff]  ;;  %v329_v20 = vcombine.high %v327_v11, %v327_v11 }
  0x73   :  { %526 = vmatprep.subr.mxu0 %v203_v43  ;;  %597 = vmatprep.subr.mxu1 %v267_v44  ;;  %v253_v13 = vld [vmem:[%s3950_s1 + $0x718] sm:$0xff]  ;;  %v252_v15 = vld [vmem:[%s3950_s1 + $0x710] sm:$0xff]  ;;  %v187_v16 = vld [vmem:[%s3950_s1 + $0x508] sm:$0xff] }
  0x74   :  { %527 = vmatpush2.msra.mxu0 %v202_v45  ;;  %598 = vmatpush2.msra.mxu1 %v266_v46  ;;  %v251_v17 = vld [vmem:[%s3950_s1 + $0x708] sm:$0xff]  ;;  %v186_v19 = vld [vmem:[%s3950_s1 + $0x500] sm:$0xff]  ;;  %v1682_v22 = vld [vmem:[%s3950_s1 + $0x8f8] sm:$0xff] }
  0x75   :  { %528 = vmatprep.subr.mxu0 %v201_v47  ;;  %599 = vmatprep.subr.mxu1 %v265_v48  ;;  %v250_v21 = vld [vmem:[%s3950_s1 + $0x700] sm:$0xff]  ;;  %v1681_v23 = vld [vmem:[%s3950_s1 + $0x8f0] sm:$0xff]  ;;  %v1680_v24 = vld [vmem:[%s3950_s1 + $0x8e8] sm:$0xff] }
  0x76   :  { %529 = vmatpush2.msra.mxu0 %v200_v49  ;;  %600 = vmatpush2.msra.mxu1 %v264_v50  ;;  %v1679_v25 = vld [vmem:[%s3950_s1 + $0x8e0] sm:$0xff]  ;;  %v1678_v26 = vld [vmem:[%s3950_s1 + $0x8d8] sm:$0xff]  ;;  %v1677_v27 = vld [vmem:[%s3950_s1 + $0x8d0] sm:$0xff] }
  0x77   :  { %530 = vmatprep.subr.mxu0 %v199_v51  ;;  %601 = vmatprep.subr.mxu1 %v263_v53  ;;  %v1676_v28 = vld [vmem:[%s3950_s1 + $0x8c8] sm:$0xff]  ;;  %v1675_v29 = vld [vmem:[%s3950_s1 + $0x8c0] sm:$0xff]  ;;  %v1674_v30 = vld [vmem:[%s3950_s1 + $0x8b8] sm:$0xff] }
  0x78   :  { %531 = vmatpush2.msra.mxu0 %v198_v54  ;;  %602 = vmatpush2.msra.mxu1 %v262_v55  ;;  %v1673_v31 = vld [vmem:[%s3950_s1 + $0x8b0] sm:$0xff]  ;;  %v1672_v32 = vld [vmem:[%s3950_s1 + $0x8a8] sm:$0xff]  ;;  %v1671_v33 = vld [vmem:[%s3950_s1 + $0x8a0] sm:$0xff] }
  0x79   :  { %532 = vmatprep.subr.mxu0 %v197_v56  ;;  %603 = vmatprep.subr.mxu1 %v261_v57  ;;  %v1670_v34 = vld [vmem:[%s3950_s1 + $0x898] sm:$0xff]  ;;  %v1669_v37 = vld [vmem:[%s3950_s1 + $0x890] sm:$0xff]  ;;  %v1668_v39 = vld [vmem:[%s3950_s1 + $0x888] sm:$0xff] }
  0x7a   :  { %533 = vmatpush2.msra.mxu0 %v196_v59  ;;  %604 = vmatpush2.msra.mxu1 %v260_v60  ;;  %v653_v35 = vld [vmem:[%s3952_s3 + $0xf8] sm:$0xff]  ;;  %v652_v38 = vld [vmem:[%s3952_s3 + $0xf0] sm:$0xff]  ;;  %v651_v42 = vld [vmem:[%s3952_s3 + $0xe8] sm:$0xff] }
  0x7b   :  { %534 = vmatprep.subr.mxu0 %v195_v61  ;;  %605 = vmatprep.subr.mxu1 %v259_v62  ;;  %v637_v36 = vld [vmem:[%s3952_s3 + $0x78] sm:$0xff]  ;;  %v636_v40 = vld [vmem:[%s3952_s3 + $0x70] sm:$0xff]  ;;  %v1667_v43 = vld [vmem:[%s3950_s1 + $0x880] sm:$0xff] }
  0x7c   :  { %535 = vmatpush2.msra.mxu0 %v194_v63  ;;  %606 = vmatpush2.msra.mxu1 %v258_v0  ;;  %v635_v44 = vld [vmem:[%s3952_s3 + $0x68] sm:$0xff]  ;;  %v1666_v45 = vld [vmem:[%s3950_s1 + $0x878] sm:$0xff]  ;;  %v650_v46 = vld [vmem:[%s3952_s3 + $0xe0] sm:$0xff] }
  0x7d   :  { %536 = vmatprep.subr.mxu0 %v193_v2  ;;  %607 = vmatprep.subr.mxu1 %v257_v3  ;;  %v1665_v47 = vld [vmem:[%s3950_s1 + $0x870] sm:$0xff]  ;;  %v634_v48 = vld [vmem:[%s3952_s3 + $0x60] sm:$0xff]  ;;  %v1664_v49 = vld [vmem:[%s3950_s1 + $0x868] sm:$0xff] }
  0x7e   :  { %537 = vmatpush2.msra.mxu0 %v192_v4  ;;  %608 = vmatpush2.msra.mxu1 %v256_v5  ;;  %v649_v50 = vld [vmem:[%s3952_s3 + $0xd8] sm:$0xff]  ;;  %v1663_v51 = vld [vmem:[%s3950_s1 + $0x860] sm:$0xff]  ;;  %v648_v55 = vld [vmem:[%s3952_s3 + $0xd0] sm:$0xff] }
  0x7f   :  { %538 = vmatprep.subr.mxu0 %v191_v6  ;;  %609 = vmatprep.subr.mxu1 %v255_v7  ;;  %v633_v53 = vld [vmem:[%s3952_s3 + $0x58] sm:$0xff]  ;;  %v1661_v56 = vld [vmem:[%s3950_s1 + $0x850] sm:$0xff]  ;;  %v1660_v58 = vld [vmem:[%s3950_s1 + $0x848] sm:$0xff] }
  0x80   :  { %539 = vmatpush2.msra.mxu0 %v190_v9  ;;  %610 = vmatpush2.msra.mxu1 %v254_v10  ;;  %v1662_v54 = vld [vmem:[%s3950_s1 + $0x858] sm:$0xff]  ;;  %v632_v57 = vld [vmem:[%s3952_s3 + $0x50] sm:$0xff]  ;;  %v647_v59 = vld [vmem:[%s3952_s3 + $0xc8] sm:$0xff] }
  0x81   :  { %540 = vmatprep.subr.mxu0 %v189_v12  ;;  %611 = vmatprep.subr.mxu1 %v253_v13  ;;  %v1659_v60 = vld [vmem:[%s3950_s1 + $0x840] sm:$0xff]  ;;  %v631_v61 = vld [vmem:[%s3952_s3 + $0x48] sm:$0xff]  ;;  %v1658_v62 = vld [vmem:[%s3950_s1 + $0x838] sm:$0xff] }
  0x82   :  { %541 = vmatpush2.msra.mxu0 %v188_v14  ;;  %612 = vmatpush2.msra.mxu1 %v252_v15  ;;  %v646_v63 = vld [vmem:[%s3952_s3 + $0xc0] sm:$0xff]  ;;  %v1657_v0 = vld [vmem:[%s3950_s1 + $0x830] sm:$0xff]  ;;  %v1656_v2 = vld [vmem:[%s3950_s1 + $0x828] sm:$0xff] }
  0x83   :  { %542 = vmatprep.subr.mxu0 %v187_v16  ;;  %613 = vmatprep.subr.mxu1 %v251_v17  ;;  %v630_v1 = vld [vmem:[%s3952_s3 + $0x40] sm:$0xff]  ;;  %v645_v3 = vld [vmem:[%s3952_s3 + $0xb8] sm:$0xff]  ;;  %v644_v7 = vld [vmem:[%s3952_s3 + $0xb0] sm:$0xff] }
  0x84   :  { %543 = vmatpush2.msra.mxu0 %v186_v19  ;;  %544 = vmatprep.mubr.f32.mxu0 %v328_v18  ;;  %v1655_v4 = vld [vmem:[%s3950_s1 + $0x820] sm:$0xff]  ;;  %v629_v5 = vld [vmem:[%s3952_s3 + $0x38] sm:$0xff]  ;;  %v628_v9 = vld [vmem:[%s3952_s3 + $0x30] sm:$0xff] }
  0x85   :  { %614 = vmatpush2.msra.mxu1 %v250_v21  ;;  %615 = vmatprep.mubr.f32.mxu1 %v329_v20  ;;  %v1654_v6 = vld [vmem:[%s3950_s1 + $0x818] sm:$0xff]  ;;  %v1652_v10 = vld [vmem:[%s3950_s1 + $0x808] sm:$0xff]  ;;  %v1651_v12 = vld [vmem:[%s3950_s1 + $0x800] sm:$0xff] }
  0x86   :  { %545 = vmatmul.mubr.f32.vlgmr.msra.gmra.mxu0 %v320_v8  ;;  %616 = vmatmul.mubr.f32.vlgmr.msra.gmra.mxu1 %v327_v11  ;;  %v1653_v8 = vld [vmem:[%s3950_s1 + $0x810] sm:$0xff]  ;;  %v643_v11 = vld [vmem:[%s3952_s3 + $0xa8] sm:$0xff]  ;;  %v1714_v14 = vld [vmem:[%s3950_s1 + $0x9f8] sm:$0xff] }
  0x87   :  { %1049 = vmatprep.subr.mxu1 %v1682_v22  ;;  %1947 = vmatprep.subr.mxu0 %v653_v35  ;;  %v627_v13 = vld [vmem:[%s3952_s3 + $0x28] sm:$0xff]  ;;  %v642_v15 = vld [vmem:[%s3952_s3 + $0xa0] sm:$0xff]  ;;  %v1713_v16 = vld [vmem:[%s3950_s1 + $0x9f0] sm:$0xff] }
  0x88   :  { %1050 = vmatpush1.msra.mxu1 %v1681_v23  ;;  %1948 = vmatpush3.msra.mxu0 %v637_v36  ;;  %v626_v17 = vld [vmem:[%s3952_s3 + $0x20] sm:$0xff]  ;;  %v1712_v18 = vld [vmem:[%s3950_s1 + $0x9e8] sm:$0xff]  ;;  %v641_v19 = vld [vmem:[%s3952_s3 + $0x98] sm:$0xff] }
  0x89   :  { %1051 = vmatprep.subr.mxu1 %v1680_v24  ;;  %1949 = vmatprep.subr.mxu0 %v652_v38  ;;  %v1711_v20 = vld [vmem:[%s3950_s1 + $0x9e0] sm:$0xff]  ;;  %v1710_v21 = vld [vmem:[%s3950_s1 + $0x9d8] sm:$0xff]  ;;  %v1709_v22 = vld [vmem:[%s3950_s1 + $0x9d0] sm:$0xff] }
  0x8a   :  { %1052 = vmatpush1.msra.mxu1 %v1679_v25  ;;  %1950 = vmatpush3.msra.mxu0 %v636_v40  ;;  %v1708_v23 = vld [vmem:[%s3950_s1 + $0x9c8] sm:$0xff]  ;;  %v1707_v24 = vld [vmem:[%s3950_s1 + $0x9c0] sm:$0xff]  ;;  %v1706_v25 = vld [vmem:[%s3950_s1 + $0x9b8] sm:$0xff] }
  0x8b   :  { %1053 = vmatprep.subr.mxu1 %v1678_v26  ;;  %1951 = vmatprep.subr.mxu0 %v651_v42  ;;  %v1705_v26 = vld [vmem:[%s3950_s1 + $0x9b0] sm:$0xff]  ;;  %v1696_v35 = vld [vmem:[%s3950_s1 + $0x968] sm:$0xff]  ;;  %v1695_v36 = vld [vmem:[%s3950_s1 + $0x960] sm:$0xff] }
  0x8c   :  { %1054 = vmatpush1.msra.mxu1 %v1677_v27  ;;  %1952 = vmatpush3.msra.mxu0 %v635_v44  ;;  %v1704_v27 = vld [vmem:[%s3950_s1 + $0x9a8] sm:$0xff]  ;;  %v1693_v38 = vld [vmem:[%s3950_s1 + $0x950] sm:$0xff]  ;;  %v625_v40 = vld [vmem:[%s3952_s3 + $0x18] sm:$0xff] }
  0x8d   :  { %1055 = vmatprep.subr.mxu1 %v1676_v28  ;;  %1953 = vmatprep.subr.mxu0 %v650_v46  ;;  %v1703_v28 = vld [vmem:[%s3950_s1 + $0x9a0] sm:$0xff]  ;;  %v1690_v44 = vld [vmem:[%s3950_s1 + $0x938] sm:$0xff]  ;;  %v1689_v46 = vld [vmem:[%s3950_s1 + $0x930] sm:$0xff] }
  0x8e   :  { %1056 = vmatpush1.msra.mxu1 %v1675_v29  ;;  %1954 = vmatpush3.msra.mxu0 %v634_v48  ;;  %v1702_v29 = vld [vmem:[%s3950_s1 + $0x998] sm:$0xff]  ;;  %v1691_v42 = vld [vmem:[%s3950_s1 + $0x940] sm:$0xff]  ;;  %v1688_v48 = vld [vmem:[%s3950_s1 + $0x928] sm:$0xff] }
  0x8f   :  { %1057 = vmatprep.subr.mxu1 %v1674_v30  ;;  %1955 = vmatprep.subr.mxu0 %v649_v50  ;;  %v1701_v30 = vld [vmem:[%s3950_s1 + $0x990] sm:$0xff]  ;;  %v1687_v50 = vld [vmem:[%s3950_s1 + $0x920] sm:$0xff] }
  0x90   :  { %1058 = vmatpush1.msra.mxu1 %v1673_v31  ;;  %1956 = vmatpush3.msra.mxu0 %v633_v53  ;;  %v1700_v31 = vld [vmem:[%s3950_s1 + $0x988] sm:$0xff]  ;;  %v1686_v53 = vld [vmem:[%s3950_s1 + $0x918] sm:$0xff] }
  0x91   :  { %1059 = vmatprep.subr.mxu1 %v1672_v32  ;;  %1957 = vmatprep.subr.mxu0 %v648_v55  ;;  %v1699_v32 = vld [vmem:[%s3950_s1 + $0x980] sm:$0xff]  ;;  %v1685_v55 = vld [vmem:[%s3950_s1 + $0x910] sm:$0xff] }
  0x92   :  { %1060 = vmatpush1.msra.mxu1 %v1671_v33  ;;  %1958 = vmatpush3.msra.mxu0 %v632_v57  ;;  %v1698_v33 = vld [vmem:[%s3950_s1 + $0x978] sm:$0xff]  ;;  %v1684_v57 = vld [vmem:[%s3950_s1 + $0x908] sm:$0xff] }
  0x93   :  { %1061 = vmatprep.subr.mxu1 %v1670_v34  ;;  %1959 = vmatprep.subr.mxu0 %v647_v59  ;;  %v1697_v34 = vld [vmem:[%s3950_s1 + $0x970] sm:$0xff] }
  0x94   :  { %1062 = vmatpush1.msra.mxu1 %v1669_v37  ;;  %1960 = vmatpush3.msra.mxu0 %v631_v61  ;;  %v1694_v37 = vld [vmem:[%s3950_s1 + $0x958] sm:$0xff] }
  0x95   :  { %1063 = vmatprep.subr.mxu1 %v1668_v39  ;;  %1961 = vmatprep.subr.mxu0 %v646_v63  ;;  %v1692_v39 = vld [vmem:[%s3950_s1 + $0x948] sm:$0xff]  ;;  %v1809_v63 = vld [vmem:[%s3950_s1 + $0xcf0] sm:$0xff] }
  0x96   :  { %1064 = vmatpush1.msra.mxu1 %v1667_v43  ;;  %1962 = vmatpush3.msra.mxu0 %v630_v1  ;;  %v640_v43 = vld [vmem:[%s3952_s3 + $0x90] sm:$0xff]  ;;  %v1807_v1 = vld [vmem:[%s3950_s1 + $0xce0] sm:$0xff] }
  0x97   :  { %1065 = vmatprep.subr.mxu1 %v1666_v45  ;;  %1963 = vmatprep.subr.mxu0 %v645_v3  ;;  %v624_v45 = vld [vmem:[%s3952_s3 + $0x10] sm:$0xff] }
  0x98   :  { %1066 = vmatpush1.msra.mxu1 %v1665_v47  ;;  %1964 = vmatpush3.msra.mxu0 %v629_v5  ;;  %v639_v47 = vld [vmem:[%s3952_s3 + $0x88] sm:$0xff]  ;;  %v1805_v3 = vld [vmem:[%s3950_s1 + $0xcd0] sm:$0xff]  ;;  %v1803_v5 = vld [vmem:[%s3950_s1 + $0xcc0] sm:$0xff] }
  0x99   :  { %1067 = vmatprep.subr.mxu1 %v1664_v49  ;;  %1965 = vmatprep.subr.mxu0 %v644_v7  ;;  %v623_v49 = vld [vmem:[%s3952_s3 + $0x8] sm:$0xff]  ;;  %v1801_v7 = vld [vmem:[%s3950_s1 + $0xcb0] sm:$0xff] }
  0x9a   :  { %1068 = vmatpush1.msra.mxu1 %v1663_v51  ;;  %1966 = vmatpush3.msra.mxu0 %v628_v9  ;;  %v638_v51 = vld [vmem:[%s3952_s3 + $0x80] sm:$0xff] }
  0x9b   :  { %1069 = vmatprep.subr.mxu1 %v1662_v54  ;;  %1967 = vmatprep.subr.mxu0 %v643_v11  ;;  %v622_v54 = vld [vmem:[%s3952_s3] sm:$0xff]  ;;  %v1797_v11 = vld [vmem:[%s3950_s1 + $0xc90] sm:$0xff] }
  0x9c   :  { %1070 = vmatpush1.msra.mxu1 %v1661_v56  ;;  %1968 = vmatpush3.msra.mxu0 %v627_v13  ;;  %v3190_v56 = vld [vmem:[%s3949_s0 + $0x10] sm:$0xff]  ;;  %v1799_v9 = vld [vmem:[%s3950_s1 + $0xca0] sm:$0xff] }
  0x9d   :  { %1071 = vmatprep.subr.mxu1 %v1660_v58  ;;  %1969 = vmatprep.subr.mxu0 %v642_v15  ;;  %v1746_v58 = vld [vmem:[%s3950_s1 + $0xaf8] sm:$0xff]  ;;  %v1014_v59 = vrot.slane %v3190_v56, %v2458_v52  ;;  %v1795_v13 = vld [vmem:[%s3950_s1 + $0xc80] sm:$0xff]  ;;  %v1793_v15 = vld [vmem:[%s3950_s1 + $0xc70] sm:$0xff] }
  0x9e   :  { %1072 = vmatpush1.msra.mxu1 %v1659_v60  ;;  %1970 = vmatpush3.msra.mxu0 %v626_v17  ;;  %v1683_v60 = vld [vmem:[%s3950_s1 + $0x900] sm:$0xff] }
  0x9f   :  { %1073 = vmatprep.subr.mxu1 %v1658_v62  ;;  %1971 = vmatprep.subr.mxu0 %v641_v19  ;;  %v1022_v61 = vcombine.high %v1014_v59, %v1014_v59  ;;  %v1810_v62 = vld [vmem:[%s3950_s1 + $0xcf8] sm:$0xff]  ;;  %v1791_v17 = vld [vmem:[%s3950_s1 + $0xc60] sm:$0xff]  ;;  %v1789_v19 = vld [vmem:[%s3950_s1 + $0xc50] sm:$0xff] }
  0xa0   :  { %1074 = vmatpush1.msra.mxu1 %v1657_v0  ;;  %1972 = vmatpush3.msra.mxu0 %v625_v40  ;;  %v1808_v0 = vld [vmem:[%s3950_s1 + $0xce8] sm:$0xff] }
  0xa1   :  { %1075 = vmatprep.subr.mxu1 %v1656_v2  ;;  %1973 = vmatprep.subr.mxu0 %v640_v43  ;;  %v1806_v2 = vld [vmem:[%s3950_s1 + $0xcd8] sm:$0xff]  ;;  %v1832_v40 = vld [vmem:[%s3950_s1 + $0xda8] sm:$0xff] }
  0xa2   :  { %1076 = vmatpush1.msra.mxu1 %v1655_v4  ;;  %1974 = vmatpush3.msra.mxu0 %v624_v45  ;;  %v1804_v4 = vld [vmem:[%s3950_s1 + $0xcc8] sm:$0xff]  ;;  %v1830_v43 = vld [vmem:[%s3950_s1 + $0xd98] sm:$0xff] }
  0xa3   :  { %1077 = vmatprep.subr.mxu1 %v1654_v6  ;;  %1975 = vmatprep.subr.mxu0 %v639_v47  ;;  %v1802_v6 = vld [vmem:[%s3950_s1 + $0xcb8] sm:$0xff]  ;;  %v1828_v45 = vld [vmem:[%s3950_s1 + $0xd88] sm:$0xff] }
  0xa4   :  { %1078 = vmatpush1.msra.mxu1 %v1653_v8  ;;  %1976 = vmatpush3.msra.mxu0 %v623_v49  ;;  %v1800_v8 = vld [vmem:[%s3950_s1 + $0xca8] sm:$0xff]  ;;  %v1826_v47 = vld [vmem:[%s3950_s1 + $0xd78] sm:$0xff] }
  0xa5   :  { %1079 = vmatprep.subr.mxu1 %v1652_v10  ;;  %1977 = vmatprep.subr.mxu0 %v638_v51  ;;  %v1798_v10 = vld [vmem:[%s3950_s1 + $0xc98] sm:$0xff]  ;;  %v1824_v49 = vld [vmem:[%s3950_s1 + $0xd68] sm:$0xff] }
  0xa6   :  { %1080 = vmatpush1.msra.mxu1 %v1651_v12  ;;  %1978 = vmatpush3.msra.mxu0 %v622_v54  ;;  %v1796_v12 = vld [vmem:[%s3950_s1 + $0xc88] sm:$0xff]  ;;  %v1822_v51 = vld [vmem:[%s3950_s1 + $0xd58] sm:$0xff] }
  0xa7   :  { %1081 = vmatprep.subr.mxu1 %v1714_v14  ;;  %1120 = vmatprep.subr.mxu0 %v1746_v58  ;;  %v1794_v14 = vld [vmem:[%s3950_s1 + $0xc78] sm:$0xff]  ;;  %v1820_v54 = vld [vmem:[%s3950_s1 + $0xd48] sm:$0xff]  ;;  %v1817_v58 = vld [vmem:[%s3950_s1 + $0xd30] sm:$0xff] }
  0xa8   :  { %1082 = vmatpush2.msra.mxu1 %v1713_v16  ;;  %1113 = vmatprep.mubr.f32.mxu1 %v1022_v61  ;;  %v1792_v16 = vld [vmem:[%s3950_s1 + $0xc68] sm:$0xff]  ;;  %v3386_v61 = vld [vmem:[%s3949_s0 + $0x18] sm:$0xff] }
  0xa9   :  { %1083 = vmatprep.subr.mxu1 %v1712_v18  ;;  %v1790_v18 = vld [vmem:[%s3950_s1 + $0xc58] sm:$0xff] }
  0xaa   :  { %1084 = vmatpush2.msra.mxu1 %v1711_v20  ;;  %v1788_v20 = vld [vmem:[%s3950_s1 + $0xc48] sm:$0xff] }
  0xab   :  { %1085 = vmatprep.subr.mxu1 %v1710_v21  ;;  %v1787_v21 = vld [vmem:[%s3950_s1 + $0xc40] sm:$0xff] }
  0xac   :  { %1086 = vmatpush2.msra.mxu1 %v1709_v22  ;;  %v1786_v22 = vld [vmem:[%s3950_s1 + $0xc38] sm:$0xff] }
  0xad   :  { %1087 = vmatprep.subr.mxu1 %v1708_v23  ;;  %v1785_v23 = vld [vmem:[%s3950_s1 + $0xc30] sm:$0xff] }
  0xae   :  { %1088 = vmatpush2.msra.mxu1 %v1707_v24  ;;  %v1784_v24 = vld [vmem:[%s3950_s1 + $0xc28] sm:$0xff] }
  0xaf   :  { %1089 = vmatprep.subr.mxu1 %v1706_v25  ;;  %v1783_v25 = vld [vmem:[%s3950_s1 + $0xc20] sm:$0xff] }
  0xb0   :  { %1090 = vmatpush2.msra.mxu1 %v1705_v26  ;;  %v1782_v26 = vld [vmem:[%s3950_s1 + $0xc18] sm:$0xff] }
  0xb1   :  { %1091 = vmatprep.subr.mxu1 %v1704_v27  ;;  %v1781_v27 = vld [vmem:[%s3950_s1 + $0xc10] sm:$0xff] }
  0xb2   :  { %1092 = vmatpush2.msra.mxu1 %v1703_v28  ;;  %v1780_v28 = vld [vmem:[%s3950_s1 + $0xc08] sm:$0xff] }
  0xb3   :  { %1093 = vmatprep.subr.mxu1 %v1702_v29  ;;  %v1779_v29 = vld [vmem:[%s3950_s1 + $0xc00] sm:$0xff] }
  0xb4   :  { %1094 = vmatpush2.msra.mxu1 %v1701_v30  ;;  %v1842_v30 = vld [vmem:[%s3950_s1 + $0xdf8] sm:$0xff] }
  0xb5   :  { %1095 = vmatprep.subr.mxu1 %v1700_v31  ;;  %v1841_v31 = vld [vmem:[%s3950_s1 + $0xdf0] sm:$0xff] }
  0xb6   :  { %1096 = vmatpush2.msra.mxu1 %v1699_v32  ;;  %v1840_v32 = vld [vmem:[%s3950_s1 + $0xde8] sm:$0xff] }
  0xb7   :  { %1097 = vmatprep.subr.mxu1 %v1698_v33  ;;  %v1839_v33 = vld [vmem:[%s3950_s1 + $0xde0] sm:$0xff] }
  0xb8   :  { %1098 = vmatpush2.msra.mxu1 %v1697_v34  ;;  %v1838_v34 = vld [vmem:[%s3950_s1 + $0xdd8] sm:$0xff] }
  0xb9   :  { %1099 = vmatprep.subr.mxu1 %v1696_v35  ;;  %v1837_v35 = vld [vmem:[%s3950_s1 + $0xdd0] sm:$0xff] }
  0xba   :  { %1100 = vmatpush2.msra.mxu1 %v1695_v36  ;;  %v1836_v36 = vld [vmem:[%s3950_s1 + $0xdc8] sm:$0xff] }
  0xbb   :  { %1101 = vmatprep.subr.mxu1 %v1694_v37  ;;  %v1835_v37 = vld [vmem:[%s3950_s1 + $0xdc0] sm:$0xff] }
  0xbc   :  { %1102 = vmatpush2.msra.mxu1 %v1693_v38  ;;  %v1834_v38 = vld [vmem:[%s3950_s1 + $0xdb8] sm:$0xff] }
  0xbd   :  { %1103 = vmatprep.subr.mxu1 %v1692_v39  ;;  %v1833_v39 = vld [vmem:[%s3950_s1 + $0xdb0] sm:$0xff] }
  0xbe   :  { %1104 = vmatpush2.msra.mxu1 %v1691_v42  ;;  %v1831_v42 = vld [vmem:[%s3950_s1 + $0xda0] sm:$0xff] }
  0xbf   :  { %1105 = vmatprep.subr.mxu1 %v1690_v44  ;;  %v1829_v44 = vld [vmem:[%s3950_s1 + $0xd90] sm:$0xff] }
  0xc0   :  { %1106 = vmatpush2.msra.mxu1 %v1689_v46  ;;  %v1827_v46 = vld [vmem:[%s3950_s1 + $0xd80] sm:$0xff] }
  0xc1   :  { %1107 = vmatprep.subr.mxu1 %v1688_v48  ;;  %v1825_v48 = vld [vmem:[%s3950_s1 + $0xd70] sm:$0xff] }
  0xc2   :  { %1108 = vmatpush2.msra.mxu1 %v1687_v50  ;;  %v1823_v50 = vld [vmem:[%s3950_s1 + $0xd60] sm:$0xff] }
  0xc3   :  { %1109 = vmatprep.subr.mxu1 %v1686_v53  ;;  %v1821_v53 = vld [vmem:[%s3950_s1 + $0xd50] sm:$0xff] }
  0xc4   :  { %1110 = vmatpush2.msra.mxu1 %v1685_v55  ;;  %v1819_v55 = vld [vmem:[%s3950_s1 + $0xd40] sm:$0xff] }
  0xc5   :  { %1111 = vmatprep.subr.mxu1 %v1684_v57  ;;  %v1818_v57 = vld [vmem:[%s3950_s1 + $0xd38] sm:$0xff] }
  0xc6   :  { %1112 = vmatpush2.msra.mxu1 %v1683_v60  ;;  %v1815_v60 = vld [vmem:[%s3950_s1 + $0xd20] sm:$0xff] }
  0xc7   :  { %1191 = vmatprep.subr.mxu1 %v1810_v62  ;;  %1114 = vmatmul.mubr.f32.vlgmr.msra.gmra.mxu1 %v1014_v59  ;;  %v1816_v59 = vld [vmem:[%s3950_s1 + $0xd28] sm:$0xff]  ;;  %v1814_v62 = vld [vmem:[%s3950_s1 + $0xd18] sm:$0xff] }
  0xc8   :  { %1192 = vmatpush1.msra.mxu1 %v1809_v63  ;;  %v1031_v63 = vrot.slane %v3386_v61, %v2458_v52 }
  0xc9   :  { %1193 = vmatprep.subr.mxu1 %v1808_v0  ;;  %v1813_v0 = vld [vmem:[%s3950_s1 + $0xd10] sm:$0xff] }
  0xca   :  { %1194 = vmatpush1.msra.mxu1 %v1807_v1  ;;  %v1812_v1 = vld [vmem:[%s3950_s1 + $0xd08] sm:$0xff] }
  0xcb   :  { %1195 = vmatprep.subr.mxu1 %v1806_v2  ;;  %v1039_v2 = vcombine.high %v1031_v63, %v1031_v63 }
  0xcc   :  { %1196 = vmatpush1.msra.mxu1 %v1805_v3  ;;  %v1811_v3 = vld [vmem:[%s3950_s1 + $0xd00] sm:$0xff] }
  0xcd   :  { %1197 = vmatprep.subr.mxu1 %v1804_v4  ;;  %1255 = vmatprep.mubr.f32.mxu1 %v1039_v2  ;;  %v286_v4 = vsub.s32 0, %v2428_v41  ;;  %v1774_v2 = vld [vmem:[%s3950_s1 + $0xbd8] sm:$0xff] }
  0xce   :  { %1198 = vmatpush1.msra.mxu1 %v1803_v5  ;;  %v282_v5 = vld [vmem:[%s3951_s2] sm:$0x3] }
  0xcf   :  { %1199 = vmatprep.subr.mxu1 %v1802_v6  ;;  %v290_v6 = vsub.s32 1, %v2428_v41  ;;  %v1648_v41 = vld [vmem:[%s3953_s4] ss:$0 sm:$0xff] }
  0xd0   :  { %1200 = vmatpush1.msra.mxu1 %v1801_v7 }
  0xd1   :  { %1201 = vmatprep.subr.mxu1 %v1800_v8  ;;  %v287_v8 = vrot.slane %v282_v5, %v286_v4 }
  0xd2   :  { %1202 = vmatpush1.msra.mxu1 %v1799_v9  ;;  %v291_v9 = vrot.slane %v282_v5, %v290_v6  ;;  %v1772_v5 = vld [vmem:[%s3950_s1 + $0xbc8] sm:$0xff] }
  0xd3   :  { %1203 = vmatprep.subr.mxu1 %v1798_v10 }
  0xd4   :  { %1204 = vmatpush1.msra.mxu1 %v1797_v11 }
  0xd5   :  { %1205 = vmatprep.subr.mxu1 %v1796_v12 }
  0xd6   :  { %1206 = vmatpush1.msra.mxu1 %v1795_v13 }
  0xd7   :  { %1207 = vmatprep.subr.mxu1 %v1794_v14  ;;  %v1007_v14 = vcombine.high %v3190_v56, %v3190_v56  ;;  %v1745_v56 = vld [vmem:[%s3950_s1 + $0xaf0] sm:$0xff] }
  0xd8   :  { %1208 = vmatpush1.msra.mxu1 %v1793_v15 }
  0xd9   :  { %1209 = vmatprep.subr.mxu1 %v1792_v16 }
  0xda   :  { %1210 = vmatpush1.msra.mxu1 %v1791_v17 }
  0xdb   :  { %1211 = vmatprep.subr.mxu1 %v1790_v18 }
  0xdc   :  { %1212 = vmatpush1.msra.mxu1 %v1789_v19 }
  0xdd   :  { %1213 = vmatprep.subr.mxu1 %v1788_v20  ;;  %v3414_v20 = vrot.slane %v1007_v14, %v2458_v52  ;;  %v1764_v14 = vld [vmem:[%s3950_s1 + $0xb88] sm:$0xff] }
  0xde   :  { %1214 = vmatpush1.msra.mxu1 %v1787_v21 }
  0xdf   :  { %1215 = vmatprep.subr.mxu1 %v1786_v22 }
  0xe0   :  { %1216 = vmatpush1.msra.mxu1 %v1785_v23 }
  0xe1   :  { %1217 = vmatprep.subr.mxu1 %v1784_v24 }
  0xe2   :  { %1218 = vmatpush1.msra.mxu1 %v1783_v25 }
  0xe3   :  { %1219 = vmatprep.subr.mxu1 %v1782_v26  ;;  %v1023_v26 = vcombine.high %v3414_v20, %v3414_v20 }
  0xe4   :  { %1220 = vmatpush1.msra.mxu1 %v1781_v27 }
  0xe5   :  { %1221 = vmatprep.subr.mxu1 %v1780_v28  ;;  %v1744_v28 = vld [vmem:[%s3950_s1 + $0xae8] sm:$0xff] }
  0xe6   :  { %1222 = vmatpush1.msra.mxu1 %v1779_v29  ;;  %v1743_v29 = vld [vmem:[%s3950_s1 + $0xae0] sm:$0xff] }
  0xe7   :  { %1223 = vmatprep.subr.mxu1 %v1842_v30  ;;  %v1742_v30 = vld [vmem:[%s3950_s1 + $0xad8] sm:$0xff] }
  0xe8   :  { %1224 = vmatpush2.msra.mxu1 %v1841_v31  ;;  %v1741_v31 = vld [vmem:[%s3950_s1 + $0xad0] sm:$0xff] }
  0xe9   :  { %1225 = vmatprep.subr.mxu1 %v1840_v32  ;;  %v1740_v32 = vld [vmem:[%s3950_s1 + $0xac8] sm:$0xff] }
  0xea   :  { %1226 = vmatpush2.msra.mxu1 %v1839_v33  ;;  %v1739_v33 = vld [vmem:[%s3950_s1 + $0xac0] sm:$0xff] }
  0xeb   :  { %1227 = vmatprep.subr.mxu1 %v1838_v34  ;;  %v1738_v34 = vld [vmem:[%s3950_s1 + $0xab8] sm:$0xff] }
  0xec   :  { %1228 = vmatpush2.msra.mxu1 %v1837_v35  ;;  %v1737_v35 = vld [vmem:[%s3950_s1 + $0xab0] sm:$0xff] }
  0xed   :  { %1229 = vmatprep.subr.mxu1 %v1836_v36  ;;  %v1736_v36 = vld [vmem:[%s3950_s1 + $0xaa8] sm:$0xff] }
  0xee   :  { %1230 = vmatpush2.msra.mxu1 %v1835_v37  ;;  %v1735_v37 = vld [vmem:[%s3950_s1 + $0xaa0] sm:$0xff] }
  0xef   :  { %1231 = vmatprep.subr.mxu1 %v1834_v38  ;;  %v1734_v38 = vld [vmem:[%s3950_s1 + $0xa98] sm:$0xff] }
  0xf0   :  { %1232 = vmatpush2.msra.mxu1 %v1833_v39  ;;  %v1733_v39 = vld [vmem:[%s3950_s1 + $0xa90] sm:$0xff] }
  0xf1   :  { %1233 = vmatprep.subr.mxu1 %v1832_v40  ;;  %v1732_v40 = vld [vmem:[%s3950_s1 + $0xa88] sm:$0xff] }
  0xf2   :  { %1234 = vmatpush2.msra.mxu1 %v1831_v42  ;;  %v1731_v42 = vld [vmem:[%s3950_s1 + $0xa80] sm:$0xff] }
  0xf3   :  { %1235 = vmatprep.subr.mxu1 %v1830_v43  ;;  %v1730_v43 = vld [vmem:[%s3950_s1 + $0xa78] sm:$0xff] }
  0xf4   :  { %1236 = vmatpush2.msra.mxu1 %v1829_v44  ;;  %v1729_v44 = vld [vmem:[%s3950_s1 + $0xa70] sm:$0xff] }
  0xf5   :  { %1237 = vmatprep.subr.mxu1 %v1828_v45  ;;  %v1728_v45 = vld [vmem:[%s3950_s1 + $0xa68] sm:$0xff] }
  0xf6   :  { %1238 = vmatpush2.msra.mxu1 %v1827_v46  ;;  %v1727_v46 = vld [vmem:[%s3950_s1 + $0xa60] sm:$0xff] }
  0xf7   :  { %1239 = vmatprep.subr.mxu1 %v1826_v47  ;;  %v1726_v47 = vld [vmem:[%s3950_s1 + $0xa58] sm:$0xff] }
  0xf8   :  { %1240 = vmatpush2.msra.mxu1 %v1825_v48  ;;  %v1725_v48 = vld [vmem:[%s3950_s1 + $0xa50] sm:$0xff] }
  0xf9   :  { %1241 = vmatprep.subr.mxu1 %v1824_v49  ;;  %v1724_v49 = vld [vmem:[%s3950_s1 + $0xa48] sm:$0xff] }
  0xfa   :  { %1242 = vmatpush2.msra.mxu1 %v1823_v50  ;;  %v1723_v50 = vld [vmem:[%s3950_s1 + $0xa40] sm:$0xff] }
  0xfb   :  { %1243 = vmatprep.subr.mxu1 %v1822_v51  ;;  %v1722_v51 = vld [vmem:[%s3950_s1 + $0xa38] sm:$0xff] }
  0xfc   :  { %1244 = vmatpush2.msra.mxu1 %v1821_v53  ;;  %v1721_v53 = vld [vmem:[%s3950_s1 + $0xa30] sm:$0xff] }
  0xfd   :  { %1245 = vmatprep.subr.mxu1 %v1820_v54  ;;  %v1720_v54 = vld [vmem:[%s3950_s1 + $0xa28] sm:$0xff] }
  0xfe   :  { %1246 = vmatpush2.msra.mxu1 %v1819_v55  ;;  %v1719_v55 = vld [vmem:[%s3950_s1 + $0xa20] sm:$0xff] }
  0xff   :  { %1247 = vmatprep.subr.mxu1 %v1818_v57  ;;  %v1718_v57 = vld [vmem:[%s3950_s1 + $0xa18] sm:$0xff] }
 0x100   :  { %1248 = vmatpush2.msra.mxu1 %v1817_v58  ;;  %v1717_v58 = vld [vmem:[%s3950_s1 + $0xa10] sm:$0xff] }
 0x101   :  { %1249 = vmatprep.subr.mxu1 %v1816_v59  ;;  %v1716_v59 = vld [vmem:[%s3950_s1 + $0xa08] sm:$0xff] }
 0x102   :  { %1250 = vmatpush2.msra.mxu1 %v1815_v60  ;;  %v1715_v60 = vld [vmem:[%s3950_s1 + $0xa00] sm:$0xff] }
 0x103   :  { %1251 = vmatprep.subr.mxu1 %v1814_v62  ;;  %v404_v7 = vpop.f32.mrf.mxu0  ;;  %v1778_v62 = vld [vmem:[%s3950_s1 + $0xbf8] sm:$0xff] }
 0x104   :  { %1252 = vmatpush2.msra.mxu1 %v1813_v0  ;;  %v405_v12 = vadd.f32 %v404_v7, %v287_v8  ;;  %v1776_v0 = vld [vmem:[%s3950_s1 + $0xbe8] sm:$0xff]  ;;  %v1771_v7 = vld [vmem:[%s3950_s1 + $0xbc0] sm:$0xff]  ;;  %v1770_v8 = vld [vmem:[%s3950_s1 + $0xbb8] sm:$0xff] }
 0x105   :  { %1253 = vmatprep.subr.mxu1 %v1812_v1  ;;  %v475_v10 = vpop.f32.mrf.mxu1  ;;  %v406_v11 = vpop.f32.mrf.mxu0  ;;  %v1775_v1 = vld [vmem:[%s3950_s1 + $0xbe0] sm:$0xff] }
 0x106   :  { %1254 = vmatpush2.msra.mxu1 %v1811_v3  ;;  %v407_v13 = vadd.f32 %v406_v11, %v291_v9  ;;  %v476_v16 = vadd.f32 %v475_v10, %v405_v12  ;;  %v1773_v3 = vld [vmem:[%s3950_s1 + $0xbd0] sm:$0xff]  ;;  %v1768_v10 = vld [vmem:[%s3950_s1 + $0xba8] sm:$0xff]  ;;  %v1767_v11 = vld [vmem:[%s3950_s1 + $0xba0] sm:$0xff] }
 0x107   :  { %1256 = vmatmul.mubr.f32.vlgmr.msra.gmra.mxu1 %v1031_v63  ;;  %v477_v15 = vpop.f32.mrf.mxu1  ;;  %v1777_v63 = vld [vmem:[%s3950_s1 + $0xbf0] sm:$0xff]  ;;  %v1766_v12 = vld [vmem:[%s3950_s1 + $0xb98] sm:$0xff] }
 0x108   :  { %v478_v19 = vadd.f32 %v477_v15, %v407_v13  ;;  %v1769_v9 = vld [vmem:[%s3950_s1 + $0xbb0] sm:$0xff]  ;;  %v1763_v15 = vld [vmem:[%s3950_s1 + $0xb80] sm:$0xff] }
 0x109   :  { %v1765_v13 = vld [vmem:[%s3950_s1 + $0xb90] sm:$0xff] }
 0x146   :  { %v546_v17 = vpop.f32.mrf.mxu0  ;;  %v617_v18 = vpop.f32.mrf.mxu1 }
 0x147   :  { %v547_v21 = vadd.f32 %v546_v17, %v476_v16  ;;  %v1762_v16 = vld [vmem:[%s3950_s1 + $0xb78] sm:$0xff]  ;;  %v1761_v17 = vld [vmem:[%s3950_s1 + $0xb70] sm:$0xff] }
 0x148   :  { %v548_v22 = vpop.f32.mrf.mxu0  ;;  %v619_v24 = vpop.f32.mrf.mxu1 }
 0x149   :  { %v549_v23 = vadd.f32 %v548_v22, %v478_v19  ;;  %v618_v27 = vadd.f32 %v617_v18, %v547_v21  ;;  %v1760_v18 = vld [vmem:[%s3950_s1 + $0xb68] sm:$0xff]  ;;  %v1759_v19 = vld [vmem:[%s3950_s1 + $0xb60] sm:$0xff]  ;;  %v1758_v21 = vld [vmem:[%s3950_s1 + $0xb58] sm:$0xff] }
 0x14a   :  { %v1757_v22 = vld [vmem:[%s3950_s1 + $0xb50] sm:$0xff] }
 0x14b   :  { %v620_v25 = vadd.f32 %v619_v24, %v549_v23  ;;  %v1756_v23 = vld [vmem:[%s3950_s1 + $0xb48] sm:$0xff]  ;;  %v1755_v24 = vld [vmem:[%s3950_s1 + $0xb40] sm:$0xff] }
 0x14d   :  { %725 = vmatprep.mubr.f32.mxu0 %v620_v25  ;;  %v1754_v25 = vld [vmem:[%s3950_s1 + $0xb38] sm:$0xff] }
 0x14e   :  { %726 = vmatmul.mubr.f32.vlgmr.msra.gmra.mxu0 %v618_v27  ;;  %v1753_v27 = vld [vmem:[%s3950_s1 + $0xb30] sm:$0xff] }
 0x14f   :  { %1121 = vmatpush1.msra.mxu0 %v1745_v56  ;;  %1184 = vmatprep.mubr.f32.mxu0 %v1023_v26  ;;  %v1024_v26 = vcombine.high %v3386_v61, %v3386_v61  ;;  %v1752_v56 = vld [vmem:[%s3950_s1 + $0xb28] sm:$0xff]  ;;  %v1750_v61 = vld [vmem:[%s3950_s1 + $0xb18] sm:$0xff] }
 0x150   :  { %1122 = vmatprep.subr.mxu0 %v1744_v28  ;;  %v1751_v28 = vld [vmem:[%s3950_s1 + $0xb20] sm:$0xff] }
 0x151   :  { %1123 = vmatpush1.msra.mxu0 %v1743_v29  ;;  %v3601_v29 = vrot.slane %v1024_v26, %v2458_v52  ;;  %v1874_v52 = vld [vmem:[%s3950_s1 + $0xef8] sm:$0xff]  ;;  %v1887_v26 = vld [vmem:[%s3950_s1 + $0xf60] sm:$0xff] }
 0x152   :  { %1124 = vmatprep.subr.mxu0 %v1742_v30  ;;  %v1749_v30 = vld [vmem:[%s3950_s1 + $0xb10] sm:$0xff] }
 0x153   :  { %1125 = vmatpush1.msra.mxu0 %v1741_v31  ;;  %v1748_v31 = vld [vmem:[%s3950_s1 + $0xb08] sm:$0xff] }
 0x154   :  { %1126 = vmatprep.subr.mxu0 %v1740_v32  ;;  %v1747_v32 = vld [vmem:[%s3950_s1 + $0xb00] sm:$0xff] }
 0x155   :  { %1127 = vmatpush1.msra.mxu0 %v1739_v33  ;;  %v1040_v33 = vcombine.high %v3601_v29, %v3601_v29 }
 0x156   :  { %1128 = vmatprep.subr.mxu0 %v1738_v34  ;;  %v1873_v34 = vld [vmem:[%s3950_s1 + $0xef0] sm:$0xff] }
 0x157   :  { %1129 = vmatpush1.msra.mxu0 %v1737_v35  ;;  %v1872_v35 = vld [vmem:[%s3950_s1 + $0xee8] sm:$0xff] }
 0x158   :  { %1130 = vmatprep.subr.mxu0 %v1736_v36  ;;  %v1871_v36 = vld [vmem:[%s3950_s1 + $0xee0] sm:$0xff] }
 0x159   :  { %1131 = vmatpush1.msra.mxu0 %v1735_v37  ;;  %v1870_v37 = vld [vmem:[%s3950_s1 + $0xed8] sm:$0xff] }
 0x15a   :  { %1132 = vmatprep.subr.mxu0 %v1734_v38  ;;  %v1869_v38 = vld [vmem:[%s3950_s1 + $0xed0] sm:$0xff] }
 0x15b   :  { %1133 = vmatpush1.msra.mxu0 %v1733_v39  ;;  %v1867_v39 = vld [vmem:[%s3950_s1 + $0xec0] sm:$0xff] }
 0x15c   :  { %1134 = vmatprep.subr.mxu0 %v1732_v40  ;;  %v1866_v40 = vld [vmem:[%s3950_s1 + $0xeb8] sm:$0xff] }
 0x15d   :  { %1135 = vmatpush1.msra.mxu0 %v1731_v42  ;;  %v1865_v42 = vld [vmem:[%s3950_s1 + $0xeb0] sm:$0xff] }
 0x15e   :  { %1136 = vmatprep.subr.mxu0 %v1730_v43  ;;  %v1864_v43 = vld [vmem:[%s3950_s1 + $0xea8] sm:$0xff] }
 0x15f   :  { %1137 = vmatpush1.msra.mxu0 %v1729_v44  ;;  %v1863_v44 = vld [vmem:[%s3950_s1 + $0xea0] sm:$0xff] }
 0x160   :  { %1138 = vmatprep.subr.mxu0 %v1728_v45  ;;  %v1862_v45 = vld [vmem:[%s3950_s1 + $0xe98] sm:$0xff] }
 0x161   :  { %1139 = vmatpush1.msra.mxu0 %v1727_v46  ;;  %v1861_v46 = vld [vmem:[%s3950_s1 + $0xe90] sm:$0xff] }
 0x162   :  { %1140 = vmatprep.subr.mxu0 %v1726_v47  ;;  %v1860_v47 = vld [vmem:[%s3950_s1 + $0xe88] sm:$0xff] }
 0x163   :  { %1141 = vmatpush1.msra.mxu0 %v1725_v48  ;;  %v1859_v48 = vld [vmem:[%s3950_s1 + $0xe80] sm:$0xff] }
 0x164   :  { %1142 = vmatprep.subr.mxu0 %v1724_v49  ;;  %v1858_v49 = vld [vmem:[%s3950_s1 + $0xe78] sm:$0xff] }
 0x165   :  { %1143 = vmatpush1.msra.mxu0 %v1723_v50  ;;  %v1857_v50 = vld [vmem:[%s3950_s1 + $0xe70] sm:$0xff] }
 0x166   :  { %1144 = vmatprep.subr.mxu0 %v1722_v51  ;;  %v1856_v51 = vld [vmem:[%s3950_s1 + $0xe68] sm:$0xff] }
 0x167   :  { %1145 = vmatpush1.msra.mxu0 %v1721_v53  ;;  %v1855_v53 = vld [vmem:[%s3950_s1 + $0xe60] sm:$0xff] }
 0x168   :  { %1146 = vmatprep.subr.mxu0 %v1720_v54  ;;  %v1854_v54 = vld [vmem:[%s3950_s1 + $0xe58] sm:$0xff] }
 0x169   :  { %1147 = vmatpush1.msra.mxu0 %v1719_v55  ;;  %v1853_v55 = vld [vmem:[%s3950_s1 + $0xe50] sm:$0xff] }
 0x16a   :  { %1148 = vmatprep.subr.mxu0 %v1718_v57  ;;  %v1852_v57 = vld [vmem:[%s3950_s1 + $0xe48] sm:$0xff] }
 0x16b   :  { %1149 = vmatpush1.msra.mxu0 %v1717_v58  ;;  %v1851_v58 = vld [vmem:[%s3950_s1 + $0xe40] sm:$0xff] }
 0x16c   :  { %1150 = vmatprep.subr.mxu0 %v1716_v59  ;;  %v1850_v59 = vld [vmem:[%s3950_s1 + $0xe38] sm:$0xff] }
 0x16d   :  { %1151 = vmatpush1.msra.mxu0 %v1715_v60  ;;  %v1849_v60 = vld [vmem:[%s3950_s1 + $0xe30] sm:$0xff] }
 0x16e   :  { %1152 = vmatprep.subr.mxu0 %v1778_v62  ;;  %v1848_v62 = vld [vmem:[%s3950_s1 + $0xe28] sm:$0xff] }
 0x16f   :  { %1153 = vmatpush2.msra.mxu0 %v1777_v63  ;;  %v1847_v63 = vld [vmem:[%s3950_s1 + $0xe20] sm:$0xff] }
 0x170   :  { %1154 = vmatprep.subr.mxu0 %v1776_v0  ;;  %v1846_v0 = vld [vmem:[%s3950_s1 + $0xe18] sm:$0xff] }
 0x171   :  { %1155 = vmatpush2.msra.mxu0 %v1775_v1  ;;  %v1845_v1 = vld [vmem:[%s3950_s1 + $0xe10] sm:$0xff] }
 0x172   :  { %1156 = vmatprep.subr.mxu0 %v1774_v2  ;;  %v1844_v2 = vld [vmem:[%s3950_s1 + $0xe08] sm:$0xff] }
 0x173   :  { %1157 = vmatpush2.msra.mxu0 %v1773_v3  ;;  %v1843_v3 = vld [vmem:[%s3950_s1 + $0xe00] sm:$0xff] }
 0x174   :  { %1158 = vmatprep.subr.mxu0 %v1772_v5  ;;  %v1906_v5 = vld [vmem:[%s3950_s1 + $0xff8] sm:$0xff] }
 0x175   :  { %1159 = vmatpush2.msra.mxu0 %v1771_v7  ;;  %v1905_v7 = vld [vmem:[%s3950_s1 + $0xff0] sm:$0xff] }
 0x176   :  { %1160 = vmatprep.subr.mxu0 %v1770_v8  ;;  %v1904_v8 = vld [vmem:[%s3950_s1 + $0xfe8] sm:$0xff] }
 0x177   :  { %1161 = vmatpush2.msra.mxu0 %v1769_v9  ;;  %v1903_v9 = vld [vmem:[%s3950_s1 + $0xfe0] sm:$0xff] }
 0x178   :  { %1162 = vmatprep.subr.mxu0 %v1768_v10  ;;  %v1902_v10 = vld [vmem:[%s3950_s1 + $0xfd8] sm:$0xff] }
 0x179   :  { %1163 = vmatpush2.msra.mxu0 %v1767_v11  ;;  %v1901_v11 = vld [vmem:[%s3950_s1 + $0xfd0] sm:$0xff] }
 0x17a   :  { %1164 = vmatprep.subr.mxu0 %v1766_v12  ;;  %v1900_v12 = vld [vmem:[%s3950_s1 + $0xfc8] sm:$0xff] }
 0x17b   :  { %1165 = vmatpush2.msra.mxu0 %v1765_v13  ;;  %v1899_v13 = vld [vmem:[%s3950_s1 + $0xfc0] sm:$0xff] }
 0x17c   :  { %1166 = vmatprep.subr.mxu0 %v1764_v14  ;;  %v1898_v14 = vld [vmem:[%s3950_s1 + $0xfb8] sm:$0xff] }
 0x17d   :  { %1167 = vmatpush2.msra.mxu0 %v1763_v15  ;;  %v1897_v15 = vld [vmem:[%s3950_s1 + $0xfb0] sm:$0xff] }
 0x17e   :  { %1168 = vmatprep.subr.mxu0 %v1762_v16  ;;  %v1896_v16 = vld [vmem:[%s3950_s1 + $0xfa8] sm:$0xff] }
 0x17f   :  { %1169 = vmatpush2.msra.mxu0 %v1761_v17  ;;  %v1895_v17 = vld [vmem:[%s3950_s1 + $0xfa0] sm:$0xff] }
 0x180   :  { %1170 = vmatprep.subr.mxu0 %v1760_v18  ;;  %v1894_v18 = vld [vmem:[%s3950_s1 + $0xf98] sm:$0xff] }
 0x181   :  { %1171 = vmatpush2.msra.mxu0 %v1759_v19  ;;  %v1893_v19 = vld [vmem:[%s3950_s1 + $0xf90] sm:$0xff] }
 0x182   :  { %1172 = vmatprep.subr.mxu0 %v1758_v21  ;;  %v1892_v21 = vld [vmem:[%s3950_s1 + $0xf88] sm:$0xff] }
 0x183   :  { %1173 = vmatpush2.msra.mxu0 %v1757_v22  ;;  %v1891_v22 = vld [vmem:[%s3950_s1 + $0xf80] sm:$0xff] }
 0x184   :  { %1174 = vmatprep.subr.mxu0 %v1756_v23  ;;  %v1890_v23 = vld [vmem:[%s3950_s1 + $0xf78] sm:$0xff] }
 0x185   :  { %1175 = vmatpush2.msra.mxu0 %v1755_v24  ;;  %v1889_v24 = vld [vmem:[%s3950_s1 + $0xf70] sm:$0xff] }
 0x186   :  { %1176 = vmatprep.subr.mxu0 %v1754_v25  ;;  %v1888_v25 = vld [vmem:[%s3950_s1 + $0xf68] sm:$0xff] }
 0x187   :  { %1177 = vmatpush2.msra.mxu0 %v1753_v27  ;;  %v1886_v27 = vld [vmem:[%s3950_s1 + $0xf58] sm:$0xff] }
 0x188   :  { %1178 = vmatprep.subr.mxu0 %v1752_v56  ;;  %v1885_v56 = vld [vmem:[%s3950_s1 + $0xf50] sm:$0xff] }
 0x189   :  { %1179 = vmatpush2.msra.mxu0 %v1751_v28  ;;  %v1884_v28 = vld [vmem:[%s3950_s1 + $0xf48] sm:$0xff] }
 0x18a   :  { %1180 = vmatprep.subr.mxu0 %v1750_v61  ;;  %v1883_v61 = vld [vmem:[%s3950_s1 + $0xf40] sm:$0xff] }
 0x18b   :  { %1181 = vmatpush2.msra.mxu0 %v1749_v30  ;;  %v1882_v30 = vld [vmem:[%s3950_s1 + $0xf38] sm:$0xff] }
 0x18c   :  { %1182 = vmatprep.subr.mxu0 %v1748_v31  ;;  %v1881_v31 = vld [vmem:[%s3950_s1 + $0xf30] sm:$0xff] }
 0x18d   :  { %1183 = vmatpush2.msra.mxu0 %v1747_v32  ;;  %v1880_v32 = vld [vmem:[%s3950_s1 + $0xf28] sm:$0xff] }
 0x18e   :  { %1185 = vmatmul.mubr.f32.vlgmr.msra.gmra.mxu0 %v3414_v20  ;;  %1262 = vmatprep.subr.mxu0 %v1874_v52  ;;  %v1868_v20 = vld [vmem:[%s3950_s1 + $0xec8] sm:$0xff]  ;;  %v1879_v52 = vld [vmem:[%s3950_s1 + $0xf20] sm:$0xff] }
 0x18f   :  { %1263 = vmatpush1.msra.mxu0 %v1873_v34  ;;  %1326 = vmatprep.mubr.f32.mxu0 %v1040_v33  ;;  %v1878_v33 = vld [vmem:[%s3950_s1 + $0xf18] sm:$0xff]  ;;  %v1877_v34 = vld [vmem:[%s3950_s1 + $0xf10] sm:$0xff] }
 0x190   :  { %1264 = vmatprep.subr.mxu0 %v1872_v35  ;;  %v1876_v35 = vld [vmem:[%s3950_s1 + $0xf08] sm:$0xff] }
 0x191   :  { %1265 = vmatpush1.msra.mxu0 %v1871_v36  ;;  %v1875_v36 = vld [vmem:[%s3950_s1 + $0xf00] sm:$0xff] }
 0x192   :  { %1266 = vmatprep.subr.mxu0 %v1870_v37  ;;  %v1939_v37 = vld [vmem:[%s3952_s3 + $0x1f8] sm:$0xff] }
 0x193   :  { %1267 = vmatpush1.msra.mxu0 %v1869_v38  ;;  %v1923_v38 = vld [vmem:[%s3952_s3 + $0x178] sm:$0xff]  ;;  %1982 = vmatprep.subr.mxu1 %v1939_v37 }
 0x194   :  { %1268 = vmatprep.subr.mxu0 %v1868_v20  ;;  %v1938_v20 = vld [vmem:[%s3952_s3 + $0x1f0] sm:$0xff]  ;;  %1983 = vmatpush3.msra.mxu1 %v1923_v38 }
 0x195   :  { %1269 = vmatpush1.msra.mxu0 %v1867_v39  ;;  %v1922_v39 = vld [vmem:[%s3952_s3 + $0x170] sm:$0xff]  ;;  %1984 = vmatprep.subr.mxu1 %v1938_v20 }
 0x196   :  { %1270 = vmatprep.subr.mxu0 %v1866_v40  ;;  %v1921_v40 = vld [vmem:[%s3952_s3 + $0x168] sm:$0xff]  ;;  %1985 = vmatpush3.msra.mxu1 %v1922_v39 }
 0x197   :  { %1271 = vmatpush1.msra.mxu0 %v1865_v42  ;;  %v1936_v42 = vld [vmem:[%s3952_s3 + $0x1e0] sm:$0xff] }
 0x198   :  { %1272 = vmatprep.subr.mxu0 %v1864_v43  ;;  %v1920_v43 = vld [vmem:[%s3952_s3 + $0x160] sm:$0xff] }
 0x199   :  { %1273 = vmatpush1.msra.mxu0 %v1863_v44  ;;  %v1935_v44 = vld [vmem:[%s3952_s3 + $0x1d8] sm:$0xff] }
 0x19a   :  { %1274 = vmatprep.subr.mxu0 %v1862_v45  ;;  %v1919_v45 = vld [vmem:[%s3952_s3 + $0x158] sm:$0xff] }
 0x19b   :  { %1275 = vmatpush1.msra.mxu0 %v1861_v46  ;;  %v1934_v46 = vld [vmem:[%s3952_s3 + $0x1d0] sm:$0xff] }
 0x19c   :  { %1276 = vmatprep.subr.mxu0 %v1860_v47  ;;  %v1918_v47 = vld [vmem:[%s3952_s3 + $0x150] sm:$0xff] }
 0x19d   :  { %1277 = vmatpush1.msra.mxu0 %v1859_v48  ;;  %v1933_v48 = vld [vmem:[%s3952_s3 + $0x1c8] sm:$0xff] }
 0x19e   :  { %1278 = vmatprep.subr.mxu0 %v1858_v49  ;;  %v1917_v49 = vld [vmem:[%s3952_s3 + $0x148] sm:$0xff] }
 0x19f   :  { %1279 = vmatpush1.msra.mxu0 %v1857_v50  ;;  %v1932_v50 = vld [vmem:[%s3952_s3 + $0x1c0] sm:$0xff] }
 0x1a0   :  { %1280 = vmatprep.subr.mxu0 %v1856_v51  ;;  %v1916_v51 = vld [vmem:[%s3952_s3 + $0x140] sm:$0xff] }
 0x1a1   :  { %1281 = vmatpush1.msra.mxu0 %v1855_v53  ;;  %v1931_v53 = vld [vmem:[%s3952_s3 + $0x1b8] sm:$0xff] }
 0x1a2   :  { %1282 = vmatprep.subr.mxu0 %v1854_v54  ;;  %v1915_v54 = vld [vmem:[%s3952_s3 + $0x138] sm:$0xff] }
 0x1a3   :  { %1283 = vmatpush1.msra.mxu0 %v1853_v55  ;;  %v1930_v55 = vld [vmem:[%s3952_s3 + $0x1b0] sm:$0xff] }
 0x1a4   :  { %1284 = vmatprep.subr.mxu0 %v1852_v57  ;;  %v1914_v57 = vld [vmem:[%s3952_s3 + $0x130] sm:$0xff] }
 0x1a5   :  { %1285 = vmatpush1.msra.mxu0 %v1851_v58  ;;  %v1929_v58 = vld [vmem:[%s3952_s3 + $0x1a8] sm:$0xff] }
 0x1a6   :  { %1286 = vmatprep.subr.mxu0 %v1850_v59  ;;  %v1913_v59 = vld [vmem:[%s3952_s3 + $0x128] sm:$0xff] }
 0x1a7   :  { %1287 = vmatpush1.msra.mxu0 %v1849_v60  ;;  %v1928_v60 = vld [vmem:[%s3952_s3 + $0x1a0] sm:$0xff] }
 0x1a8   :  { %1288 = vmatprep.subr.mxu0 %v1848_v62  ;;  %v1912_v62 = vld [vmem:[%s3952_s3 + $0x120] sm:$0xff] }
 0x1a9   :  { %1289 = vmatpush1.msra.mxu0 %v1847_v63  ;;  %v1927_v63 = vld [vmem:[%s3952_s3 + $0x198] sm:$0xff] }
 0x1aa   :  { %1290 = vmatprep.subr.mxu0 %v1846_v0  ;;  %v1911_v0 = vld [vmem:[%s3952_s3 + $0x118] sm:$0xff] }
 0x1ab   :  { %1291 = vmatpush1.msra.mxu0 %v1845_v1  ;;  %v1926_v1 = vld [vmem:[%s3952_s3 + $0x190] sm:$0xff] }
 0x1ac   :  { %1292 = vmatprep.subr.mxu0 %v1844_v2 }
 0x1ad   :  { %1293 = vmatpush1.msra.mxu0 %v1843_v3  ;;  %v1910_v3 = vld [vmem:[%s3952_s3 + $0x110] sm:$0xff] }
 0x1ae   :  { %1294 = vmatprep.subr.mxu0 %v1906_v5  ;;  %v1925_v5 = vld [vmem:[%s3952_s3 + $0x188] sm:$0xff] }
 0x1af   :  { %1295 = vmatpush2.msra.mxu0 %v1905_v7 }
 0x1b0   :  { %1296 = vmatprep.subr.mxu0 %v1904_v8  ;;  %v1909_v8 = vld [vmem:[%s3952_s3 + $0x108] sm:$0xff] }
 0x1b1   :  { %1297 = vmatpush2.msra.mxu0 %v1903_v9 }
 0x1b2   :  { %1298 = vmatprep.subr.mxu0 %v1902_v10  ;;  %v1924_v10 = vld [vmem:[%s3952_s3 + $0x180] sm:$0xff] }
 0x1b3   :  { %1299 = vmatpush2.msra.mxu0 %v1901_v11  ;;  %v1908_v11 = vld [vmem:[%s3952_s3 + $0x100] sm:$0xff] }
 0x1b4   :  { %1300 = vmatprep.subr.mxu0 %v1900_v12  ;;  %v1907_v12 = vld [vmem:[%s3951_s2 + $0x2] sm:$0x3] }
 0x1b5   :  { %1301 = vmatpush2.msra.mxu0 %v1899_v13  ;;  %v1115_v13 = vpop.f32.mrf.mxu1 }
 0x1b6   :  { %1302 = vmatprep.subr.mxu0 %v1898_v14  ;;  %v1002_v14 = vrot.slane %v1907_v12, %v290_v6 }
 0x1b7   :  { %1303 = vmatpush2.msra.mxu0 %v1897_v15  ;;  %v998_v15 = vrot.slane %v1907_v12, %v286_v4 }
 0x1b8   :  { %1304 = vmatprep.subr.mxu0 %v1896_v16  ;;  %v1117_v16 = vpop.f32.mrf.mxu1 }
 0x1b9   :  { %1305 = vmatpush2.msra.mxu0 %v1895_v17 }
 0x1ba   :  { %1306 = vmatprep.subr.mxu0 %v1894_v18  ;;  %v1118_v18 = vadd.f32 %v1117_v16, %v1002_v14 }
 0x1bb   :  { %1307 = vmatpush2.msra.mxu0 %v1893_v19  ;;  %v1116_v19 = vadd.f32 %v1115_v13, %v998_v15 }
 0x1bc   :  { %1308 = vmatprep.subr.mxu0 %v1892_v21 }
 0x1bd   :  { %1309 = vmatpush2.msra.mxu0 %v1891_v22 }
 0x1be   :  { %1310 = vmatprep.subr.mxu0 %v1890_v23 }
 0x1bf   :  { %1311 = vmatpush2.msra.mxu0 %v1889_v24 }
 0x1c0   :  { %1312 = vmatprep.subr.mxu0 %v1888_v25 }
 0x1c1   :  { %1313 = vmatpush2.msra.mxu0 %v1887_v26 }
 0x1c2   :  { %1314 = vmatprep.subr.mxu0 %v1886_v27 }
 0x1c3   :  { %1315 = vmatpush2.msra.mxu0 %v1885_v56 }
 0x1c4   :  { %1316 = vmatprep.subr.mxu0 %v1884_v28 }
 0x1c5   :  { %1317 = vmatpush2.msra.mxu0 %v1883_v61 }
 0x1c6   :  { %1318 = vmatprep.subr.mxu0 %v1882_v30 }
 0x1c7   :  { %1319 = vmatpush2.msra.mxu0 %v1881_v31  ;;  %v1257_v22 = vpop.f32.mrf.mxu1  ;;  %v1941_v31 = vld [vmem:[%s3953_s4 + $0x1] ss:$0 sm:$0xff]  ;;  %s2084_s4 = smov 112  }
 0x1c8   :  { %1320 = vmatprep.subr.mxu0 %v1880_v32 }
 0x1c9   :  { %1321 = vmatpush2.msra.mxu0 %v1879_v52  ;;  %v1259_v25 = vpop.f32.mrf.mxu1 }
 0x1ca   :  { %1322 = vmatprep.subr.mxu0 %v1878_v33 }
 0x1cb   :  { %1323 = vmatpush2.msra.mxu0 %v1877_v34 }
 0x1cc   :  { %1324 = vmatprep.subr.mxu0 %v1876_v35 }
 0x1cd   :  { %1325 = vmatpush2.msra.mxu0 %v1875_v36 }
 0x1ce   :  { %1327 = vmatmul.mubr.f32.vlgmr.msra.gmra.mxu0 %v3601_v29  ;;  %v1937_v29 = vld [vmem:[%s3952_s3 + $0x1e8] sm:$0xff] }
 0x1cf   :  { %1986 = vmatprep.subr.mxu1 %v1937_v29 }
 0x1d0   :  { %1987 = vmatpush3.msra.mxu1 %v1921_v40 }
 0x1d1   :  { %1988 = vmatprep.subr.mxu1 %v1936_v42 }
 0x1d2   :  { %1989 = vmatpush3.msra.mxu1 %v1920_v43 }
 0x1d3   :  { %1990 = vmatprep.subr.mxu1 %v1935_v44 }
 0x1d4   :  { %1991 = vmatpush3.msra.mxu1 %v1919_v45 }
 0x1d5   :  { %1992 = vmatprep.subr.mxu1 %v1934_v46 }
 0x1d6   :  { %1993 = vmatpush3.msra.mxu1 %v1918_v47 }
 0x1d7   :  { %1994 = vmatprep.subr.mxu1 %v1933_v48 }
 0x1d8   :  { %1995 = vmatpush3.msra.mxu1 %v1917_v49 }
 0x1d9   :  { %1996 = vmatprep.subr.mxu1 %v1932_v50 }
 0x1da   :  { %1997 = vmatpush3.msra.mxu1 %v1916_v51 }
 0x1db   :  { %1998 = vmatprep.subr.mxu1 %v1931_v53 }
 0x1dc   :  { %1999 = vmatpush3.msra.mxu1 %v1915_v54 }
 0x1dd   :  { %2000 = vmatprep.subr.mxu1 %v1930_v55 }
 0x1de   :  { %2001 = vmatpush3.msra.mxu1 %v1914_v57 }
 0x1df   :  { %2002 = vmatprep.subr.mxu1 %v1929_v58 }
 0x1e0   :  { %2003 = vmatpush3.msra.mxu1 %v1913_v59  ;;  %v1445_v59 = vld [vmem:[%s3954_s5] sm:$0x3] }
 0x1e1   :  { %2004 = vmatprep.subr.mxu1 %v1928_v60 }
 0x1e2   :  { %2005 = vmatpush3.msra.mxu1 %v1912_v62 }
 0x1e3   :  { %2006 = vmatprep.subr.mxu1 %v1927_v63 }
 0x1e4   :  { %2007 = vmatpush3.msra.mxu1 %v1911_v0 }
 0x1e5   :  { %2008 = vmatprep.subr.mxu1 %v1926_v1 }
 0x1e6   :  { %2009 = vmatpush3.msra.mxu1 %v1910_v3 }
 0x1e7   :  { %2010 = vmatprep.subr.mxu1 %v1925_v5 }
 0x1e8   :  { %2011 = vmatpush3.msra.mxu1 %v1909_v8 }
 0x1e9   :  { %2012 = vmatprep.subr.mxu1 %v1924_v10 }
 0x1ea   :  { %2013 = vmatpush3.msra.mxu1 %v1908_v11 }
 0x20e   :  { %v1979_v2 = vpop.f32.mrf.mxu0 }
 0x210   :  { %v1980_v7 = vpop.f32.mrf.mxu0 }
 0x211   :  { %v1981_v9 = vadd.f32 %v1980_v7, %v1979_v2 }
 0x213   :  { %v728_v4 = vadd.f32 %v1981_v9, %v1648_v41 }
 0x215   :  { %2033 = vtanh.f32 %v728_v4 }
 0x222   :  { %v2034_v34 = vpop.eup %2033 }
 0x223   :  { %v1506_v35 = vadd.f32 2.0, %v2034_v34  ;;  %v1448_v40 = vmul.f32 0.5, %v2034_v34 }
 0x225   :  { %v1507_v20 = vmul.f32 -2.0, %v1506_v35  ;;  %v1449_v42 = vmul.f32 1.442695, %v1448_v40 }
 0x227   :  { %v1508_v29 = vmul.f32 1.442695, %v1507_v20 }
 0x24e   :  { %v1186_v17 = vpop.f32.mrf.mxu0 }
 0x24f   :  { %v1187_v24 = vadd.f32 %v1186_v17, %v1116_v19 }
 0x250   :  { %v1188_v21 = vpop.f32.mrf.mxu0 }
 0x251   :  { %v1189_v23 = vadd.f32 %v1188_v21, %v1118_v18  ;;  %v1258_v56 = vadd.f32 %v1257_v22, %v1187_v24  ;;  %v1942_v22 = vld [vmem:[%s3954_s5 + $0x2] sm:$0x3] }
 0x253   :  { %v1260_v27 = vadd.f32 %v1259_v25, %v1189_v23 }
 0x28e   :  { %v1328_v26 = vpop.f32.mrf.mxu0 }
 0x28f   :  { %v1329_v30 = vadd.f32 %v1328_v26, %v1258_v56 }
 0x290   :  { %v1330_v28 = vpop.f32.mrf.mxu0 }
 0x291   :  { %v1331_v61 = vadd.f32 %v1330_v28, %v1260_v27 }
 0x293   :  { %1438 = vmatprep.mubr.f32.mxu1 %v1331_v61 }
 0x294   :  { %1439 = vmatmul.mubr.f32.vlgmr.msra.gmra.mxu1 %v1329_v30 }
 0x354   :  { %v2014_v6 = vpop.f32.mrf.mxu1 }
 0x356   :  { %v2015_v32 = vpop.f32.mrf.mxu1 }
 0x357   :  { %v2016_v52 = vadd.f32 %v2015_v32, %v2014_v6 }
 0x359   :  { %v1441_v33 = vadd.f32 %v2016_v52, %v1941_v31 }
 0x35b   :  { %2035 = vtanh.f32 %v1441_v33 }
 0x368   :  { %v3917_v36 = vpop.eup %2035 }
 0x369   :  { %v1469_v37 = vadd.f32 2.0, %v3917_v36  ;;  %v1457_v46 = vmul.f32 0.5, %v3917_v36  ;;  %v1466_v48 = vsub.f32 %v2034_v34, %v3917_v36  ;;  %v1503_v50 = vsub.f32 %v3917_v36, %v2034_v34 }
 0x36b   :  { %v1470_v38 = vmul.f32 -2.0, %v1469_v37  ;;  %v1458_v47 = vmul.f32 1.442695, %v1457_v46  ;;  %v1468_v49 = vmul.f32 %v1466_v48, %v1466_v48  ;;  %v1505_v54 = vmul.f32 %v1503_v50, %v1503_v50 }
 0x36c   :  { %v1467_v0 = vmul.f32 2.0, %v1466_v48  ;;  %v1504_v3 = vmul.f32 2.0, %v1503_v50 }
 0x36d   :  { %v1471_v39 = vmul.f32 1.442695, %v1470_v38 }
 0x36e   :  { %v1478_v2 = vmul.f32 1.442695, %v1467_v0  ;;  %v1515_v8 = vmul.f32 1.442695, %v1504_v3 }
 0x36f   :  { %2037 = vpow2.f32 %v1471_v39 }
 0x370   :  { %2039 = vpow2.f32 %v1508_v29 }
 0x371   :  { %2041 = vpow2.f32 %v1449_v42 }
 0x372   :  { %2043 = vpow2.f32 %v1458_v47 }
 0x373   :  { %2045 = vpow2.f32 %v1478_v2 }
 0x374   :  { %2047 = vpow2.f32 %v1515_v8 }
 0x37c   :  { %v2038_v43 = vpop.eup %2037 }
 0x37d   :  { %1474 = vrot.lane.b32.xlu0 %v2038_v43, %s2084_s4  ;;  %v2040_v44 = vpop.eup %2039 }
 0x37e   :  { %v2042_v45 = vpop.eup %2041 }
 0x37f   :  { %v2044_v58 = vpop.eup %2043 }
 0x380   :  { %v2046_v13 = vpop.eup %2045 }
 0x381   :  { %1511 = vrot.lane.b32.xlu0 %v2040_v44, %s2084_s4  ;;  %v2048_v17 = vpop.eup %2047 }
 0x385   :  { %1452 = vrot.lane.b32.xlu0 %v2042_v45, %s2084_s4 }
 0x3ef   :  { %v1475_v51 = vpop.permute.xlu0 %1474 }
 0x3f0   :  { %v1477_v53 = vmul.f32 %v1475_v51, %v1468_v49 }
 0x3f2   :  { %1481 = vrot.lane.b32.xlu1 %v1477_v53, %s2085_s19 }
 0x3f3   :  { %v1512_v55 = vpop.permute.xlu0 %1511 }
 0x3f4   :  { %v1514_v57 = vmul.f32 %v1512_v55, %v1505_v54 }
 0x3f6   :  { %1518 = vrot.lane.b32.xlu1 %v1514_v57, %s2085_s19 }
 0x3f7   :  { %v1453_v60 = vpop.permute.xlu0 %1452 }
 0x3f8   :  { %v1455_v62 = vmul.f32 %v1453_v60, %v1445_v59 }
 0x3fa   :  { %1461 = vrot.lane.b32.xlu1 %v2044_v58, %s2084_s4  ;;  %v3930_v63 = vadd.f32 %v2034_v34, %v1455_v62 }
 0x3fc   :  { %v1549_v1 = vsub.f32 0.0, %v3930_v63  ;;  %v1562_v5 = vand.u32 2147483647, %v3930_v63  ;;  %v1946_v31 = vmul.f32 -1.442695, %v3930_v63  ;;  %v1561_v45 = vmax.f32 %v3930_v63, 0.0 }
 0x3fe   :  { %v1551_v7 = vand.u32 2147483647, %v1549_v1  ;;  %v1563_v9 = vsub.f32 0.0, %v1562_v5  ;;  %v1550_v47 = vmax.f32 %v1549_v1, 0.0 }
 0x400   :  { %v1552_v10 = vsub.f32 0.0, %v1551_v7  ;;  %v1564_v11 = vmul.f32 1.442695, %v1563_v9 }
 0x402   :  { %v1553_v12 = vmul.f32 1.442695, %v1552_v10  ;;  %2049 = vpow2.f32 %v1564_v11 }
 0x404   :  { %2051 = vpow2.f32 %v1553_v12 }
 0x40f   :  { %v2050_v25 = vpop.eup %2049 }
 0x410   :  { %v1566_v61 = vadd.f32 1.0, %v2050_v25 }
 0x411   :  { %v2052_v56 = vpop.eup %2051 }
 0x412   :  { %v1555_v6 = vadd.f32 1.0, %v2052_v56 }
 0x464   :  { %v1482_v14 = vpop.permute.xlu1 %1481 }
 0x465   :  { %v1484_v15 = vadd.f32 %v2046_v13, %v1482_v14 }
 0x467   :  { %v1943_v16 = vadd.f32 -1.0, %v1484_v15 }
 0x468   :  { %v1519_v18 = vpop.permute.xlu1 %1518 }
 0x469   :  { %v1486_v19 = vsub.f32 %v1943_v16, %v1467_v0  ;;  %v1521_v21 = vadd.f32 %v2048_v17, %v1519_v18 }
 0x46b   :  { %v1944_v23 = vadd.f32 -1.0, %v1521_v21  ;;  %1488 = vrot.lane.b32.xlu0 %v1486_v19, %s2084_s4 }
 0x46c   :  { %v1462_v24 = vpop.permute.xlu1 %1461 }
 0x46d   :  { %v1523_v26 = vsub.f32 %v1944_v23, %v1504_v3  ;;  %v1464_v27 = vmul.f32 %v1942_v22, %v1462_v24 }
 0x46f   :  { %v1465_v28 = vadd.f32 %v3917_v36, %v1464_v27  ;;  %1525 = vrot.lane.b32.xlu1 %v1523_v26, %s2084_s4 }
 0x471   :  { %v1945_v30 = vmul.f32 -1.442695, %v1465_v28  ;;  %v1593_v41 = vsub.f32 0.0, %v1465_v28  ;;  %v1606_v4 = vand.u32 2147483647, %v1465_v28  ;;  %v1605_v63 = vmax.f32 %v1465_v28, 0.0 }
 0x473   :  { %2053 = vpow2.f32 %v1945_v30  ;;  %v1595_v32 = vand.u32 2147483647, %v1593_v41  ;;  %v1607_v52 = vsub.f32 0.0, %v1606_v4  ;;  %v1594_v5 = vmax.f32 %v1593_v41, 0.0 }
 0x474   :  { %2055 = vlog2.f32 %v1566_v61 }
 0x475   :  { %v1596_v33 = vsub.f32 0.0, %v1595_v32  ;;  %v1608_v34 = vmul.f32 1.442695, %v1607_v52  ;;  %2057 = vlog2.f32 %v1555_v6 }
 0x476   :  { %2059 = vpow2.f32 %v1946_v31 }
 0x477   :  { %v1597_v35 = vmul.f32 1.442695, %v1596_v33  ;;  %2061 = vpow2.f32 %v1608_v34 }
 0x479   :  { %2063 = vpow2.f32 %v1597_v35 }
 0x480   :  { %v2054_v36 = vpop.eup %2053 }
 0x481   :  { %v2056_v37 = vpop.eup %2055  ;;  %v1546_v38 = vadd.f32 1.0, %v2054_v36 }
 0x482   :  { %v2058_v20 = vpop.eup %2057  ;;  %v1568_v42 = vmul.f32 0.6931472, %v2056_v37 }
 0x483   :  { %v2060_v39 = vpop.eup %2059  ;;  %2065 = vrcp.f32 %v1546_v38  ;;  %v1557_v40 = vmul.f32 0.6931472, %v2058_v20 }
 0x484   :  { %v2062_v29 = vpop.eup %2061  ;;  %v1590_v46 = vadd.f32 1.0, %v2060_v39  ;;  %v1569_v50 = vadd.f32 %v1568_v42, %v1561_v45 }
 0x485   :  { %v1610_v43 = vadd.f32 1.0, %v2062_v29  ;;  %v1558_v49 = vadd.f32 %v1557_v40, %v1550_v47 }
 0x486   :  { %v2064_v44 = vpop.eup %2063  ;;  %v1570_v53 = vsub.f32 0.0, %v1569_v50 }
 0x487   :  { %v1599_v48 = vadd.f32 1.0, %v2064_v44  ;;  %2067 = vlog2.f32 %v1610_v43  ;;  %v1559_v51 = vsub.f32 0.0, %v1558_v49 }
 0x488   :  { %v1571_v57 = vmax.f32 %v1570_v53, -100.0 }
 0x489   :  { %2069 = vlog2.f32 %v1599_v48  ;;  %v1560_v55 = vmax.f32 %v1559_v51, -100.0 }
 0x48a   :  { %2071 = vrcp.f32 %v1590_v46 }
 0x490   :  { %v2066_v54 = vpop.eup %2065 }
 0x491   :  { %v1573_v58 = vsub.f32 1.0, %v2066_v54  ;;  %v1572_v59 = vmul.f32 %v2066_v54, %v1560_v55 }
 0x493   :  { %v1574_v60 = vmul.f32 %v1573_v58, %v1571_v57 }
 0x494   :  { %v2068_v62 = vpop.eup %2067 }
 0x495   :  { %v1575_v0 = vadd.f32 %v1574_v60, %v1572_v59  ;;  %v1612_v2 = vmul.f32 0.6931472, %v2068_v62 }
 0x496   :  { %v2070_v1 = vpop.eup %2069 }
 0x497   :  { %v1576_v3 = vsel %vm1491_vm0, %v1575_v0, 0.0  ;;  %v1601_v7 = vmul.f32 0.6931472, %v2070_v1  ;;  %v1613_v8 = vadd.f32 %v1612_v2, %v1605_v63  ;;  %v2072_v9 = vpop.eup %2071 }
 0x498   :  { %1577 = vadd.xlane.f32.xlu0 %v1576_v3  ;;  %v1617_v14 = vsub.f32 1.0, %v2072_v9 }
 0x499   :  { %v1602_v10 = vadd.f32 %v1601_v7, %v1594_v5  ;;  %v1614_v11 = vsub.f32 0.0, %v1613_v8 }
 0x49b   :  { %v1603_v12 = vsub.f32 0.0, %v1602_v10  ;;  %v1615_v13 = vmax.f32 %v1614_v11, -100.0 }
 0x49d   :  { %v1604_v15 = vmax.f32 %v1603_v12, -100.0  ;;  %v1618_v16 = vmul.f32 %v1617_v14, %v1615_v13 }
 0x49f   :  { %v1616_v17 = vmul.f32 %v2072_v9, %v1604_v15 }
 0x4a1   :  { %v1619_v18 = vadd.f32 %v1618_v16, %v1616_v17 }
 0x4a3   :  { %v1620_v24 = vsel %vm1491_vm0, %v1619_v18, 0.0 }
 0x4dd   :  { %v1489_v19 = vpop.permute.xlu0 %1488 }
 0x4de   :  { %v1492_v21 = vsel %vm1491_vm0, %v1489_v19, 0.0 }
 0x4df   :  { %1493 = vadd.xlane.f32.xlu0 %v1492_v21 }
 0x4e1   :  { %v1526_v22 = vpop.permute.xlu1 %1525 }
 0x4e2   :  { %v1528_v23 = vsel %vm1491_vm0, %v1526_v22, 0.0 }
 0x4e3   :  { %1529 = vadd.xlane.f32.xlu1 %v1528_v23  ;;  %1621 = vadd.xlane.f32.xlu0 %v1620_v24 }
 0x521   :  { %v1578_v25 = vpop.xlane.xlu0 %1577 }
 0x522   :  { %v1579_v26 = vrot.slane %v1578_v25, 4 }
 0x524   :  { %v1580_v27 = vadd.f32 %v1579_v26, %v1578_v25 }
 0x526   :  { %v1581_v30 = vrot.slane %v1580_v27, 2 }
 0x528   :  { %v1582_v35 = vadd.f32 %v1581_v30, %v1580_v27 }
 0x52a   :  { %v1583_v40 = vrot.slane %v1582_v35, 1 }
 0x52c   :  { %v1584_v46 = vadd.f32 %v1583_v40, %v1582_v35 }
 0x568   :  { %v1494_v56 = vpop.xlane.xlu0 %1493 }
 0x569   :  { %v1495_v28 = vrot.slane %v1494_v56, 4 }
 0x56b   :  { %v1496_v61 = vadd.f32 %v1495_v28, %v1494_v56 }
 0x56c   :  { %v1530_v41 = vpop.xlane.xlu1 %1529  ;;  %v1622_v4 = vpop.xlane.xlu0 %1621 }
 0x56d   :  { %v1497_v6 = vrot.slane %v1496_v61, 2  ;;  %v1531_v31 = vrot.slane %v1530_v41, 4  ;;  %v1623_v32 = vrot.slane %v1622_v4, 4 }
 0x56f   :  { %v1532_v52 = vadd.f32 %v1531_v31, %v1530_v41  ;;  %v1624_v33 = vadd.f32 %v1623_v32, %v1622_v4  ;;  %v1498_v34 = vadd.f32 %v1497_v6, %v1496_v61 }
 0x571   :  { %v1533_v36 = vrot.slane %v1532_v52, 2  ;;  %v1625_v37 = vrot.slane %v1624_v33, 2  ;;  %v1499_v38 = vrot.slane %v1498_v34, 1 }
 0x573   :  { %v1534_v20 = vadd.f32 %v1533_v36, %v1532_v52  ;;  %v1626_v39 = vadd.f32 %v1625_v37, %v1624_v33  ;;  %v1500_v29 = vadd.f32 %v1499_v38, %v1498_v34 }
 0x575   :  { %2017 = vpush %v1500_v29  ;;  %v1535_v42 = vrot.slane %v1534_v20, 1  ;;  %v1627_v43 = vrot.slane %v1626_v39, 1 }
 0x577   :  { %v1536_v44 = vadd.f32 %v1535_v42, %v1534_v20  ;;  %v1628_v45 = vadd.f32 %v1627_v43, %v1626_v39 }
 0x579   :  { %2019 = vpush %v1536_v44 }
 0x57a   :  { %2021 = vpush %v1584_v46 }
 0x57b   :  { %2023 = vpush %v1628_v45 }
 0x5a6   :  { %s2018_s5 = spop %2017 }
 0x5a7   :  { %s1502_s23 = smul.f32 0.5, %s2018_s5 }
 0x5aa   :  { %s2020_s24 = spop %2019 }
 0x5ab   :  { %s1538_s25 = smul.f32 0.5, %s2020_s24  ;;  %s2022_s26 = spop %2021 }
 0x5ac   :  { %s1586_s27 = ssub.f32 0.0, %s2022_s26  ;;  %s2024_s28 = spop %2023 }
 0x5ad   :  { %s1539_s29 = sadd.f32 %s1538_s25, %s1502_s23 }
 0x5ae   :  { %s1630_s30 = ssub.f32 0.0, %s2024_s28 }
 0x5af   :  { %s1542_s7 = smul.f32 0.5, %s1539_s29 }
 0x5b0   :  { %s1631_s8 = sadd.f32 %s1630_s30, %s1586_s27 }
 0x5b2   :  { %s1632_s9 = ssub.f32 %s1631_s8, %s1542_s7 }
 0x5b4   :  { %1634 = sst [smem:[#allocation2]] %s1632_s9 }
 0x5b5   :  { %1642 = dma.smem_to_hbm %s2086_s10, 16, %s3955_s6, [#allocation3]  }
 0x5b6   :  { %2081 = dma.done.wait [#allocation3], 16  }
 0x5b7   :  { %2082 = vsyncadd [#allocation3], 4294967280 }
 0x5b8   :  { %1646 = sfence }
 0x5b9   :  { %1647 = vsyncpa [#allocation3], 1 }

</bundles_post_ra>
